<compile_context>
chip_gen: v5e
topology: v5e:2x2
jax: 0.10.0
libtpu: 0.0.40
codegen_flags: <defaults>
</compile_context>

<pallas_src>
import math
import functools

import numpy as np
import jax
import jax.numpy as jnp
from jax import lax
from jax.experimental import pallas as pl
from jax.experimental.pallas import tpu as pltpu

# ---------------- small, consistent config ----------------
BATCH = 4            # total samples
BB = 2               # samples per grid step  (grid = BATCH//BB = 2 -> both v7x TCs busy)
WIN = 8              # win_size (sequence length L); divisible by every patch size
ENC_IN = 4           # M (number of input channels) == `channel` used by DAC reduce
D_MODEL = 32
N_HEADS = 1
E_LAYERS = 2
PATCH_SIZE = (2, 4)
NUM_MAPS = 2 * E_LAYERS * len(PATCH_SIZE)     # {series, prior} x layers x patch sizes
LANES = NUM_MAPS * WIN * WIN                  # 512 lane-dense output per sample

# branch table: (patch_idx, is_prior, seq_len, in_chan, im2col column offset)
BRANCHES = []
_col = 0
for _pi, _p in enumerate(PATCH_SIZE):
    _n = WIN // _p
    BRANCHES.append((_pi, 0, _n, _p, _col)); _col += 3 * _p      # series (x_patch_size)
    BRANCHES.append((_pi, 1, _p, _n, _col)); _col += 3 * _n      # prior  (x_patch_num)
C_TOT = _col                                   # 36 im2col columns (block-structured)
NB = len(BRANCHES)                             # 4 branches
K_MAX = max(b[2] for b in BRANCHES)            # 4 (uniform, padded block size)
ROWS = K_MAX * BB * NB * ENC_IN                # 128 rows per grid step
QK_W = 2 * D_MODEL * E_LAYERS                  # 128 = [Q_l0|K_l0|Q_l1|K_l1]
assert ROWS == QK_W                            # lets us stack bias_big & mask into one slab


def _row_idx(i, s, u, c):
    """Row index within one grid step for (position i, sample s, branch u, channel c)."""
    return ((i * BB + s) * NB + u) * ENC_IN + c


# ============================================================
# Host-side linearization of the `Convolution` module (pre-sigmoid).
# The module is affine in its (win, win) input map, so it is probed once at init
# and folded (together with the repeat/tile upsampling and the channel mean, which
# commute with it) into one (k, k, win*win) tensor per (layer, patch, branch).
# ============================================================
def _conv_pre_np(X, cp):
    """Pre-sigmoid output of `Convolution.forward` for one (win, win) map (NumPy)."""
    w1, b1 = cp['w1'], cp['b1']
    w2, b2 = cp['w2'], cp['b2']
    w3, b3 = cp['w3'], cp['b3']
    wp, bp = cp['wp'], cp['bp']
    W = X.shape[1]
    x1 = w1 @ X + b1                                                   # pointconv1, k=1
    x2 = sum(w2[k] @ X[:, k:k + W - 2] for k in range(3)) + b2         # pointconv2, k=3, valid
    x3 = sum(w3[k] @ X[:, k:k + W - 4] for k in range(5)) + b3         # pointconv3, k=5, valid
    xcat = np.concatenate([x1, x2, x3], axis=1)                        # (win, 3W - 6)
    xpad = np.concatenate([np.zeros((X.shape[0], 3), np.float32), xcat,
                           np.zeros((X.shape[0], 3), np.float32)], axis=1)   # proj padding=3
    out = np.zeros((X.shape[0], W), np.float32)
    for t in range(W):                                                 # proj: stride=3, dilation=2
        out[:, t] = bp[:, 0] + wp[0] @ xpad[:, 3 * t] + wp[1] @ xpad[:, 3 * t + 2]
    return out


def _linearize_upsample_conv(cp, k, upsample_fn):
    """F[i, j, :] = vec(Conv(upsample(E_ij)) - Conv(0)); shape (k, k, win*win)."""
    base = _conv_pre_np(np.zeros((WIN, WIN), np.float32), cp)
    F = np.zeros((k, k, WIN * WIN), np.float32)
    for i in range(k):
        for j in range(k):
            e = np.zeros((k, k), np.float32)
            e[i, j] = 1.0
            F[i, j] = (_conv_pre_np(upsample_fn(e), cp) - base).reshape(-1)
    return F


# ============================================================
# parameter init (deterministic, synthetic); all constants pre-folded here
# ============================================================
def sinusoidal_pe(max_len, d_model):
    pos = np.arange(max_len, dtype=np.float32)[:, None]
    div = np.exp(np.arange(0, d_model, 2, dtype=np.float32) * -(math.log(10000.0) / d_model))
    pe = np.zeros((max_len, d_model), np.float32)
    pe[:, 0::2] = np.sin(pos * div)
    pe[:, 1::2] = np.cos(pos * div)
    return jnp.asarray(pe)


def init_params(key):
    def nrm(k, shape, scale=0.1):
        return scale * jax.random.normal(k, shape, dtype=jnp.float32)

    keys = iter(jax.random.split(key, 64))
    d = D_MODEL
    params = {'pe': sinusoidal_pe(WIN, d)}

    # TokenEmbedding Conv1d weights (torch layout (d, c_in, 3)), pre-flattened for im2col.
    params['wf_ps'], params['wf_pn'] = [], []
    for p in PATCH_SIZE:
        n = WIN // p
        w_ps = nrm(next(keys), (d, p, 3))
        w_pn = nrm(next(keys), (d, n, 3))
        params['wf_ps'].append(jnp.transpose(w_ps, (2, 1, 0)).reshape(3 * p, d))
        params['wf_pn'].append(jnp.transpose(w_pn, (2, 1, 0)).reshape(3 * n, d))

    # Q/K projections + per-layer Convolution blocks
    d_keys = d // N_HEADS
    wq_l, bq_l, wk_l, bk_l, convs = [], [], [], [], []
    for _ in range(E_LAYERS):
        wq_l.append(nrm(next(keys), (d, d_keys * N_HEADS)))
        bq_l.append(nrm(next(keys), (1, d_keys * N_HEADS)))
        wk_l.append(nrm(next(keys), (d, d_keys * N_HEADS)))
        bk_l.append(nrm(next(keys), (1, d_keys * N_HEADS)))
        convs.append({
            'w1': nrm(next(keys), (WIN, WIN)), 'b1': nrm(next(keys), (WIN, 1)),
            'w2': nrm(next(keys), (3, WIN, WIN)), 'b2': nrm(next(keys), (WIN, 1)),
            'w3': nrm(next(keys), (5, WIN, WIN)), 'b3': nrm(next(keys), (WIN, 1)),
            'wp': nrm(next(keys), (2, WIN, WIN)), 'bp': nrm(next(keys), (WIN, 1)),
        })
    params['wq'] = jnp.concatenate(wq_l, axis=1)      # (d, E_LAYERS*d)  (reference use)
    params['bq'] = jnp.concatenate(bq_l, axis=1)
    params['wk'] = jnp.concatenate(wk_l, axis=1)
    params['bk'] = jnp.concatenate(bk_l, axis=1)
    params['convs'] = convs

    # ------- packed kernel constants (all folding done once, host-side NumPy) -------
    wqk = np.concatenate(
        [np.concatenate([np.asarray(wq_l[l]), np.asarray(wk_l[l])], axis=1)
         for l in range(E_LAYERS)], axis=1)                        # (32, 128) [Q0|K0|Q1|K1]
    bqk = np.concatenate(
        [np.concatenate([np.asarray(bq_l[l]), np.asarray(bk_l[l])], axis=1)
         for l in range(E_LAYERS)], axis=1)                        # (1, 128)

    # block-stacked token-embedding weights, composed with Wqk -> one matmul in kernel
    w_emb = np.zeros((C_TOT, d), np.float32)
    for (pi, is_prior, seq, cin, off) in BRANCHES:
        w = params['wf_pn'][pi] if is_prior else params['wf_ps'][pi]
        w_emb[off:off + 3 * cin] = np.asarray(w)
    params['w_big'] = jnp.asarray(w_emb @ wqk, dtype=jnp.bfloat16)  # (36, 128)

    # per-row PE@Wqk + bias, and the additive block-diagonal softmax mask
    pe_np = np.asarray(params['pe'])
    bias_big = np.zeros((ROWS, QK_W), np.float32)
    mask = np.full((ROWS, ROWS), -1e30, np.float32)
    for i in range(K_MAX):
        for s in range(BB):
            for u, (pi, is_prior, seq, cin, off) in enumerate(BRANCHES):
                for c in range(ENC_IN):
                    r = _row_idx(i, s, u, c)
                    bias_big[r] = pe_np[i] @ wqk + bqk[0]
                    for j in range(seq):                 # attend only to own real block
                        mask[r, _row_idx(j, s, u, c)] = 0.0
    params['cf32'] = jnp.asarray(np.stack([bias_big, mask], axis=0))   # (2, 128, 128) f32

    # pre-folded (channel-mean + repeat/tile + Convolution) operators
    fold_series, fold_prior, base_conv = {}, {}, []
    for l in range(E_LAYERS):
        cp_np = {k_: np.asarray(v) for k_, v in convs[l].items()}
        base_conv.append(_conv_pre_np(np.zeros((WIN, WIN), np.float32), cp_np))
        for pi, p in enumerate(PATCH_SIZE):
            n = WIN // p
            fold_series[(pi, l)] = _linearize_upsample_conv(
                cp_np, n, lambda a, p=p: np.repeat(np.repeat(a, p, axis=0), p, axis=1))
            fold_prior[(pi, l)] = _linearize_upsample_conv(
                cp_np, p, lambda a, n=n: np.tile(a, (n, n)))

    # rcat[i, l*ROWS + q, :] = G_{branch(q)}[i, j(q), :]/M  placed in that map's 64 lanes
    rcat = np.zeros((K_MAX, E_LAYERS * ROWS, LANES), np.float32)
    for i in range(K_MAX):
        for l in range(E_LAYERS):
            for s in range(BB):
                for u, (pi, is_prior, seq, cin, off) in enumerate(BRANCHES):
                    if i >= seq:
                        continue                        # padded row positions contribute 0
                    G = fold_prior[(pi, l)] if is_prior else fold_series[(pi, l)]
                    m = (pi * E_LAYERS + l) * 2 + is_prior
                    for c in range(ENC_IN):
                        for j in range(seq):
                            q = _row_idx(j, s, u, c)
                            rcat[i, l * ROWS + q, m * WIN * WIN:(m + 1) * WIN * WIN] = \
                                G[i, j] / ENC_IN
    params['rcat'] = jnp.asarray(rcat, dtype=jnp.bfloat16)             # (4, 256, 512)

    # per-sample row-sum selector (0/1, exact in bf16)
    lsum = np.zeros((BB, ROWS), np.float32)
    for r in range(ROWS):
        lsum[(r // (NB * ENC_IN)) % BB, r] = 1.0
    params['lsum'] = jnp.asarray(lsum, dtype=jnp.bfloat16)             # (2, 128)

    # Convolution output for an all-zero map (the affine bias), one 64-lane slot per map
    bout = np.zeros((1, LANES), np.float32)
    for m in range(NUM_MAPS):
        l = (m // 2) % E_LAYERS
        bout[0, m * WIN * WIN:(m + 1) * WIN * WIN] = base_conv[l].reshape(-1)
    params['bias_out'] = jnp.asarray(bout)                             # (1, 512)
    return params


# ============================================================
# The single fused Pallas kernel: one grid step == BB batch samples.
# ============================================================
def _frect_fused_kernel(x_ref, cf_ref, wbig_ref, rcat_ref, lsum_ref, bout_ref, o_ref, *,
                        n_layers, k_max, rows, d_model, scale):
    x = x_ref[...]                                   # (128, 36) bf16  (im2col, block-structured)
    w_big = wbig_ref[...]                            # (36, 128) bf16  (emb -> [Q0|K0|Q1|K1])
    bias_big = cf_ref[0]                             # (128, 128) f32  (PE@Wqk + bqk per row)
    mask = cf_ref[1]                                 # (128, 128) f32  (block-diag attention mask)
    lsum = lsum_ref[...]                             # (BB, 128) bf16  (per-sample row sum)
    bias_out = bout_ref[...]                         # (1, 512)  f32   (Convolution bias)

    # token Conv1d embedding + PE + both layers' Q/K projections in ONE matmul
    qk = jnp.dot(x, w_big, preferred_element_type=jnp.float32) + bias_big   # (128, 128) f32

    # per-layer block-diagonal-masked attention over all (sample, branch, channel) blocks
    probs = []
    for l in range(n_layers):
        q = qk[:, 2 * l * d_model:(2 * l + 1) * d_model].astype(jnp.bfloat16)
        k = qk[:, (2 * l + 1) * d_model:(2 * l + 2) * d_model].astype(jnp.bfloat16)
        s = lax.dot_general(q, k, (((1,), (1,)), ((), ())),
                            preferred_element_type=jnp.float32)             # (128, 128)
        s = s * scale + mask
        s = s - jnp.max(s, axis=-1, keepdims=True)
        e = jnp.exp(s)
        p = e * pl.reciprocal(jnp.sum(e, axis=-1, keepdims=True), approx=True)   # EUP divide
        probs.append(p.astype(jnp.bfloat16))
    p_cat = jnp.concatenate(probs, axis=1)           # (128, 256) bf16: [P_layer0 | P_layer1]

    # pre-folded repeat/tile + channel-mean + Convolution: one matmul per position block
    blk = rows // k_max                              # 32 rows per position block
    z_blocks = [jnp.dot(p_cat[i * blk:(i + 1) * blk, :], rcat_ref[i],
                        preferred_element_type=jnp.float32)                 # (32, 512)
                for i in range(k_max)]
    z = jnp.concatenate(z_blocks, axis=0).astype(jnp.bfloat16)              # (128, 512)

    # per-sample row sum + Convolution bias, then ONE exact sigmoid on the lane-dense slab
    out = jnp.dot(lsum, z, preferred_element_type=jnp.float32) + bias_out   # (BB, 512)
    o_ref[...] = 1.0 / (1.0 + jnp.exp(-out))         # exact reciprocal keeps outputs <= 1.0


# ============================================================
# FreCT forward: host-side normalization/im2col glue + ONE pallas_call
# ============================================================
def frect_forward(x, params):
    """x: (B, L=win_size, M=enc_in) float32 -> (series_list, prior_list)."""
    B, L, M = x.shape
    G = B // BB
    # TODO(synk): RevIN is instantiated in the reference forward but never applied; skipped.
    # TODO(synk): x_ori = embedding_window_size(x) and self.projection never feed the returned
    #             attention maps in the reference; dropped here as dead work.

    means = jnp.mean(x, axis=1, keepdims=True)
    xz = x - means
    stdev = jnp.sqrt(jnp.var(xz, axis=1, keepdims=True) + 1e-5)        # unbiased=False
    xz = xz / stdev
    x_t = jnp.transpose(xz, (0, 2, 1))                                 # 'b l m -> b m l'

    def im2col(xs):                                                    # (B,M,S,C) -> (B,M,S,3C)
        S = xs.shape[2]
        xpad = jnp.concatenate([xs[:, :, -1:, :], xs, xs[:, :, :1, :]], axis=2)  # circular pad
        return jnp.concatenate([xpad[:, :, j:j + S, :] for j in range(3)], axis=-1)

    # one block-structured data slab per step: rows ordered (position i, sample, branch, chan)
    pieces = []
    for (pi, is_prior, seq, cin, off) in BRANCHES:
        imc = im2col(x_t.reshape(B, M, seq, cin))                      # (B, M, seq, 3*cin)
        imc = jnp.pad(imc, ((0, 0), (0, 0), (0, K_MAX - seq), (off, C_TOT - off - 3 * cin)))
        pieces.append(imc)                                             # (B, M, K_MAX, C_TOT)
    data = jnp.stack(pieces, axis=0)                                   # (NB, B, M, K_MAX, C)
    data = data.reshape(NB, G, BB, M, K_MAX, C_TOT)
    data = jnp.transpose(data, (1, 4, 2, 0, 3, 5))                     # (G, i, s, u, c, C)
    data = data.reshape(G * ROWS, C_TOT).astype(jnp.bfloat16)

    kernel = functools.partial(
        _frect_fused_kernel, n_layers=E_LAYERS, k_max=K_MAX, rows=ROWS,
        d_model=D_MODEL, scale=1.0 / math.sqrt(D_MODEL // N_HEADS))

    out = pl.pallas_call(
        kernel,
        out_shape=jax.ShapeDtypeStruct((G, BB, LANES), jnp.float32),
        grid=(G,),
        in_specs=[
            pl.BlockSpec((ROWS, C_TOT), lambda g: (g, 0)),                        # data slab
            pl.BlockSpec((2, ROWS, QK_W), lambda g: (0, 0, 0)),                   # bias_big+mask
            pl.BlockSpec((C_TOT, QK_W), lambda g: (0, 0)),                        # folded weights
            pl.BlockSpec((K_MAX, E_LAYERS * ROWS, LANES), lambda g: (0, 0, 0)),   # fold operators
            pl.BlockSpec((BB, ROWS), lambda g: (0, 0)),                           # row-sum select
            pl.BlockSpec((1, LANES), lambda g: (0, 0)),                           # conv bias
        ],
        out_specs=pl.BlockSpec((None, BB, LANES), lambda g: (g, 0, 0)),           # lane-dense out
        compiler_params=pltpu.CompilerParams(dimension_semantics=("parallel",)),
    )(data, params['cf32'], params['w_big'], params['rcat'],
      params['lsum'], params['bias_out'])

    maps = out.reshape(B, NUM_MAPS, L, L)
    series_list, prior_list = [], []
    for pi in range(len(PATCH_SIZE)):
        for l in range(E_LAYERS):
            base = (pi * E_LAYERS + l) * 2
            series_list.append(maps[:, base][:, :, None, :])           # (B, L, 1, L)
            prior_list.append(maps[:, base + 1][:, :, None, :])
    return series_list, prior_list


# ============================================================
# Unfused NumPy port of the original forward (attention -> repeat/tile ->
# channel mean -> Convolution -> sigmoid) used only as a correctness cross-check.
# ============================================================
def _reference_forward_np(x, params):
    x = np.asarray(x, np.float32)
    B, L, M = x.shape
    pe = np.asarray(params['pe'], np.float32)
    wq_s = np.asarray(params['wq'], np.float32)
    bq_s = np.asarray(params['bq'], np.float32)
    wk_s = np.asarray(params['wk'], np.float32)
    bk_s = np.asarray(params['bk'], np.float32)
    scale = 1.0 / math.sqrt(D_MODEL // N_HEADS)

    means = x.mean(axis=1, keepdims=True)
    xz = x - means
    stdev = np.sqrt(xz.var(axis=1, keepdims=True) + 1e-5)
    xz = xz / stdev
    x_t = np.transpose(xz, (0, 2, 1))

    def embed(xs, wf, pe_s):
        _, S, _ = xs.shape
        xpad = np.concatenate([xs[:, -1:, :], xs, xs[:, :1, :]], axis=1)
        xcol = np.concatenate([xpad[:, j:j + S, :] for j in range(3)], axis=-1)
        return xcol @ wf + pe_s[None]

    def softmax(s):
        s = s - s.max(axis=-1, keepdims=True)
        e = np.exp(s)
        return e / e.sum(axis=-1, keepdims=True)

    series_list, prior_list = [], []
    for pi, p in enumerate(PATCH_SIZE):
        n = L // p
        emb_ps = embed(x_t.reshape(B * M, n, p), np.asarray(params['wf_ps'][pi], np.float32), pe[:n])
        emb_pn = embed(x_t.reshape(B * M, p, n), np.asarray(params['wf_pn'][pi], np.float32), pe[:p])
        for l in range(E_LAYERS):
            wq = wq_s[:, l * D_MODEL:(l + 1) * D_MODEL]
            bq = bq_s[:, l * D_MODEL:(l + 1) * D_MODEL]
            wk = wk_s[:, l * D_MODEL:(l + 1) * D_MODEL]
            bk = bk_s[:, l * D_MODEL:(l + 1) * D_MODEL]

            def attn(e):
                q = e @ wq + bq
                k = e @ wk + bk
                return softmax(np.einsum('bid,bjd->bij', q, k) * scale)

            a_ps = attn(emb_ps)
            a_pn = attn(emb_pn)
            series = np.repeat(np.repeat(a_ps, p, axis=1), p, axis=2)
            prior = np.tile(a_pn, (1, n, n))
            series = series.reshape(B, M, L, L).mean(axis=1)
            prior = prior.reshape(B, M, L, L).mean(axis=1)
            cp = {k_: np.asarray(v, np.float32) for k_, v in params['convs'][l].items()}
            s_out = np.stack([_conv_pre_np(series[b], cp) for b in range(B)])
            p_out = np.stack([_conv_pre_np(prior[b], cp) for b in range(B)])
            series_list.append(1.0 / (1.0 + np.exp(-s_out)))
            prior_list.append(1.0 / (1.0 + np.exp(-p_out)))
    return series_list, prior_list


if __name__ == "__main__":
    key = jax.random.PRNGKey(0)
    pkey, xkey = jax.random.split(key)
    params = init_params(pkey)
    x = jax.random.normal(xkey, (BATCH, WIN, ENC_IN), dtype=jnp.float32)

    fwd = jax.jit(frect_forward)
    series_list, prior_list = fwd(x, params)
    jax.block_until_ready(series_list)
    jax.block_until_ready(prior_list)

    assert len(series_list) == E_LAYERS * len(PATCH_SIZE)
    assert len(prior_list) == E_LAYERS * len(PATCH_SIZE)
    assert all(t.shape == (BATCH, WIN, 1, WIN) for t in series_list + prior_list)
    assert all(bool(jnp.all(jnp.isfinite(t))) for t in series_list + prior_list)
    assert all(bool(jnp.all((t >= 0.0) & (t <= 1.0))) for t in series_list + prior_list)

    # cross-check the fused / pre-folded bf16 kernel against the unfused f32 reference
    ref_series, ref_prior = _reference_forward_np(np.asarray(x), params)
    for got, ref in zip(series_list + prior_list, ref_series + ref_prior):
        err = float(np.max(np.abs(np.asarray(got)[:, :, 0, :] - ref)))
        assert err < 2e-2, f"kernel/reference mismatch: max abs err {err}"
    print("KERNEL_OK")
</pallas_src>

<mosaic_0001>
module attributes {stable_mosaic.version = 11 : i64} {
  func.func @_frect_fused_kernel(%arg0: i32, %arg1: memref<128x36xbf16, #tpu.memory_space<vmem>>, %arg2: memref<2x128x128xf32, #tpu.memory_space<vmem>>, %arg3: memref<36x128xbf16, #tpu.memory_space<vmem>>, %arg4: memref<4x256x512xbf16, #tpu.memory_space<vmem>>, %arg5: memref<2x128xbf16, #tpu.memory_space<vmem>>, %arg6: memref<1x512xf32, #tpu.memory_space<vmem>>, %arg7: memref<1x2x512xf32, #tpu.memory_space<vmem>>) attributes {dimension_semantics = [#tpu.dimension_semantics<parallel>], iteration_bounds = array<i64: 2>, scalar_prefetch = 0 : i64, scratch_operands = 0 : i64, tpu.core_type = #tpu.core_type<tc>, window_params = [{transform_indices = @transform_0, window_bounds = array<i64: 128, 36>}, {pipeline_mode = #tpu.pipeline_mode<synchronous>, transform_indices = @transform_1, window_bounds = array<i64: 2, 128, 128>}, {pipeline_mode = #tpu.pipeline_mode<synchronous>, transform_indices = @transform_2, window_bounds = array<i64: 36, 128>}, {pipeline_mode = #tpu.pipeline_mode<synchronous>, transform_indices = @transform_3, window_bounds = array<i64: 4, 256, 512>}, {pipeline_mode = #tpu.pipeline_mode<synchronous>, transform_indices = @transform_4, window_bounds = array<i64: 2, 128>}, {pipeline_mode = #tpu.pipeline_mode<synchronous>, transform_indices = @transform_5, window_bounds = array<i64: 1, 512>}, {transform_indices = @transform_6, window_bounds = array<i64: 1, 2, 512>}]} {
    %c0 = arith.constant 0 : index
    %c0_0 = arith.constant 0 : index
    %0 = vector.load %arg1[%c0, %c0_0] : memref<128x36xbf16, #tpu.memory_space<vmem>>, vector<128x36xbf16>
    %c0_1 = arith.constant 0 : index
    %c0_2 = arith.constant 0 : index
    %1 = vector.load %arg3[%c0_1, %c0_2] : memref<36x128xbf16, #tpu.memory_space<vmem>>, vector<36x128xbf16>
    %c0_3 = arith.constant 0 : index
    %c0_4 = arith.constant 0 : index
    %c0_5 = arith.constant 0 : index
    %2 = vector.load %arg2[%c0_3, %c0_4, %c0_5] : memref<2x128x128xf32, #tpu.memory_space<vmem>>, vector<1x128x128xf32>
    %3 = vector.shape_cast %2 : vector<1x128x128xf32> to vector<128x128xf32>
    %c1 = arith.constant 1 : index
    %c0_6 = arith.constant 0 : index
    %c0_7 = arith.constant 0 : index
    %4 = vector.load %arg2[%c1, %c0_6, %c0_7] : memref<2x128x128xf32, #tpu.memory_space<vmem>>, vector<1x128x128xf32>
    %5 = vector.shape_cast %4 : vector<1x128x128xf32> to vector<128x128xf32>
    %c0_8 = arith.constant 0 : index
    %c0_9 = arith.constant 0 : index
    %6 = vector.load %arg5[%c0_8, %c0_9] : memref<2x128xbf16, #tpu.memory_space<vmem>>, vector<2x128xbf16>
    %c0_10 = arith.constant 0 : index
    %c0_11 = arith.constant 0 : index
    %7 = vector.load %arg6[%c0_10, %c0_11] : memref<1x512xf32, #tpu.memory_space<vmem>>, vector<1x512xf32>
    %cst = arith.constant dense<0.000000e+00> : vector<128x128xf32>
    %8 = tpu.matmul %0, %1, %cst {dimension_numbers = #tpu.dot_dimension_numbers<[1], [0], [0], [1], [0, 0, 1, 1], [], []>} : vector<128x36xbf16>, vector<36x128xbf16>, vector<128x128xf32> -> vector<128x128xf32>
    %9 = arith.addf %8, %3 : vector<128x128xf32>
    %10 = vector.extract_strided_slice %9 {offsets = [0, 0], sizes = [128, 32], strides = [1, 1]} : vector<128x128xf32> to vector<128x32xf32>
    %11 = arith.truncf %10 : vector<128x32xf32> to vector<128x32xbf16>
    %12 = vector.extract_strided_slice %9 {offsets = [0, 32], sizes = [128, 32], strides = [1, 1]} : vector<128x128xf32> to vector<128x32xf32>
    %13 = arith.truncf %12 : vector<128x32xf32> to vector<128x32xbf16>
    %cst_12 = arith.constant dense<0.000000e+00> : vector<128x128xf32>
    %14 = tpu.matmul %11, %13, %cst_12 {dimension_numbers = #tpu.dot_dimension_numbers<[1], [1], [0], [0], [0, 0, 1, 0], [], []>} : vector<128x32xbf16>, vector<128x32xbf16>, vector<128x128xf32> -> vector<128x128xf32>
    %cst_13 = arith.constant 0.176776692 : f32
    %15 = vector.broadcast %cst_13 : f32 to vector<128x128xf32>
    %16 = arith.mulf %14, %15 : vector<128x128xf32>
    %17 = arith.addf %16, %5 : vector<128x128xf32>
    %cst_14 = arith.constant dense<0xFF800000> : vector<128xf32>
    %18 = vector.multi_reduction <maximumf>, %17, %cst_14 [1] : vector<128x128xf32> to vector<128xf32>
    %19 = vector.shape_cast %18 : vector<128xf32> to vector<128x1xf32>
    %20 = vector.broadcast %19 : vector<128x1xf32> to vector<128x128xf32>
    %21 = arith.subf %17, %20 : vector<128x128xf32>
    %22 = math.exp %21 : vector<128x128xf32>
    %cst_15 = arith.constant dense<0.000000e+00> : vector<128xf32>
    %23 = vector.multi_reduction <add>, %22, %cst_15 [1] : vector<128x128xf32> to vector<128xf32>
    %24 = vector.shape_cast %23 : vector<128xf32> to vector<128x1xf32>
    %25 = tpu.reciprocal %24 {approx = true} : vector<128x1xf32> -> vector<128x1xf32>
    %26 = vector.broadcast %25 : vector<128x1xf32> to vector<128x128xf32>
    %27 = arith.mulf %22, %26 : vector<128x128xf32>
    %28 = arith.truncf %27 : vector<128x128xf32> to vector<128x128xbf16>
    %29 = vector.extract_strided_slice %9 {offsets = [0, 64], sizes = [128, 32], strides = [1, 1]} : vector<128x128xf32> to vector<128x32xf32>
    %30 = arith.truncf %29 : vector<128x32xf32> to vector<128x32xbf16>
    %31 = vector.extract_strided_slice %9 {offsets = [0, 96], sizes = [128, 32], strides = [1, 1]} : vector<128x128xf32> to vector<128x32xf32>
    %32 = arith.truncf %31 : vector<128x32xf32> to vector<128x32xbf16>
    %cst_16 = arith.constant dense<0.000000e+00> : vector<128x128xf32>
    %33 = tpu.matmul %30, %32, %cst_16 {dimension_numbers = #tpu.dot_dimension_numbers<[1], [1], [0], [0], [0, 0, 1, 0], [], []>} : vector<128x32xbf16>, vector<128x32xbf16>, vector<128x128xf32> -> vector<128x128xf32>
    %cst_17 = arith.constant 0.176776692 : f32
    %34 = vector.broadcast %cst_17 : f32 to vector<128x128xf32>
    %35 = arith.mulf %33, %34 : vector<128x128xf32>
    %36 = arith.addf %35, %5 : vector<128x128xf32>
    %cst_18 = arith.constant dense<0xFF800000> : vector<128xf32>
    %37 = vector.multi_reduction <maximumf>, %36, %cst_18 [1] : vector<128x128xf32> to vector<128xf32>
    %38 = vector.shape_cast %37 : vector<128xf32> to vector<128x1xf32>
    %39 = vector.broadcast %38 : vector<128x1xf32> to vector<128x128xf32>
    %40 = arith.subf %36, %39 : vector<128x128xf32>
    %41 = math.exp %40 : vector<128x128xf32>
    %cst_19 = arith.constant dense<0.000000e+00> : vector<128xf32>
    %42 = vector.multi_reduction <add>, %41, %cst_19 [1] : vector<128x128xf32> to vector<128xf32>
    %43 = vector.shape_cast %42 : vector<128xf32> to vector<128x1xf32>
    %44 = tpu.reciprocal %43 {approx = true} : vector<128x1xf32> -> vector<128x1xf32>
    %45 = vector.broadcast %44 : vector<128x1xf32> to vector<128x128xf32>
    %46 = arith.mulf %41, %45 : vector<128x128xf32>
    %47 = arith.truncf %46 : vector<128x128xf32> to vector<128x128xbf16>
    %48 = tpu.concatenate %28, %47 in 1 : vector<128x128xbf16>, vector<128x128xbf16> -> vector<128x256xbf16>
    %49 = vector.extract_strided_slice %48 {offsets = [0, 0], sizes = [32, 256], strides = [1, 1]} : vector<128x256xbf16> to vector<32x256xbf16>
    %c0_20 = arith.constant 0 : index
    %c0_21 = arith.constant 0 : index
    %c0_22 = arith.constant 0 : index
    %50 = vector.load %arg4[%c0_20, %c0_21, %c0_22] : memref<4x256x512xbf16, #tpu.memory_space<vmem>>, vector<1x256x512xbf16>
    %51 = vector.shape_cast %50 : vector<1x256x512xbf16> to vector<256x512xbf16>
    %cst_23 = arith.constant dense<0.000000e+00> : vector<32x512xf32>
    %52 = tpu.matmul %49, %51, %cst_23 {dimension_numbers = #tpu.dot_dimension_numbers<[1], [0], [0], [1], [0, 0, 1, 1], [], []>} : vector<32x256xbf16>, vector<256x512xbf16>, vector<32x512xf32> -> vector<32x512xf32>
    %53 = vector.extract_strided_slice %48 {offsets = [32, 0], sizes = [32, 256], strides = [1, 1]} : vector<128x256xbf16> to vector<32x256xbf16>
    %c1_24 = arith.constant 1 : index
    %c0_25 = arith.constant 0 : index
    %c0_26 = arith.constant 0 : index
    %54 = vector.load %arg4[%c1_24, %c0_25, %c0_26] : memref<4x256x512xbf16, #tpu.memory_space<vmem>>, vector<1x256x512xbf16>
    %55 = vector.shape_cast %54 : vector<1x256x512xbf16> to vector<256x512xbf16>
    %cst_27 = arith.constant dense<0.000000e+00> : vector<32x512xf32>
    %56 = tpu.matmul %53, %55, %cst_27 {dimension_numbers = #tpu.dot_dimension_numbers<[1], [0], [0], [1], [0, 0, 1, 1], [], []>} : vector<32x256xbf16>, vector<256x512xbf16>, vector<32x512xf32> -> vector<32x512xf32>
    %57 = vector.extract_strided_slice %48 {offsets = [64, 0], sizes = [32, 256], strides = [1, 1]} : vector<128x256xbf16> to vector<32x256xbf16>
    %c2 = arith.constant 2 : index
    %c0_28 = arith.constant 0 : index
    %c0_29 = arith.constant 0 : index
    %58 = vector.load %arg4[%c2, %c0_28, %c0_29] : memref<4x256x512xbf16, #tpu.memory_space<vmem>>, vector<1x256x512xbf16>
    %59 = vector.shape_cast %58 : vector<1x256x512xbf16> to vector<256x512xbf16>
    %cst_30 = arith.constant dense<0.000000e+00> : vector<32x512xf32>
    %60 = tpu.matmul %57, %59, %cst_30 {dimension_numbers = #tpu.dot_dimension_numbers<[1], [0], [0], [1], [0, 0, 1, 1], [], []>} : vector<32x256xbf16>, vector<256x512xbf16>, vector<32x512xf32> -> vector<32x512xf32>
    %61 = vector.extract_strided_slice %48 {offsets = [96, 0], sizes = [32, 256], strides = [1, 1]} : vector<128x256xbf16> to vector<32x256xbf16>
    %c3 = arith.constant 3 : index
    %c0_31 = arith.constant 0 : index
    %c0_32 = arith.constant 0 : index
    %62 = vector.load %arg4[%c3, %c0_31, %c0_32] : memref<4x256x512xbf16, #tpu.memory_space<vmem>>, vector<1x256x512xbf16>
    %63 = vector.shape_cast %62 : vector<1x256x512xbf16> to vector<256x512xbf16>
    %cst_33 = arith.constant dense<0.000000e+00> : vector<32x512xf32>
    %64 = tpu.matmul %61, %63, %cst_33 {dimension_numbers = #tpu.dot_dimension_numbers<[1], [0], [0], [1], [0, 0, 1, 1], [], []>} : vector<32x256xbf16>, vector<256x512xbf16>, vector<32x512xf32> -> vector<32x512xf32>
    %65 = tpu.concatenate %52, %56, %60, %64 in 0 : vector<32x512xf32>, vector<32x512xf32>, vector<32x512xf32>, vector<32x512xf32> -> vector<128x512xf32>
    %66 = arith.truncf %65 : vector<128x512xf32> to vector<128x512xbf16>
    %cst_34 = arith.constant dense<0.000000e+00> : vector<2x512xf32>
    %67 = tpu.matmul %6, %66, %cst_34 {dimension_numbers = #tpu.dot_dimension_numbers<[1], [0], [0], [1], [0, 0, 1, 1], [], []>} : vector<2x128xbf16>, vector<128x512xbf16>, vector<2x512xf32> -> vector<2x512xf32>
    %68 = vector.broadcast %7 : vector<1x512xf32> to vector<2x512xf32>
    %69 = arith.addf %67, %68 : vector<2x512xf32>
    %cst_35 = arith.constant 0.000000e+00 : f32
    %70 = vector.broadcast %cst_35 : f32 to vector<2x512xf32>
    %71 = arith.subf %70, %69 : vector<2x512xf32>
    %72 = math.exp %71 : vector<2x512xf32>
    %cst_36 = arith.constant 1.000000e+00 : f32
    %73 = vector.broadcast %cst_36 : f32 to vector<2x512xf32>
    %74 = arith.addf %73, %72 : vector<2x512xf32>
    %cst_37 = arith.constant 1.000000e+00 : f32
    %75 = vector.broadcast %cst_37 : f32 to vector<2x512xf32>
    %76 = arith.divf %75, %74 : vector<2x512xf32>
    %c0_38 = arith.constant 0 : index
    %c0_39 = arith.constant 0 : index
    %c0_40 = arith.constant 0 : index
    %77 = vector.load %arg7[%c0_38, %c0_39, %c0_40] : memref<1x2x512xf32, #tpu.memory_space<vmem>>, vector<1x2x512xf32>
    %78 = vector.shape_cast %77 : vector<1x2x512xf32> to vector<2x512xf32>
    %79 = vector.shape_cast %76 : vector<2x512xf32> to vector<1x2x512xf32>
    tpu.vector_store %arg7[%c0_38, %c0_39, %c0_40], %79 {strides = array<i32>} : memref<1x2x512xf32, #tpu.memory_space<vmem>>, vector<1x2x512xf32>,
    return
  }
  func.func @transform_0(%arg0: i32) -> (i32, i32) {
    %c0_i32 = arith.constant 0 : i32
    %c0_i32_0 = arith.constant 0 : i32
    return %arg0, %c0_i32 : i32, i32
  }
  func.func @transform_1(%arg0: i32) -> (i32, i32, i32) {
    %c0_i32 = arith.constant 0 : i32
    %c0_i32_0 = arith.constant 0 : i32
    %c0_i32_1 = arith.constant 0 : i32
    %c0_i32_2 = arith.constant 0 : i32
    return %c0_i32, %c0_i32_0, %c0_i32_1 : i32, i32, i32
  }
  func.func @transform_2(%arg0: i32) -> (i32, i32) {
    %c0_i32 = arith.constant 0 : i32
    %c0_i32_0 = arith.constant 0 : i32
    %c0_i32_1 = arith.constant 0 : i32
    return %c0_i32, %c0_i32_0 : i32, i32
  }
  func.func @transform_3(%arg0: i32) -> (i32, i32, i32) {
    %c0_i32 = arith.constant 0 : i32
    %c0_i32_0 = arith.constant 0 : i32
    %c0_i32_1 = arith.constant 0 : i32
    %c0_i32_2 = arith.constant 0 : i32
    return %c0_i32, %c0_i32_0, %c0_i32_1 : i32, i32, i32
  }
  func.func @transform_4(%arg0: i32) -> (i32, i32) {
    %c0_i32 = arith.constant 0 : i32
    %c0_i32_0 = arith.constant 0 : i32
    %c0_i32_1 = arith.constant 0 : i32
    return %c0_i32, %c0_i32_0 : i32, i32
  }
  func.func @transform_5(%arg0: i32) -> (i32, i32) {
    %c0_i32 = arith.constant 0 : i32
    %c0_i32_0 = arith.constant 0 : i32
    %c0_i32_1 = arith.constant 0 : i32
    return %c0_i32, %c0_i32_0 : i32, i32
  }
  func.func @transform_6(%arg0: i32) -> (i32, i32, i32) {
    %c0_i32 = arith.constant 0 : i32
    %c0_i32_0 = arith.constant 0 : i32
    %c0_i32_1 = arith.constant 0 : i32
    return %arg0, %c0_i32, %c0_i32_0 : i32, i32, i32
  }
}

</mosaic_0001>

<bundles_post_ra>
// kernel: frect_forward.1
= control target key start
LH: loop header
LB: loop body
LE: loop exit
PB: predicated region body
PF: predicated region fallthrough
CT: control target
= control target key end

     0   :  { %s5343_s21 = smov 0   ;;  %s7746_s0 = inlined_call_operand.vmem [shape: bf16[256,36], index: 0, kind: input, shape index: {}]   ;;  %s7747_s1 = inlined_call_operand.vmem [shape: f32[2,128,128], index: 1, kind: input, shape index: {}]   ;;  %s7748_s2 = inlined_call_operand.vmem [shape: bf16[36,128], index: 2, kind: input, shape index: {}]   ;;  %s7749_s3 = inlined_call_operand.vmem [shape: bf16[4,256,512], index: 3, kind: input, shape index: {}]   ;;  %s7750_s4 = inlined_call_operand.vmem [shape: bf16[2,128], index: 4, kind: input, shape index: {}]   ;;  %s7751_s5 = inlined_call_operand.vmem [shape: f32[1,512], index: 5, kind: input, shape index: {}]   ;;  %s7752_s6 = inlined_call_operand.vmem [shape: f32[2,2,512], index: 6, kind: output, shape index: {}]  }
   0x1 LB: > { %s5349_s22 = sadd.s32 4294967295, %s5303_s21   ;;  %p3572_p0 = scmp.ge.s32.totalorder %s5303_s21, 1  ;;  %s5303_s21 = sphi %s5343_s21, %s16_s21  }
   0x2   : > { %p213_p1 = scmp.lt.s32.totalorder %s5303_s21, 3 }
   0x4   : > { %p214_p2 = pnand %p3572_p0, %p213_p1 }
   0x6   : > { %217 = sbr.rel (%p214_p2) target bundleno = 1745 (0x6d1), region = 44 }
   0xb   : > { %v275_v0 = vld [vmem:[%s7748_s2 + $0x10] sm:$0x3]  ;;  %s3573_s25 = sshll.u32 %s5349_s22, 4  ;;  %vm391_vm0 = vcmask 1041408   ;;  %v4885_v4 = vld [vmem:[%s7748_s2 + $0x8] sm:$0xff]  ;;  %v4884_v5 = vld [vmem:[%s7748_s2] sm:$0xff] }
   0xc   : > { %v360_v1 = vunpack.c.l.b16 %v275_v0  ;;  %p244_p3 = scmp.lt.s32.totalorder %s3573_s25, 31  ;;  %vm366_vm1 = vcmask 293888   ;;  %v286_v25 = vld [vmem:[%s7747_s1 + $0x50] sm:$0xff]  ;;  %v287_v26 = vld [vmem:[%s7747_s1 + $0x58] sm:$0xff]  ;;  %v285_v31 = vld [vmem:[%s7747_s1 + $0x48] sm:$0xff]  ;;  %s5305_s16 = smov 96  }
   0xd   : > { %v284_v32 = vld [vmem:[%s7747_s1 + $0x40] sm:$0xff]  ;;  %v281_v37 = vld [vmem:[%s7747_s1 + $0x28] sm:$0xff]  ;;  %v290_v44 = vld [vmem:[%s7747_s1 + $0x70] sm:$0xff]  ;;  %s5307_s19 = smov 64   ;;  %vm476_vm2 = vcmask 261120   ;;  %p249_p4 = scmp.lt.s32.totalorder %s5349_s22, 1 }
   0xe   : > { %v363_v2 = vpack.c.b16 %v360_v1, %v360_v1  ;;  %s7846_s25 = smov (!%p244_p3, %s3573_s25), 31  ;;  %v280_v38 = vld [vmem:[%s7747_s1 + $0x20] sm:$0xff]  ;;  %v291_v45 = vld [vmem:[%s7747_s1 + $0x78] sm:$0xff]  ;;  %v289_v51 = vld [vmem:[%s7747_s1 + $0x68] sm:$0xff] }
   0xf   : > { %s3574_s28 = sshll.u32 %s7846_s25, 2  ;;  %s5306_s25 = smov 32   ;;  %v283_v50 = vld [vmem:[%s7747_s1 + $0x38] sm:$0xff]  ;;  %v277_v52 = vld [vmem:[%s7747_s1 + $0x8] sm:$0xff]  ;;  %v282_v53 = vld [vmem:[%s7747_s1 + $0x30] sm:$0xff] }
  0x10   : > { %v393_v3 = vsel %vm391_vm0, %v363_v2, 0  ;;  %s247_s9 = scalar_lea.vmem %s7746_s0, %s3574_s28  ;;  %v288_v54 = vld [vmem:[%s7747_s1 + $0x60] sm:$0xff]  ;;  %v279_v1 = vld [vmem:[%s7747_s1 + $0x18] sm:$0xff]  ;;  %v278_v2 = vld [vmem:[%s7747_s1 + $0x10] sm:$0xff]  ;;  %s7848_s22 = smov (!%p249_p4, %s5349_s22), 1 }
  0x11   : > { %400 = vmatpush.bf16.msra.mxu0 %v393_v3  ;;  %v4876_v6 = vld [vmem:[%s247_s9] sm:$0xff]  ;;  %v4877_v7 = vld [vmem:[%s247_s9 + $0x8] sm:$0xff]  ;;  %v4878_v8 = vld [vmem:[%s247_s9 + $0x10] sm:$0xff]  ;;  %s4875_s29 = sshll.u32 %s7848_s22, 3 }
  0x12   : > { %v4879_v9 = vld [vmem:[%s247_s9 + $0x18] sm:$0xff]  ;;  %v4880_v10 = vld [vmem:[%s247_s9 + $0x20] sm:$0xff]  ;;  %v4881_v11 = vld [vmem:[%s247_s9 + $0x28] sm:$0xff]  ;;  %s253_s8 = scalar_lea.vmem %s7752_s6, %s4875_s29 }
  0x13   : > { %v4882_v12 = vld [vmem:[%s247_s9 + $0x30] sm:$0xff]  ;;  %v4883_v13 = vld [vmem:[%s247_s9 + $0x38] sm:$0xff]  ;;  %v276_v55 = vld [vmem:[%s7747_s1] sm:$0xff] }
  0x15   : > { %401 = vmatpush.bf16.msra.mxu0 %v4885_v4 }
  0x19   : > { %402 = vmatpush.bf16.msra.mxu0 %v4884_v5 }
  0x1c   : > { %3633 = vmatmul.msk.bf16.vlgmr.msra.gmra.mxu0 %vm366_vm1, %v4876_v6 }
  0x2c   : > { %3634 = vmatmul.msk.bf16.gmra.mxu0 %vm366_vm1, %v4877_v7 }
  0x3c   : > { %3635 = vmatmul.msk.bf16.gmra.mxu0 %vm366_vm1, %v4878_v8 }
  0x4c   : > { %3636 = vmatmul.msk.bf16.gmra.mxu0 %vm366_vm1, %v4879_v9 }
  0x5c   : > { %3637 = vmatmul.msk.bf16.gmra.mxu0 %vm366_vm1, %v4880_v10 }
  0x6c   : > { %3638 = vmatmul.msk.bf16.gmra.mxu0 %vm366_vm1, %v4881_v11 }
  0x7c   : > { %3639 = vmatmul.msk.bf16.gmra.mxu0 %vm366_vm1, %v4882_v12 }
  0x8c   : > { %3640 = vmatmul.msk.bf16.gmra.mxu0 %vm366_vm1, %v4883_v13 }
  0x99   : > { %v404_v14 = vpop.f32.mrf.mxu0 }
  0x9a   : > { %v405_v61 = vadd.f32 %v404_v14, %v276_v55 }
  0xa1   : > { %v406_v15 = vpop.f32.mrf.mxu0 }
  0xa2   : > { %v407_v58 = vadd.f32 %v406_v15, %v277_v52 }
  0xa4   : > { %v5439_v0 = vpack.c.bf16 %v407_v58, %v405_v61 }
  0xa9   : > { %v5367_v16 = vpop.f32.mrf.mxu0 }
  0xaa   : > { %v410_v4 = vadd.f32 %v5367_v16, %v278_v2 }
  0xb1   : > { %v5369_v17 = vpop.f32.mrf.mxu0 }
  0xb2   : > { %v412_v3 = vadd.f32 %v5369_v17, %v279_v1 }
  0xb4   : > { %v445_v5 = vpack.c.bf16 %v412_v3, %v410_v4 }
  0xb9   : > { %v414_v18 = vpop.f32.mrf.mxu0 }
  0xba   : > { %v415_v41 = vadd.f32 %v414_v18, %v280_v38 }
  0xc1   : > { %v416_v19 = vpop.f32.mrf.mxu0 }
  0xc2   : > { %v417_v39 = vadd.f32 %v416_v19, %v281_v37 }
  0xc4   : > { %v5397_v42 = vpack.c.bf16 %v417_v39, %v415_v41 }
  0xc9   : > { %v419_v20 = vpop.f32.mrf.mxu0 }
  0xca   : > { %v420_v59 = vadd.f32 %v419_v20, %v282_v53 }
  0xd1   : > { %v421_v21 = vpop.f32.mrf.mxu0 }
  0xd2   : > { %v422_v56 = vadd.f32 %v421_v21, %v283_v50  ;;  %v3578_v50 = vld [vmem:[%s7747_s1 + $0x88] sm:$0xff] }
  0xd4   : > { %v5435_v62 = vpack.c.bf16 %v422_v56, %v420_v59  ;;  %v3579_v56 = vld [vmem:[%s7747_s1 + $0x90] sm:$0xff] }
  0xd9   : > { %v424_v22 = vpop.f32.mrf.mxu0 }
  0xda   : > { %v425_v35 = vadd.f32 %v424_v22, %v284_v32 }
  0xe1   : > { %v426_v23 = vpop.f32.mrf.mxu0 }
  0xe2   : > { %v427_v33 = vadd.f32 %v426_v23, %v285_v31 }
  0xe4   : > { %v5387_v36 = vpack.c.bf16 %v427_v33, %v425_v35 }
  0xe9   : > { %v429_v24 = vpop.f32.mrf.mxu0 }
  0xea   : > { %v430_v28 = vadd.f32 %v429_v24, %v286_v25 }
  0xf1   : > { %v431_v27 = vpop.f32.mrf.mxu0 }
  0xf2   : > { %v432_v29 = vadd.f32 %v431_v27, %v287_v26 }
  0xf4   : > { %v5377_v30 = vpack.c.bf16 %v432_v29, %v430_v28 }
  0xf6   : > { %470 = vrot.lane.b32.xlu1 %v5377_v30, %s5305_s16 }
  0xf9   : > { %v434_v34 = vpop.f32.mrf.mxu0 }
  0xfa   : > { %v435_v60 = vadd.f32 %v434_v34, %v288_v54 }
  0xfe   : > { %468 = vrot.lane.b32.xlu1 %v5387_v36, %s5305_s16 }
 0x101   : > { %v436_v40 = vpop.f32.mrf.mxu0 }
 0x102   : > { %v437_v57 = vadd.f32 %v436_v40, %v289_v51 }
 0x104   : > { %v5437_v63 = vpack.c.bf16 %v437_v57, %v435_v60 }
 0x106   : > { %464 = vrot.lane.b32.xlu1 %v5397_v42, %s5305_s16 }
 0x109   : > { %v439_v43 = vpop.f32.mrf.mxu0 }
 0x10a   : > { %v440_v47 = vadd.f32 %v439_v43, %v290_v44 }
 0x10e   : > { %790 = vrot.lane.b32.xlu1 %v5387_v36, %s5306_s25 }
 0x111   : > { %v441_v46 = vpop.f32.mrf.mxu0 }
 0x112   : > { %v442_v48 = vadd.f32 %v441_v46, %v291_v45  ;;  %v3577_v45 = vld [vmem:[%s7747_s1 + $0x80] sm:$0xff] }
 0x114   : > { %v5409_v49 = vpack.c.bf16 %v442_v48, %v440_v47 }
 0x116   : > { %796 = vrot.lane.b32.xlu2 %v5409_v49, %s5306_s25  ;;  %474 = vrot.lane.b32.xlu0 %v5409_v49, %s5305_s16 }
 0x117   : > { %786 = vrot.lane.b32.xlu1 %v5397_v42, %s5306_s25 }
 0x11e   : > { %472 = vrot.lane.b32.xlu0 %v5437_v63, %s5305_s16  ;;  %466 = vrot.lane.b32.xlu2 %v5435_v62, %s5305_s16 }
 0x11f   : > { %766 = vrot.lane.b32.xlu1 %v5439_v0, %s5307_s19 }
 0x126   : > { %794 = vrot.lane.b32.xlu0 %v5437_v63, %s5306_s25  ;;  %792 = vrot.lane.b32.xlu2 %v5377_v30, %s5306_s25 }
 0x127   : > { %772 = vrot.lane.b32.xlu1 %v5435_v62, %s5307_s19 }
 0x12e   : > { %462 = vrot.lane.b32.xlu0 %v445_v5, %s5305_s16  ;;  %460 = vrot.lane.b32.xlu2 %v5439_v0, %s5305_s16 }
 0x136   : > { %788 = vrot.lane.b32.xlu0 %v5435_v62, %s5306_s25  ;;  %784 = vrot.lane.b32.xlu2 %v445_v5, %s5306_s25 }
 0x13e   : > { %782 = vrot.lane.b32.xlu0 %v5439_v0, %s5306_s25  ;;  %768 = vrot.lane.b32.xlu2 %v445_v5, %s5307_s19 }
 0x146   : > { %770 = vrot.lane.b32.xlu0 %v5397_v42, %s5307_s19 }
 0x168   : > { %v471_v8 = vpop.permute.xlu1 %470 }
 0x169   : > { %v517_v16 = vsel %vm476_vm2, %v471_v8, 0 }
 0x170   : > { %v797_v6 = vpop.permute.xlu2 %796  ;;  %v469_v13 = vpop.permute.xlu1 %468 }
 0x171   : > { %v844_v7 = vsel %vm476_vm2, %v797_v6, 0  ;;  %v514_v20 = vsel %vm476_vm2, %v469_v13, 0  ;;  %v3580_v6 = vld [vmem:[%s7747_s1 + $0x98] sm:$0xff] }
 0x172   : > { %846 = vmatpush.bf16.xpose.msra.mxu2 %v844_v7 }
 0x178   : > { %v467_v14 = vpop.permute.xlu2 %466  ;;  %v465_v18 = vpop.permute.xlu1 %464 }
 0x179   : > { %v511_v24 = vsel %vm476_vm2, %v467_v14, 0  ;;  %v508_v27 = vsel %vm476_vm2, %v465_v18, 0 }
 0x180   : > { %v793_v19 = vpop.permute.xlu2 %792  ;;  %v791_v23 = vpop.permute.xlu1 %790 }
 0x181   : > { %v838_v21 = vsel %vm476_vm2, %v793_v19, 0  ;;  %v835_v25 = vsel %vm476_vm2, %v791_v23, 0 }
 0x188   : > { %v475_v9 = vpop.permute.xlu0 %474  ;;  %v461_v29 = vpop.permute.xlu2 %460 }
 0x189   : > { %v523_v10 = vsel %vm476_vm2, %v475_v9, 0  ;;  %v787_v31 = vpop.permute.xlu1 %786  ;;  %v502_v35 = vsel %vm476_vm2, %v461_v29, 0 }
 0x18a   : > { %525 = vmatpush.bf16.xpose.msra.mxu1 %v523_v10  ;;  %v829_v33 = vsel %vm476_vm2, %v787_v31, 0 }
 0x190   : > { %v473_v11 = vpop.permute.xlu0 %472  ;;  %v785_v34 = vpop.permute.xlu2 %784 }
 0x191   : > { %v520_v12 = vsel %vm476_vm2, %v473_v11, 0  ;;  %v826_v37 = vsel %vm476_vm2, %v785_v34, 0  ;;  %v767_v40 = vpop.permute.xlu1 %766 }
 0x192   : > { %526 = vmatpush.bf16.xpose.msra.mxu1 %v520_v12 }
 0x198   : > { %v795_v15 = vpop.permute.xlu0 %794  ;;  %v769_v41 = vpop.permute.xlu2 %768 }
 0x199   : > { %v841_v17 = vsel %vm476_vm2, %v795_v15, 0  ;;  %v773_v44 = vpop.permute.xlu1 %772 }
 0x19a   : > { %527 = vmatpush.bf16.xpose.msra.mxu1 %v517_v16  ;;  %847 = vmatpush.bf16.xpose.msra.mxu2 %v841_v17 }
 0x1a0   : > { %v463_v22 = vpop.permute.xlu0 %462 }
 0x1a1   : > { %v505_v32 = vsel %vm476_vm2, %v463_v22, 0 }
 0x1a2   : > { %528 = vmatpush.bf16.xpose.msra.mxu1 %v514_v20  ;;  %848 = vmatpush.bf16.xpose.msra.mxu2 %v838_v21 }
 0x1a8   : > { %v789_v26 = vpop.permute.xlu0 %788 }
 0x1a9   : > { %v832_v28 = vsel %vm476_vm2, %v789_v26, 0 }
 0x1aa   : > { %529 = vmatpush.bf16.xpose.msra.mxu1 %v511_v24  ;;  %849 = vmatpush.bf16.xpose.msra.mxu2 %v835_v25 }
 0x1b0   : > { %v783_v38 = vpop.permute.xlu0 %782 }
 0x1b1   : > { %v823_v39 = vsel %vm476_vm2, %v783_v38, 0 }
 0x1b2   : > { %530 = vmatpush.bf16.xpose.msra.mxu1 %v508_v27  ;;  %850 = vmatpush.bf16.xpose.msra.mxu2 %v832_v28 }
 0x1b8   : > { %v771_v43 = vpop.permute.xlu0 %770 }
 0x1ba   : > { %531 = vmatpush.bf16.xpose.msra.mxu1 %v505_v32  ;;  %851 = vmatpush.bf16.xpose.msra.mxu2 %v829_v33 }
 0x1c2   : > { %532 = vmatpush.bf16.xpose.msra.mxu1 %v502_v35  ;;  %852 = vmatpush.bf16.xpose.msra.mxu2 %v826_v37 }
 0x1c9   : > { %3641 = vmatmul.msk.bf16.vlgmr.msra.gmra.mxu1 %vm476_vm2, %v5439_v0 }
 0x1ca   : > { %853 = vmatpush.bf16.xpose.msra.mxu2 %v823_v39 }
 0x1d1   : > { %3649 = vmatmul.msk.bf16.vlgmr.msra.gmra.mxu2 %vm476_vm2, %v767_v40 }
 0x1d9   : > { %3642 = vmatmul.msk.bf16.gmra.mxu1 %vm476_vm2, %v445_v5 }
 0x1e1   : > { %3650 = vmatmul.msk.bf16.gmra.mxu2 %vm476_vm2, %v769_v41 }
 0x1e9   : > { %3643 = vmatmul.msk.bf16.gmra.mxu1 %vm476_vm2, %v5397_v42 }
 0x1f1   : > { %3651 = vmatmul.msk.bf16.gmra.mxu2 %vm476_vm2, %v771_v43 }
 0x1f9   : > { %3644 = vmatmul.msk.bf16.gmra.mxu1 %vm476_vm2, %v5435_v62 }
 0x201   : > { %3652 = vmatmul.msk.bf16.gmra.mxu2 %vm476_vm2, %v773_v44 }
 0x209   : > { %3645 = vmatmul.msk.bf16.gmra.mxu1 %vm476_vm2, %v5387_v36 }
 0x219   : > { %3646 = vmatmul.msk.bf16.gmra.mxu1 %vm476_vm2, %v5377_v30 }
 0x229   : > { %3647 = vmatmul.msk.bf16.gmra.mxu1 %vm476_vm2, %v5437_v63 }
 0x239   : > { %3648 = vmatmul.msk.bf16.gmra.mxu1 %vm476_vm2, %v5409_v49 }
 0x246   : > { %v534_v42 = vpop.f32.mrf.mxu1 }
 0x247   : > { %v574_v46 = vmul.f32 0.17677669, %v534_v42 }
 0x249   : > { %v590_v47 = vadd.f32 %v3577_v45, %v574_v46 }
 0x24b   : > { %606 = vmax.xlane.f32.xlu2 %v590_v47 }
 0x24e   : > { %v536_v48 = vpop.f32.mrf.mxu1 }
 0x24f   : > { %v575_v51 = vmul.f32 0.17677669, %v536_v48 }
 0x251   : > { %v591_v52 = vadd.f32 %v3578_v50, %v575_v51  ;;  %v3779_v51 = vld [vmem:[%s7749_s3 + $0xe8] sm:$0xf] }
 0x253   : > { %608 = vmax.xlane.f32.xlu0 %v591_v52 }
 0x254   : > { %v855_v53 = vpop.f32.mrf.mxu2 }
 0x255   : > { %v895_v54 = vmul.f32 0.17677669, %v855_v53 }
 0x256   : > { %v539_v55 = vpop.f32.mrf.mxu1 }
 0x257   : > { %v576_v57 = vmul.f32 0.17677669, %v539_v55  ;;  %v911_v58 = vadd.f32 %v3577_v45, %v895_v54  ;;  %v4917_v54 = vld [vmem:[%s7749_s3 + $0xf4] sm:$0xf0] }
 0x258   : > { %v3780_v55 = vor.u32 %v4917_v54, %v3779_v51  ;;  %v4893_v51 = vld [vmem:[%s7749_s3 + $0x34] sm:$0xf0] }
 0x259   : > { %927 = vmax.xlane.f32.xlu2 %v911_v58  ;;  %v592_v59 = vadd.f32 %v3579_v56, %v576_v57  ;;  %v3755_v57 = vld [vmem:[%s7749_s3 + $0xc0] sm:$0xf] }
 0x25a   : > { %1643 = vmatpush.bf16.msrb.mxu0 %v3780_v55 }
 0x25b   : > { %610 = vmax.xlane.f32.xlu1 %v592_v59 }
 0x25c   : > { %v857_v60 = vpop.f32.mrf.mxu2 }
 0x25d   : > { %v896_v61 = vmul.f32 0.17677669, %v857_v60 }
 0x25e   : > { %v541_v3 = vpop.f32.mrf.mxu1 }
 0x25f   : > { %v912_v62 = vadd.f32 %v3578_v50, %v896_v61  ;;  %v577_v4 = vmul.f32 0.17677669, %v541_v3  ;;  %v3747_v3 = vld [vmem:[%s7749_s3 + $0xa8] sm:$0xf] }
 0x261   : > { %929 = vmax.xlane.f32.xlu0 %v912_v62  ;;  %v593_v8 = vadd.f32 %v3580_v6, %v577_v4 }
 0x264   : > { %v860_v0 = vpop.f32.mrf.mxu2 }
 0x265   : > { %v897_v1 = vmul.f32 0.17677669, %v860_v0 }
 0x266   : > { %v5545_v41 = vpop.f32.mrf.mxu1 }
 0x267   : > { %v913_v2 = vadd.f32 %v3579_v56, %v897_v1  ;;  %v3739_v1 = vld [vmem:[%s7749_s3 + $0xa0] sm:$0xf] }
 0x269   : > { %931 = vmax.xlane.f32.xlu2 %v913_v2 }
 0x26c   : > { %v862_v5 = vpop.f32.mrf.mxu2 }
 0x26d   : > { %v898_v7 = vmul.f32 0.17677669, %v862_v5 }
 0x26e   : > { %v546_v45 = vpop.f32.mrf.mxu1 }
 0x26f   : > { %v914_v9 = vadd.f32 %v3580_v6, %v898_v7  ;;  %v579_v46 = vmul.f32 0.17677669, %v546_v45  ;;  %v4909_v6 = vld [vmem:[%s7749_s3 + $0xb4] sm:$0xf0] }
 0x271   : > { %612 = vmax.xlane.f32.xlu2 %v593_v8  ;;  %933 = vmax.xlane.f32.xlu0 %v914_v9 }
 0x274   : > { %774 = vrot.lane.b32.xlu1 %v5387_v36, %s5307_s19  ;;  %v5549_v44 = vpop.f32.mrf.mxu2 }
 0x275   : > { %v899_v54 = vmul.f32 0.17677669, %v5549_v44  ;;  %v3667_v44 = vld [vmem:[%s7749_s3 + $0x8] sm:$0xf] }
 0x276   : > { %v549_v56 = vpop.f32.mrf.mxu1 }
 0x277   : > { %v580_v4 = vmul.f32 0.17677669, %v549_v56 }
 0x27c   : > { %v867_v50 = vpop.f32.mrf.mxu2 }
 0x284   : > { %v5601_v7 = vpop.f32.mrf.mxu2 }
 0x2be   : > { %v607_v10 = vpop.xlane.xlu2 %606 }
 0x2bf   : > { %v638_v11 = vsub.f32 %v590_v47, %v607_v10  ;;  %v3582_v47 = vld [vmem:[%s7747_s1 + $0xa8] sm:$0xff]  ;;  %v3723_v10 = vld [vmem:[%s7749_s3 + $0x80] sm:$0xf] }
 0x2c0   : > { %v5559_v48 = vadd.f32 %v3582_v47, %v579_v46  ;;  %v3581_v46 = vld [vmem:[%s7747_s1 + $0xa0] sm:$0xff] }
 0x2c1   : > { %v654_v12 = vmul.f32 1.442695, %v638_v11  ;;  %v4904_v11 = vld [vmem:[%s7749_s3 + $0x8c] sm:$0xf0] }
 0x2c3   : > { %5153 = vpow2.f32 %v654_v12  ;;  %v3731_v12 = vld [vmem:[%s7749_s3 + $0x88] sm:$0xf] }
 0x2c6   : > { %v609_v13 = vpop.xlane.xlu0 %608 }
 0x2c7   : > { %v639_v14 = vsub.f32 %v591_v52, %v609_v13  ;;  %v900_v52 = vmul.f32 0.17677669, %v867_v50  ;;  %v4892_v50 = vld [vmem:[%s7749_s3 + $0x2c] sm:$0xf0] }
 0x2c9   : > { %v5521_v15 = vpop.eup %5153  ;;  %v656_v16 = vmul.f32 1.442695, %v639_v14  ;;  %v5583_v60 = vadd.f32 %v3582_v47, %v900_v52  ;;  %v3724_v14 = vor.u32 %v4904_v11, %v3723_v10  ;;  %v3675_v47 = vld [vmem:[%s7749_s3 + $0x20] sm:$0xf]  ;;  %v4947_v52 = vld [vmem:[%s7749_s3 + $0x1ec] sm:$0xf] }
 0x2ca   : > { %686 = vadd.xlane.f32.xlu2 %v5521_v15  ;;  %v3877_v10 = vld [vmem:[%s7749_s3 + $0x1b8] sm:$0xf0] }
 0x2cb   : > { %5155 = vpow2.f32 %v656_v16  ;;  %v4905_v16 = vld [vmem:[%s7749_s3 + $0x94] sm:$0xf0] }
 0x2cc   : > { %v928_v19 = vpop.xlane.xlu2 %927 }
 0x2cd   : > { %v959_v36 = vsub.f32 %v911_v58, %v928_v19  ;;  %v4912_v58 = vld [vmem:[%s7749_s3 + $0xcc] sm:$0xf0]  ;;  %v3707_v19 = vld [vmem:[%s7749_s3 + $0x60] sm:$0xf] }
 0x2ce   : > { %v611_v17 = vpop.xlane.xlu1 %610  ;;  %v3756_v61 = vor.u32 %v4912_v58, %v3755_v57  ;;  %v3659_v58 = vld [vmem:[%s7749_s3] sm:$0xf] }
 0x2cf   : > { %v640_v18 = vsub.f32 %v592_v59, %v611_v17  ;;  %v975_v22 = vmul.f32 1.442695, %v959_v36  ;;  %v3763_v59 = vld [vmem:[%s7749_s3 + $0xc8] sm:$0xf]  ;;  %v551_v17 = vpop.f32.mrf.mxu1 }
 0x2d0   : > { %v3715_v36 = vld [vmem:[%s7749_s3 + $0x68] sm:$0xf] }
 0x2d1   : > { %v5524_v20 = vpop.eup %5155  ;;  %v658_v21 = vmul.f32 1.442695, %v640_v18  ;;  %v3732_v18 = vor.u32 %v4905_v16, %v3731_v12 }
 0x2d2   : > { %688 = vadd.xlane.f32.xlu0 %v5524_v20 }
 0x2d3   : > { %5157 = vpow2.f32 %v658_v21  ;;  %v4900_v21 = vld [vmem:[%s7749_s3 + $0x6c] sm:$0xf0] }
 0x2d4   : > { %v930_v23 = vpop.xlane.xlu0 %929  ;;  %5159 = vpow2.f32 %v975_v22  ;;  %v581_v22 = vmul.f32 0.17677669, %v551_v17  ;;  %v4935_v17 = vld [vmem:[%s7749_s3 + $0x18c] sm:$0xf] }
 0x2d5   : > { %v960_v25 = vsub.f32 %v912_v62, %v930_v23  ;;  %v4913_v62 = vld [vmem:[%s7749_s3 + $0xd4] sm:$0xf0]  ;;  %v3708_v23 = vor.u32 %v4900_v21, %v3707_v19 }
 0x2d6   : > { %v3764_v0 = vor.u32 %v4913_v62, %v3763_v59  ;;  %v4888_v59 = vld [vmem:[%s7749_s3 + $0xc] sm:$0xf0] }
 0x2d7   : > { %v977_v27 = vmul.f32 1.442695, %v960_v25  ;;  %v4901_v25 = vld [vmem:[%s7749_s3 + $0x74] sm:$0xf0]  ;;  %v3660_v62 = vor.u32 %v4888_v59, %v3659_v58  ;;  %v4919_v58 = vld [vmem:[%s7749_s3 + $0x10c] sm:$0xf] }
 0x2d8   : > { %1644 = vmatpush.bf16.msrb.mxu0 %v3764_v0  ;;  %v4889_v0 = vld [vmem:[%s7749_s3 + $0x14] sm:$0xf0]  ;;  %v3797_v59 = vld [vmem:[%s7749_s3 + $0x118] sm:$0xf0] }
 0x2d9   : > { %v5527_v24 = vpop.eup %5157  ;;  %5161 = vpow2.f32 %v977_v27  ;;  %v3716_v27 = vor.u32 %v4901_v25, %v3715_v36  ;;  %v5733_v36 = vld [vmem:[%s7747_s1 + $0xc8] sm:$0xff] }
 0x2da   : > { %690 = vadd.xlane.f32.xlu0 %v5527_v24  ;;  %v5530_v28 = vpop.eup %5159 }
 0x2dc   : > { %v932_v26 = vpop.xlane.xlu2 %931 }
 0x2dd   : > { %v961_v40 = vsub.f32 %v913_v2, %v932_v26  ;;  %v4908_v2 = vld [vmem:[%s7749_s3 + $0xac] sm:$0xf0]  ;;  %v3584_v26 = vld [vmem:[%s7747_s1 + $0xb8] sm:$0xff] }
 0x2de   : > { %v3740_v5 = vor.u32 %v4908_v2, %v3739_v1  ;;  %v4943_v1 = vld [vmem:[%s7749_s3 + $0x1cc] sm:$0xf]  ;;  %v3893_v2 = vld [vmem:[%s7749_s3 + $0x1d8] sm:$0xf0] }
 0x2df   : > { %v5536_v38 = vpop.eup %5161  ;;  %v979_v43 = vmul.f32 1.442695, %v961_v40  ;;  %v578_v40 = vmul.f32 0.17677669, %v5545_v41  ;;  %v3683_v41 = vld [vmem:[%s7749_s3 + $0x28] sm:$0xf] }
 0x2e0   : > { %v3684_v56 = vor.u32 %v4893_v51, %v3683_v41  ;;  %v3883_v51 = vld [vmem:[%s7749_s3 + $0x1c0] sm:$0xf] }
 0x2e1   : > { %v5677_v55 = vadd.f32 %v3581_v46, %v578_v40 }
 0x2e2   : > { %776 = vrot.lane.b32.xlu2 %v5377_v30, %s5307_s19  ;;  %1007 = vadd.xlane.f32.xlu0 %v5530_v28 }
 0x2e4   : > { %v934_v29 = vpop.xlane.xlu0 %933  ;;  %v613_v31 = vpop.xlane.xlu2 %612 }
 0x2e5   : > { %v962_v32 = vsub.f32 %v914_v9, %v934_v29  ;;  %v641_v33 = vsub.f32 %v593_v8, %v613_v31  ;;  %v5606_v8 = vld [vmem:[%s7747_s1 + $0xb0] sm:$0xff]  ;;  %v3748_v9 = vor.u32 %v4909_v6, %v3747_v3  ;;  %v872_v29 = vpop.f32.mrf.mxu2  ;;  %v3691_v31 = vld [vmem:[%s7749_s3 + $0x40] sm:$0xf]  ;;  %v901_v3 = vmul.f32 0.17677669, %v5601_v7 }
 0x2e6   : > { %v775_v34 = vpop.permute.xlu1 %774  ;;  %v5618_v13 = vadd.f32 %v5606_v8, %v580_v4  ;;  %v902_v45 = vmul.f32 0.17677669, %v872_v29  ;;  %v5701_v4 = vadd.f32 %v3581_v46, %v899_v54  ;;  %v3896_v6 = vor.u32 %v4943_v1, %v3893_v2  ;;  %v4927_v29 = vld [vmem:[%s7749_s3 + $0x14c] sm:$0xf]  ;;  %v4940_v1 = vld [vmem:[%s7749_s3 + $0x1ac] sm:$0xf0] }
 0x2e7   : > { %v981_v35 = vmul.f32 1.442695, %v962_v32  ;;  %v660_v37 = vmul.f32 1.442695, %v641_v33  ;;  %3653 = vmatmul.msk.bf16.gmra.mxu2 %vm476_vm2, %v775_v34  ;;  %1645 = vmatpush.bf16.msrb.mxu0 %v3748_v9  ;;  %v4896_v32 = vld [vmem:[%s7749_s3 + $0x4c] sm:$0xf0]  ;;  %v5648_v34 = vadd.f32 %v3584_v26, %v581_v22  ;;  %v5712_v12 = vadd.f32 %v5606_v8, %v901_v3 }
 0x2e8   : > { %v3699_v33 = vld [vmem:[%s7749_s3 + $0x48] sm:$0xf]  ;;  %v4939_v9 = vld [vmem:[%s7749_s3 + $0x1ac] sm:$0xf] }
 0x2e9   : > { %5163 = vpow2.f32 %v660_v37  ;;  %v4897_v37 = vld [vmem:[%s7749_s3 + $0x54] sm:$0xf0]  ;;  %v3880_v7 = vor.u32 %v4939_v9, %v3877_v10  ;;  %v4931_v22 = vld [vmem:[%s7749_s3 + $0x16c] sm:$0xf] }
 0x2ea   : > { %1009 = vadd.xlane.f32.xlu0 %v5536_v38  ;;  %5165 = vpow2.f32 %v981_v35  ;;  %v3692_v35 = vor.u32 %v4896_v32, %v3691_v31  ;;  %v3829_v31 = vld [vmem:[%s7749_s3 + $0x158] sm:$0xf0]  ;;  %v4923_v46 = vld [vmem:[%s7749_s3 + $0x12c] sm:$0xf] }
 0x2eb   : > { %5167 = vpow2.f32 %v979_v43  ;;  %1646 = vmatpush.bf16.msrb.mxu0 %v3732_v18  ;;  %v3700_v43 = vor.u32 %v4897_v37, %v3699_v33  ;;  %v3861_v18 = vld [vmem:[%s7749_s3 + $0x198] sm:$0xf0]  ;;  %v3832_v32 = vor.u32 %v4927_v29, %v3829_v31  ;;  %v3899_v33 = vld [vmem:[%s7749_s3 + $0x1e0] sm:$0xf]  ;;  %v4915_v37 = vld [vmem:[%s7749_s3 + $0xec] sm:$0xf] }
 0x2ec   : > { %v3864_v8 = vor.u32 %v4935_v17, %v3861_v18  ;;  %v4907_v2 = vld [vmem:[%s7749_s3 + $0xac] sm:$0xf] }
 0x2ed   : > { %v4903_v17 = vld [vmem:[%s7749_s3 + $0x8c] sm:$0xf] }
 0x2ee   : > { %v4899_v29 = vld [vmem:[%s7749_s3 + $0x6c] sm:$0xf] }
 0x2ef   : > { %v5539_v39 = vpop.eup %5163  ;;  %1647 = vmatpush.bf16.msrb.mxu0 %v3716_v27 }
 0x2f0   : > { %v5541_v30 = vpop.eup %5165  ;;  %692 = vadd.xlane.f32.xlu1 %v5539_v39 }
 0x2f1   : > { %v5551_v42 = vpop.eup %5167 }
 0x2f2   : > { %1013 = vadd.xlane.f32.xlu0 %v5541_v30 }
 0x2f3   : > { %1648 = vmatpush.bf16.msrb.mxu0 %v3700_v43  ;;  %v3781_v43 = vld [vmem:[%s7749_s3 + $0xf8] sm:$0xf0] }
 0x2f7   : > { %1649 = vmatpush.bf16.msrb.mxu0 %v3684_v56  ;;  %v3765_v56 = vld [vmem:[%s7749_s3 + $0xd8] sm:$0xf0] }
 0x306   : > { %778 = vrot.lane.b32.xlu0 %v5437_v63, %s5307_s19  ;;  %v3771_v63 = vld [vmem:[%s7749_s3 + $0xe0] sm:$0xf] }
 0x309   : > { %780 = vrot.lane.b32.xlu1 %v5409_v49, %s5307_s19  ;;  %v4916_v49 = vld [vmem:[%s7749_s3 + $0xec] sm:$0xf0] }
 0x30a   : > { %v3772_v53 = vor.u32 %v4916_v49, %v3771_v63  ;;  %v554_v63 = vpop.f32.mrf.mxu1  ;;  %v3676_v49 = vor.u32 %v4892_v50, %v3675_v47  ;;  %v3813_v47 = vld [vmem:[%s7749_s3 + $0x138] sm:$0xf0] }
 0x30b   : > { %1011 = vadd.xlane.f32.xlu2 %v5551_v42  ;;  %v582_v11 = vmul.f32 0.17677669, %v554_v63  ;;  %v3816_v63 = vor.u32 %v4923_v46, %v3813_v47  ;;  %v3701_v46 = vld [vmem:[%s7749_s3 + $0x58] sm:$0xf0] }
 0x30c   : > { %1567 = vmatpush.bf16.msra.mxu3 %v3772_v53  ;;  %v3909_v53 = vld [vmem:[%s7749_s3 + $0x1f8] sm:$0xf0] }
 0x30d   : > { %v3912_v57 = vor.u32 %v4947_v52, %v3909_v53  ;;  %v4944_v52 = vld [vmem:[%s7749_s3 + $0x1cc] sm:$0xf0]  ;;  %v4911_v53 = vld [vmem:[%s7749_s3 + $0xcc] sm:$0xf] }
 0x30e   : > { %v3884_v54 = vor.u32 %v4944_v52, %v3883_v51  ;;  %v3685_v52 = vld [vmem:[%s7749_s3 + $0x38] sm:$0xf0] }
 0x30f   : > { %1700 = vmatpush.bf16.msrb.mxu1 %v3912_v57  ;;  %v3768_v57 = vor.u32 %v4911_v53, %v3765_v56 }
 0x310   : > { %1568 = vmatpush.bf16.msra.mxu3 %v3756_v61  ;;  %v5689_v61 = vadd.f32 %v3584_v26, %v902_v45  ;;  %v3784_v45 = vor.u32 %v4915_v37, %v3781_v43  ;;  %v3819_v37 = vld [vmem:[%s7749_s3 + $0x140] sm:$0xf]  ;;  %v4895_v43 = vld [vmem:[%s7749_s3 + $0x4c] sm:$0xf] }
 0x312   : > { %v556_v16 = vpop.f32.mrf.mxu1 }
 0x313   : > { %616 = vmax.xlane.f32.xlu2 %v5559_v48  ;;  %1701 = vmatpush.bf16.msrb.mxu1 %v3896_v6  ;;  %v583_v21 = vmul.f32 0.17677669, %v556_v16  ;;  %v4936_v16 = vld [vmem:[%s7749_s3 + $0x18c] sm:$0xf0] }
 0x314   : > { %1569 = vmatpush.bf16.msra.mxu3 %v3740_v5  ;;  %v3668_v5 = vor.u32 %v4889_v0, %v3667_v44  ;;  %v3867_v0 = vld [vmem:[%s7749_s3 + $0x1a0] sm:$0xf] }
 0x315   : > { %v5742_v27 = vadd.f32 %v5733_v36, %v583_v21  ;;  %v3868_v3 = vor.u32 %v4940_v1, %v3867_v0 }
 0x316   : > { %1650 = vmatpush.bf16.msrb.mxu0 %v3668_v5 }
 0x317   : > { %1702 = vmatpush.bf16.msrb.mxu1 %v3880_v7  ;;  %v3851_v7 = vld [vmem:[%s7749_s3 + $0x180] sm:$0xf] }
 0x318   : > { %1570 = vmatpush.bf16.msra.mxu3 %v3724_v14  ;;  %v5717_v14 = vld [vmem:[%s7747_s1 + $0xc0] sm:$0xff] }
 0x319   : > { %v5727_v19 = vadd.f32 %v5717_v14, %v582_v11 }
 0x31a   : > { %1681 = vmatpush.bf16.msra.mxu0 %v3784_v45 }
 0x31b   : > { %937 = vmax.xlane.f32.xlu2 %v5583_v60  ;;  %1703 = vmatpush.bf16.msrb.mxu1 %v3864_v8  ;;  %v3852_v8 = vor.u32 %v4936_v16, %v3851_v7  ;;  %v3757_v7 = vld [vmem:[%s7749_s3 + $0xd0] sm:$0xf0] }
 0x31c   : > { %1571 = vmatpush.bf16.msra.mxu3 %v3708_v23  ;;  %v3845_v23 = vld [vmem:[%s7749_s3 + $0x178] sm:$0xf0] }
 0x31d   : > { %v3848_v26 = vor.u32 %v4931_v22, %v3845_v23 }
 0x31e   : > { %1682 = vmatpush.bf16.msra.mxu0 %v3768_v57  ;;  %v3787_v57 = vld [vmem:[%s7749_s3 + $0x100] sm:$0xf] }
 0x31f   : > { %1704 = vmatpush.bf16.msrb.mxu1 %v3848_v26  ;;  %v4932_v26 = vld [vmem:[%s7749_s3 + $0x16c] sm:$0xf0] }
 0x320   : > { %1572 = vmatpush.bf16.msra.mxu3 %v3692_v35  ;;  %v4948_v35 = vld [vmem:[%s7749_s3 + $0x1ec] sm:$0xf0] }
 0x321   : > { %v3900_v40 = vor.u32 %v4948_v35, %v3899_v33  ;;  %v3717_v33 = vld [vmem:[%s7749_s3 + $0x78] sm:$0xf0] }
 0x322   : > { %v3720_v35 = vor.u32 %v4899_v29, %v3717_v33  ;;  %v3725_v33 = vld [vmem:[%s7749_s3 + $0x90] sm:$0xf0] }
 0x323   : > { %618 = vmax.xlane.f32.xlu2 %v5618_v13  ;;  %1705 = vmatpush.bf16.msrb.mxu1 %v3832_v32 }
 0x324   : > { %1573 = vmatpush.bf16.msra.mxu3 %v3676_v49 }
 0x327   : > { %1706 = vmatpush.bf16.msrb.mxu1 %v3816_v63  ;;  %v4924_v63 = vld [vmem:[%s7749_s3 + $0x12c] sm:$0xf0] }
 0x328   : > { %1574 = vmatpush.bf16.msra.mxu3 %v3660_v62  ;;  %v3800_v62 = vor.u32 %v4919_v58, %v3797_v59  ;;  %v4920_v58 = vld [vmem:[%s7749_s3 + $0x10c] sm:$0xf0]  ;;  %v4887_v59 = vld [vmem:[%s7749_s3 + $0xc] sm:$0xf] }
 0x32b   : > { %620 = vmax.xlane.f32.xlu2 %v5648_v34  ;;  %1707 = vmatpush.bf16.msrb.mxu1 %v3800_v62  ;;  %v3669_v62 = vld [vmem:[%s7749_s3 + $0x18] sm:$0xf0] }
 0x32c   : > { %1586 = vmatpush.bf16.msrb.mxu3 %v3900_v40  ;;  %v4928_v40 = vld [vmem:[%s7749_s3 + $0x14c] sm:$0xf0]  ;;  %v3672_v0 = vor.u32 %v4887_v59, %v3669_v62  ;;  %v4946_v62 = vld [vmem:[%s7749_s3 + $0x1e4] sm:$0xf] }
 0x32d   : > { %v3820_v47 = vor.u32 %v4928_v40, %v3819_v37 }
 0x330   : > { %614 = vmax.xlane.f32.xlu0 %v5677_v55  ;;  %1587 = vmatpush.bf16.msrb.mxu3 %v3884_v54 }
 0x333   : > { %941 = vmax.xlane.f32.xlu2 %v5689_v61  ;;  %935 = vmax.xlane.f32.xlu1 %v5701_v4 }
 0x334   : > { %1588 = vmatpush.bf16.msrb.mxu3 %v3868_v3  ;;  %v3773_v3 = vld [vmem:[%s7749_s3 + $0xf0] sm:$0xf0] }
 0x338   : > { %939 = vmax.xlane.f32.xlu0 %v5712_v12  ;;  %1589 = vmatpush.bf16.msrb.mxu3 %v3852_v8 }
 0x33b   : > { %622 = vmax.xlane.f32.xlu2 %v5727_v19 }
 0x33d   : > { %v687_v25 = vpop.xlane.xlu2 %686 }
 0x33e   : > { %5169 = vrcp.f32 %v687_v25  ;;  %v3835_v25 = vld [vmem:[%s7749_s3 + $0x160] sm:$0xf] }
 0x33f   : > { %v3836_v32 = vor.u32 %v4932_v26, %v3835_v25 }
 0x340   : > { %624 = vmax.xlane.f32.xlu0 %v5742_v27 }
 0x341   : > { %1590 = vmatpush.bf16.msrb.mxu3 %v3836_v32  ;;  %v4902_v32 = vld [vmem:[%s7749_s3 + $0x84] sm:$0xf] }
 0x344   : > { %v5170_v49 = vpop.eup %5169 }
 0x345   : > { %v689_v50 = vpop.xlane.xlu0 %688  ;;  %v777_v41 = vpop.permute.xlu2 %776  ;;  %v734_v44 = vmul.f32 %v5170_v49, %v5521_v15  ;;  %v3749_v15 = vld [vmem:[%s7749_s3 + $0xb8] sm:$0xf0]  ;;  %1591 = vmatpush.bf16.msrb.mxu3 %v3820_v47  ;;  %v4891_v49 = vld [vmem:[%s7749_s3 + $0x2c] sm:$0xf] }
 0x346   : > { %5171 = vrcp.f32 %v689_v50  ;;  %3654 = vmatmul.msk.bf16.gmra.mxu2 %vm476_vm2, %v777_v41  ;;  %v3752_v6 = vor.u32 %v4907_v2, %v3749_v15  ;;  %v3704_v50 = vor.u32 %v4895_v43, %v3701_v46  ;;  %v3803_v41 = vld [vmem:[%s7749_s3 + $0x120] sm:$0xf]  ;;  %v3688_v53 = vor.u32 %v4891_v49, %v3685_v52  ;;  %v4914_v2 = vld [vmem:[%s7749_s3 + $0xe4] sm:$0xf]  ;;  %v3709_v46 = vld [vmem:[%s7749_s3 + $0x70] sm:$0xf0] }
 0x347   : > { %v750_v9 = vpack.c.bf16 %v734_v44, %v734_v44  ;;  %v3804_v51 = vor.u32 %v4924_v63, %v3803_v41  ;;  %v3788_v44 = vor.u32 %v4920_v58, %v3787_v57  ;;  %v3776_v15 = vor.u32 %v4914_v2, %v3773_v3  ;;  %v3693_v41 = vld [vmem:[%s7749_s3 + $0x50] sm:$0xf0] }
 0x348   : > { %1683 = vmatpush.bf16.msra.mxu0 %v3752_v6  ;;  %v3677_v52 = vld [vmem:[%s7749_s3 + $0x30] sm:$0xf0] }
 0x349   : > { %v1103_v22 = vunpack.c.l.b16 %v750_v9  ;;  %1592 = vmatpush.bf16.msrb.mxu3 %v3804_v51  ;;  %v4890_v51 = vld [vmem:[%s7749_s3 + $0x24] sm:$0xf]  ;;  %v3661_v57 = vld [vmem:[%s7749_s3 + $0x10] sm:$0xf0] }
 0x34c   : > { %v5172_v5 = vpop.eup %5171 }
 0x34d   : > { %v735_v10 = vmul.f32 %v5172_v5, %v5524_v20  ;;  %v691_v11 = vpop.xlane.xlu0 %690  ;;  %v3733_v20 = vld [vmem:[%s7749_s3 + $0x98] sm:$0xf0]  ;;  %1593 = vmatpush.bf16.msrb.mxu3 %v3788_v44 }
 0x34e   : > { %v3736_v21 = vor.u32 %v4903_v17, %v3733_v20 }
 0x34f   : > { %v751_v18 = vpack.c.bf16 %v735_v10, %v735_v10 }
 0x350   : > { %1684 = vmatpush.bf16.msra.mxu0 %v3736_v21  ;;  %v3741_v21 = vld [vmem:[%s7749_s3 + $0xb0] sm:$0xf0] }
 0x351   : > { %v1104_v23 = vunpack.c.l.b16 %v751_v18 }
 0x353   : > { %v5823_v31 = vpack.c.b16 %v1104_v23, %v1103_v22 }
 0x354   : > { %1685 = vmatpush.bf16.msra.mxu0 %v3720_v35  ;;  %v3728_v35 = vor.u32 %v4902_v32, %v3725_v33  ;;  %v4930_v33 = vld [vmem:[%s7749_s3 + $0x164] sm:$0xf] }
 0x355   : > { %v1008_v45 = vpop.xlane.xlu0 %1007  ;;  %1575 = vmatmul.bf16.vlgmr.msra.gmra.mxu3 %v5823_v31  ;;  %1651 = vmatmul.bf16.vlgmr.msrb.gmra.mxu0 %v5823_v31 }
 0x356   : > { %5173 = vrcp.f32 %v1008_v45  ;;  %1605 = vmatpush.bf16.msra.mxu3 %v3776_v15 }
 0x358   : > { %1686 = vmatpush.bf16.msra.mxu0 %v3704_v50  ;;  %v4894_v50 = vld [vmem:[%s7749_s3 + $0x44] sm:$0xf] }
 0x359   : > { %v3696_v63 = vor.u32 %v4894_v50, %v3693_v41  ;;  %v4922_v50 = vld [vmem:[%s7749_s3 + $0x124] sm:$0xf]  ;;  %v3805_v41 = vld [vmem:[%s7749_s3 + $0x130] sm:$0xf0] }
 0x35c   : > { %v5174_v56 = vpop.eup %5173  ;;  %1687 = vmatpush.bf16.msra.mxu0 %v3688_v53  ;;  %v3680_v53 = vor.u32 %v4890_v51, %v3677_v52  ;;  %v4918_v52 = vld [vmem:[%s7749_s3 + $0x104] sm:$0xf] }
 0x35d   : > { %v1010_v54 = vpop.xlane.xlu0 %1009  ;;  %v1055_v1 = vmul.f32 %v5174_v56, %v5530_v28  ;;  %v4910_v28 = vld [vmem:[%s7749_s3 + $0xc4] sm:$0xf] }
 0x35e   : > { %5175 = vrcp.f32 %v1010_v54  ;;  %v3760_v17 = vor.u32 %v4910_v28, %v3757_v7  ;;  %v4886_v56 = vld [vmem:[%s7749_s3 + $0x4] sm:$0xf] }
 0x35f   : > { %5177 = vrcp.f32 %v691_v11  ;;  %v1071_v10 = vpack.c.bf16 %v1055_v1, %v1055_v1  ;;  %v3664_v59 = vor.u32 %v4886_v56, %v3661_v57 }
 0x360   : > { %1688 = vmatpush.bf16.msra.mxu0 %v3672_v0  ;;  %1606 = vmatpush.bf16.msra.mxu3 %v3760_v17  ;;  %v3901_v0 = vld [vmem:[%s7749_s3 + $0x1f0] sm:$0xf0] }
 0x361   : > { %v1151_v8 = vunpack.c.l.b16 %v1071_v10  ;;  %v3904_v1 = vor.u32 %v4946_v62, %v3901_v0 }
 0x363   : > { %v693_v6 = vpop.xlane.xlu1 %692 }
 0x364   : > { %v5176_v5 = vpop.eup %5175  ;;  %5179 = vrcp.f32 %v693_v6  ;;  %v3885_v6 = vld [vmem:[%s7749_s3 + $0x1d0] sm:$0xf0] }
 0x365   : > { %v5178_v9 = vpop.eup %5177  ;;  %v1056_v11 = vmul.f32 %v5176_v5, %v5536_v38  ;;  %v4906_v38 = vld [vmem:[%s7749_s3 + $0xa4] sm:$0xf]  ;;  %v1014_v43 = vpop.xlane.xlu0 %1013 }
 0x366   : > { %v736_v18 = vmul.f32 %v5178_v9, %v5527_v24  ;;  %v3744_v25 = vor.u32 %v4906_v38, %v3741_v21  ;;  %5181 = vrcp.f32 %v1014_v43  ;;  %v4934_v21 = vld [vmem:[%s7749_s3 + $0x184] sm:$0xf] }
 0x367   : > { %v1072_v16 = vpack.c.bf16 %v1056_v11, %v1056_v11  ;;  %v4926_v43 = vld [vmem:[%s7749_s3 + $0x144] sm:$0xf] }
 0x368   : > { %v752_v26 = vpack.c.bf16 %v736_v18, %v736_v18  ;;  %1607 = vmatpush.bf16.msra.mxu3 %v3744_v25  ;;  %v4938_v18 = vld [vmem:[%s7749_s3 + $0x1a4] sm:$0xf] }
 0x369   : > { %v1152_v20 = vunpack.c.l.b16 %v1072_v16 }
 0x36a   : > { %v5180_v22 = vpop.eup %5179  ;;  %v1105_v37 = vunpack.c.l.b16 %v752_v26  ;;  %v875_v9 = vpop.f32.mrf.mxu2 }
 0x36b   : > { %v5887_v23 = vpack.c.b16 %v1152_v20, %v1151_v8  ;;  %v737_v29 = vmul.f32 %v5180_v22, %v5539_v39  ;;  %v4898_v39 = vld [vmem:[%s7749_s3 + $0x64] sm:$0xf]  ;;  %v3869_v8 = vld [vmem:[%s7749_s3 + $0x1b0] sm:$0xf0]  ;;  %v903_v51 = vmul.f32 0.17677669, %v875_v9 }
 0x36c   : > { %1608 = vmatpush.bf16.msra.mxu3 %v3728_v35  ;;  %v3712_v47 = vor.u32 %v4898_v39, %v3709_v46  ;;  %v5182_v58 = vpop.eup %5181  ;;  %v3872_v20 = vor.u32 %v4938_v18, %v3869_v8  ;;  %v3853_v22 = vld [vmem:[%s7749_s3 + $0x190] sm:$0xf0]  ;;  %v3859_v18 = vld [vmem:[%s7749_s3 + $0x188] sm:$0xf]  ;;  %v4937_v8 = vld [vmem:[%s7749_s3 + $0x194] sm:$0xf0] }
 0x36d   : > { %1708 = vmatmul.bf16.vlgmr.msrb.gmra.mxu1 %v5887_v23  ;;  %v753_v24 = vpack.c.bf16 %v737_v29, %v737_v29  ;;  %v1058_v44 = vmul.f32 %v5182_v58, %v5541_v30  ;;  %v4942_v30 = vld [vmem:[%s7749_s3 + $0x1c4] sm:$0xf]  ;;  %v3856_v26 = vor.u32 %v4934_v21, %v3853_v22  ;;  %v3837_v35 = vld [vmem:[%s7749_s3 + $0x170] sm:$0xf0]  ;;  %v6000_v57 = vadd.f32 %v5717_v14, %v903_v51  ;;  %v3843_v21 = vld [vmem:[%s7749_s3 + $0x168] sm:$0xf] }
 0x36e   : > { %v3888_v11 = vor.u32 %v4942_v30, %v3885_v6  ;;  %v3821_v39 = vld [vmem:[%s7749_s3 + $0x150] sm:$0xf0]  ;;  %v4941_v6 = vld [vmem:[%s7749_s3 + $0x1b4] sm:$0xf0] }
 0x36f   : > { %v1106_v40 = vunpack.c.l.b16 %v753_v24  ;;  %v1074_v3 = vpack.c.bf16 %v1058_v44, %v1058_v44  ;;  %v3824_v46 = vor.u32 %v4926_v43, %v3821_v39  ;;  %v4949_v44 = vld [vmem:[%s7749_s3 + $0x1f4] sm:$0xf0] }
 0x370   : > { %1609 = vmatpush.bf16.msra.mxu3 %v3712_v47  ;;  %v4933_v22 = vld [vmem:[%s7749_s3 + $0x174] sm:$0xf0] }
 0x371   : > { %v5897_v45 = vpack.c.b16 %v1106_v40, %v1105_v37  ;;  %v3840_v37 = vor.u32 %v4930_v33, %v3837_v35  ;;  %v3827_v35 = vld [vmem:[%s7749_s3 + $0x148] sm:$0xf]  ;;  %v3588_v39 = vld [vmem:[%s7747_s1 + $0xd8] sm:$0xff] }
 0x372   : > { %v877_v24 = vpop.f32.mrf.mxu2 }
 0x373   : > { %1580 = vmatmul.bf16.gmra.mxu3 %v5897_v45  ;;  %1656 = vmatmul.bf16.gmra.mxu0 %v5897_v45  ;;  %v904_v40 = vmul.f32 0.17677669, %v877_v24 }
 0x374   : > { %1610 = vmatpush.bf16.msra.mxu3 %v3696_v63 }
 0x375   : > { %v5980_v47 = vadd.f32 %v5733_v36, %v904_v40 }
 0x378   : > { %v779_v49 = vpop.permute.xlu0 %778  ;;  %1611 = vmatpush.bf16.msra.mxu3 %v3680_v53  ;;  %v3789_v53 = vld [vmem:[%s7749_s3 + $0x110] sm:$0xf0] }
 0x379   : > { %3655 = vmatmul.msk.bf16.gmra.mxu2 %vm476_vm2, %v779_v49  ;;  %v3808_v49 = vor.u32 %v4922_v50, %v3805_v41  ;;  %v3792_v56 = vor.u32 %v4918_v52, %v3789_v53  ;;  %v4921_v52 = vld [vmem:[%s7749_s3 + $0x114] sm:$0xf0] }
 0x37b   : > { %v781_v28 = vpop.permute.xlu1 %780 }
 0x37c   : > { %1612 = vmatpush.bf16.msra.mxu3 %v3664_v59  ;;  %v3907_v59 = vld [vmem:[%s7749_s3 + $0x1e8] sm:$0xf] }
 0x37d   : > { %v3908_v0 = vor.u32 %v4949_v44, %v3907_v59 }
 0x37e   : > { %v1012_v54 = vpop.xlane.xlu2 %1011 }
 0x37f   : > { %5183 = vrcp.f32 %v1012_v54 }
 0x383   : > { %1594 = vmatmul.bf16.vlgmr.msrb.gmra.mxu3 %v5887_v23  ;;  %1689 = vmatmul.bf16.vlgmr.msra.gmra.mxu0 %v5823_v31 }
 0x384   : > { %1624 = vmatpush.bf16.msrb.mxu3 %v3904_v1  ;;  %v3891_v1 = vld [vmem:[%s7749_s3 + $0x1c8] sm:$0xf] }
 0x385   : > { %v5184_v2 = vpop.eup %5183 }
 0x386   : > { %v1057_v15 = vmul.f32 %v5184_v2, %v5551_v42  ;;  %v617_v5 = vpop.xlane.xlu2 %616  ;;  %v1154_v42 = vunpack.c.l.b16 %v1074_v3  ;;  %v4945_v2 = vld [vmem:[%s7749_s3 + $0x1d4] sm:$0xf0] }
 0x387   : > { %v643_v10 = vsub.f32 %v5559_v48, %v617_v5 }
 0x388   : > { %v1073_v7 = vpack.c.bf16 %v1057_v15, %v1057_v15  ;;  %1625 = vmatpush.bf16.msrb.mxu3 %v3888_v11  ;;  %v3892_v15 = vor.u32 %v4945_v2, %v3891_v1 }
 0x389   : > { %v664_v16 = vmul.f32 1.442695, %v643_v10  ;;  %3656 = vmatmul.msk.bf16.gmra.mxu2 %vm476_vm2, %v781_v28 }
 0x38a   : > { %v1153_v17 = vunpack.c.l.b16 %v1073_v7 }
 0x38b   : > { %5185 = vpow2.f32 %v664_v16  ;;  %v3587_v16 = vld [vmem:[%s7747_s1 + $0xd0] sm:$0xff] }
 0x38c   : > { %v5950_v48 = vpack.c.b16 %v1154_v42, %v1153_v17  ;;  %1626 = vmatpush.bf16.msrb.mxu3 %v3872_v20 }
 0x38e   : > { %1713 = vmatmul.bf16.gmra.mxu1 %v5950_v48  ;;  %v938_v38 = vpop.xlane.xlu2 %937 }
 0x38f   : > { %v964_v25 = vsub.f32 %v5583_v60, %v938_v38 }
 0x390   : > { %1627 = vmatpush.bf16.msrb.mxu3 %v3856_v26 }
 0x391   : > { %v5960_v29 = vpop.eup %5185  ;;  %v985_v32 = vmul.f32 1.442695, %v964_v25  ;;  %v3844_v25 = vor.u32 %v4933_v22, %v3843_v21  ;;  %v4075_v22 = vld [vmem:[%s7749_s3 + $0x2c0] sm:$0xf] }
 0x392   : > { %696 = vadd.xlane.f32.xlu2 %v5960_v29 }
 0x393   : > { %5187 = vpow2.f32 %v985_v32  ;;  %1599 = vmatmul.bf16.gmra.mxu3 %v5950_v48  ;;  %1694 = vmatmul.bf16.gmra.mxu0 %v5897_v45 }
 0x394   : > { %1628 = vmatpush.bf16.msrb.mxu3 %v3840_v37  ;;  %v4929_v37 = vld [vmem:[%s7749_s3 + $0x154] sm:$0xf0] }
 0x396   : > { %v5971_v60 = vpop.xlane.xlu2 %618 }
 0x397   : > { %v644_v20 = vsub.f32 %v5618_v13, %v5971_v60 }
 0x398   : > { %1629 = vmatpush.bf16.msrb.mxu3 %v3824_v46  ;;  %v3811_v46 = vld [vmem:[%s7749_s3 + $0x128] sm:$0xf] }
 0x399   : > { %v5988_v63 = vpop.eup %5187  ;;  %v666_v26 = vmul.f32 1.442695, %v644_v20  ;;  %v4093_v20 = vld [vmem:[%s7749_s3 + $0x2f0] sm:$0xf0] }
 0x39a   : > { %945 = vmax.xlane.f32.xlu2 %v5980_v47  ;;  %1017 = vadd.xlane.f32.xlu1 %v5988_v63 }
 0x39c   : > { %1630 = vmatpush.bf16.msrb.mxu3 %v3808_v49 }
 0x39e   : > { %v621_v36 = vpop.xlane.xlu2 %620 }
 0x39f   : > { %v645_v54 = vsub.f32 %v5648_v34, %v621_v36  ;;  %v3795_v36 = vld [vmem:[%s7749_s3 + $0x108] sm:$0xf] }
 0x3a0   : > { %1631 = vmatpush.bf16.msrb.mxu3 %v3792_v56  ;;  %v3796_v53 = vor.u32 %v4921_v52, %v3795_v36  ;;  %v5010_v36 = vld [vmem:[%s7749_s3 + $0x3e4] sm:$0xf]  ;;  %v4221_v52 = vld [vmem:[%s7749_s3 + $0x3f0] sm:$0xf0] }
 0x3a1   : > { %v668_v58 = vmul.f32 1.442695, %v645_v54 }
 0x3a2   : > { %943 = vmax.xlane.f32.xlu1 %v6000_v57 }
 0x3a3   : > { %5189 = vpow2.f32 %v668_v58  ;;  %v615_v62 = vpop.xlane.xlu0 %614  ;;  %1613 = vmatmul.bf16.vlgmr.msra.gmra.mxu3 %v5823_v31  ;;  %v3875_v31 = vld [vmem:[%s7749_s3 + $0x1a8] sm:$0xf] }
 0x3a4   : > { %v642_v34 = vsub.f32 %v5677_v55, %v615_v62  ;;  %1662 = vmatpush.bf16.msra.mxu3 %v3908_v0  ;;  %v559_v55 = vpop.f32.mrf.mxu1  ;;  %v3876_v28 = vor.u32 %v4941_v6, %v3875_v31  ;;  %v6114_v6 = vld [vmem:[%s7747_s1 + $0xe8] sm:$0xff] }
 0x3a5   : > { %v584_v7 = vmul.f32 0.17677669, %v559_v55 }
 0x3a6   : > { %v662_v14 = vmul.f32 1.442695, %v642_v34  ;;  %v936_v3 = vpop.xlane.xlu1 %935  ;;  %v942_v10 = vpop.xlane.xlu2 %941 }
 0x3a7   : > { %v963_v5 = vsub.f32 %v5701_v4, %v936_v3  ;;  %v6042_v38 = vadd.f32 %v3587_v16, %v584_v7  ;;  %v966_v40 = vsub.f32 %v5689_v61, %v942_v10  ;;  %v4925_v61 = vld [vmem:[%s7749_s3 + $0x134] sm:$0xf0]  ;;  %v6101_v3 = vld [vmem:[%s7747_s1 + $0xe0] sm:$0xff] }
 0x3a8   : > { %5191 = vpow2.f32 %v662_v14  ;;  %1663 = vmatpush.bf16.msra.mxu3 %v3892_v15  ;;  %v3812_v41 = vor.u32 %v4925_v61, %v3811_v46  ;;  %v5012_v46 = vld [vmem:[%s7749_s3 + $0x3ec] sm:$0xf0]  ;;  %v4970_v61 = vld [vmem:[%s7749_s3 + $0x2a4] sm:$0xf] }
 0x3a9   : > { %v6018_v30 = vpop.eup %5189  ;;  %v983_v9 = vmul.f32 1.442695, %v963_v5  ;;  %v989_v50 = vmul.f32 1.442695, %v966_v40 }
 0x3aa   : > { %700 = vadd.xlane.f32.xlu1 %v6018_v30 }
 0x3ab   : > { %v940_v11 = vpop.xlane.xlu0 %939  ;;  %5193 = vpow2.f32 %v983_v9 }
 0x3ac   : > { %v965_v4 = vsub.f32 %v5712_v12, %v940_v11  ;;  %1664 = vmatpush.bf16.msra.mxu3 %v3876_v28  ;;  %v3860_v12 = vor.u32 %v4937_v8, %v3859_v18  ;;  %v561_v33 = vpop.f32.mrf.mxu1  ;;  %v4091_v18 = vld [vmem:[%s7749_s3 + $0x2e0] sm:$0xf]  ;;  %v4980_v8 = vld [vmem:[%s7749_s3 + $0x2ec] sm:$0xf0] }
 0x3ad   : > { %v585_v43 = vmul.f32 0.17677669, %v561_v33  ;;  %v4077_v33 = vld [vmem:[%s7749_s3 + $0x2d0] sm:$0xf0] }
 0x3ae   : > { %v6031_v42 = vpop.eup %5191  ;;  %v987_v17 = vmul.f32 1.442695, %v965_v4  ;;  %v623_v13 = vpop.xlane.xlu2 %622 }
 0x3af   : > { %694 = vadd.xlane.f32.xlu0 %v6031_v42  ;;  %v646_v60 = vsub.f32 %v5727_v19, %v623_v13  ;;  %v6075_v51 = vadd.f32 %v3588_v39, %v585_v43  ;;  %v4219_v43 = vld [vmem:[%s7749_s3 + $0x3e0] sm:$0xf] }
 0x3b0   : > { %5195 = vpow2.f32 %v987_v17  ;;  %1665 = vmatpush.bf16.msra.mxu3 %v3860_v12  ;;  %v4092_v12 = vor.u32 %v4980_v8, %v4091_v18  ;;  %v5006_v18 = vld [vmem:[%s7749_s3 + $0x3c4] sm:$0xf]  ;;  %v4205_v8 = vld [vmem:[%s7749_s3 + $0x3d0] sm:$0xf0] }
 0x3b1   : > { %v6052_v24 = vpop.eup %5193  ;;  %5197 = vpow2.f32 %v666_v26  ;;  %v670_v49 = vmul.f32 1.442695, %v646_v60  ;;  %v4974_v26 = vld [vmem:[%s7749_s3 + $0x2c4] sm:$0xf]  ;;  %v4972_v60 = vld [vmem:[%s7749_s3 + $0x2ac] sm:$0xf0] }
 0x3b2   : > { %626 = vmax.xlane.f32.xlu1 %v6042_v38  ;;  %5199 = vpow2.f32 %v989_v50  ;;  %2104 = vmatpush.bf16.msrb.mxu2 %v4092_v12  ;;  %v4061_v50 = vld [vmem:[%s7749_s3 + $0x2b0] sm:$0xf0]  ;;  %v4208_v12 = vor.u32 %v5006_v18, %v4205_v8 }
 0x3b3   : > { %1618 = vmatmul.bf16.gmra.mxu3 %v5897_v45  ;;  %v3828_v45 = vor.u32 %v4929_v37, %v3827_v35  ;;  %5201 = vpow2.f32 %v670_v49  ;;  %v625_v0 = vpop.xlane.xlu0 %624  ;;  %v4080_v37 = vor.u32 %v4974_v26, %v4077_v33  ;;  %v4064_v49 = vor.u32 %v4970_v61, %v4061_v50  ;;  %v5004_v33 = vld [vmem:[%s7749_s3 + $0x3ac] sm:$0xf0] }
 0x3b4   : > { %1666 = vmatpush.bf16.msra.mxu3 %v3844_v25  ;;  %v564_v44 = vpop.f32.mrf.mxu1  ;;  %v647_v34 = vsub.f32 %v5742_v27, %v625_v0  ;;  %v4976_v25 = vld [vmem:[%s7749_s3 + $0x2cc] sm:$0xf0] }
 0x3b5   : > { %v586_v14 = vmul.f32 0.17677669, %v564_v44  ;;  %v4076_v13 = vor.u32 %v4976_v25, %v4075_v22  ;;  %v4968_v44 = vld [vmem:[%s7749_s3 + $0x28c] sm:$0xf0]  ;;  %v4187_v25 = vld [vmem:[%s7749_s3 + $0x3a0] sm:$0xf] }
 0x3b6   : > { %v6054_v32 = vpop.eup %5195  ;;  %v672_v15 = vmul.f32 1.442695, %v647_v34  ;;  %v4203_v34 = vld [vmem:[%s7749_s3 + $0x3c0] sm:$0xf]  ;;  %v4964_v22 = vld [vmem:[%s7749_s3 + $0x26c] sm:$0xf0] }
 0x3b7   : > { %1015 = vadd.xlane.f32.xlu0 %v6052_v24  ;;  %1019 = vadd.xlane.f32.xlu2 %v6054_v32  ;;  %v6077_v19 = vpop.eup %5197  ;;  %v6107_v31 = vadd.f32 %v6101_v3, %v586_v14  ;;  %v5008_v14 = vld [vmem:[%s7749_s3 + $0x3cc] sm:$0xf0] }
 0x3b8   : > { %1667 = vmatpush.bf16.msra.mxu3 %v3828_v45  ;;  %v6088_v54 = vpop.eup %5199  ;;  %5203 = vpow2.f32 %v672_v15  ;;  %2105 = vmatpush.bf16.msrb.mxu2 %v4076_v13  ;;  %v4059_v45 = vld [vmem:[%s7749_s3 + $0x2a0] sm:$0xf] }
 0x3b9   : > { %v6090_v56 = vpop.eup %5201 }
 0x3bc   : > { %1668 = vmatpush.bf16.msra.mxu3 %v3812_v41  ;;  %v566_v55 = vpop.f32.mrf.mxu1  ;;  %v4220_v41 = vor.u32 %v5012_v46, %v4219_v43  ;;  %v4189_v46 = vld [vmem:[%s7749_s3 + $0x3b0] sm:$0xf0] }
 0x3bd   : > { %v587_v27 = vmul.f32 0.17677669, %v566_v55  ;;  %v4204_v55 = vor.u32 %v5008_v14, %v4203_v34 }
 0x3be   : > { %v6119_v10 = vpop.eup %5203 }
 0x3bf   : > { %628 = vmax.xlane.f32.xlu2 %v6075_v51  ;;  %698 = vadd.xlane.f32.xlu0 %v6077_v19  ;;  %v6117_v9 = vadd.f32 %v6114_v6, %v587_v27  ;;  %v4045_v27 = vld [vmem:[%s7749_s3 + $0x290] sm:$0xf0] }
 0x3c0   : > { %1669 = vmatpush.bf16.msra.mxu3 %v3796_v53 }
 0x3c3   : > { %1632 = vmatmul.bf16.vlgmr.msrb.gmra.mxu3 %v5887_v23 }
 0x3c4   : > { %v6130_v4 = vpop.f32.mrf.mxu1  ;;  %2123 = vmatpush.bf16.msrb.mxu3 %v4220_v41 }
 0x3c7   : > { %1021 = vadd.xlane.f32.xlu0 %v6088_v54  ;;  %702 = vadd.xlane.f32.xlu2 %v6090_v56 }
 0x3c8   : > { %2124 = vmatpush.bf16.msrb.mxu3 %v4204_v55  ;;  %v4998_v55 = vld [vmem:[%s7749_s3 + $0x384] sm:$0xf] }
 0x3c9   : > { %v880_v58 = vpop.f32.mrf.mxu2 }
 0x3ca   : > { %v905_v59 = vmul.f32 0.17677669, %v880_v58  ;;  %v4224_v58 = vor.u32 %v5010_v36, %v4221_v52  ;;  %v4011_v36 = vld [vmem:[%s7749_s3 + $0x240] sm:$0xf]  ;;  %v4960_v52 = vld [vmem:[%s7749_s3 + $0x24c] sm:$0xf0] }
 0x3cc   : > { %v6094_v62 = vadd.f32 %v3587_v16, %v905_v59  ;;  %v4043_v59 = vld [vmem:[%s7749_s3 + $0x280] sm:$0xf]  ;;  %2161 = vmatpush.bf16.msra.mxu1 %v4224_v58  ;;  %v4012_v58 = vor.u32 %v4960_v52, %v4011_v36 }
 0x3cd   : > { %v4044_v0 = vor.u32 %v4968_v44, %v4043_v59  ;;  %v4171_v59 = vld [vmem:[%s7749_s3 + $0x380] sm:$0xf]  ;;  %v5000_v44 = vld [vmem:[%s7749_s3 + $0x38c] sm:$0xf0] }
 0x3cf   : > { %947 = vmax.xlane.f32.xlu0 %v6094_v62 }
 0x3d0   : > { %2162 = vmatpush.bf16.msra.mxu1 %v4208_v12 }
 0x3d1   : > { %v882_v1 = vpop.f32.mrf.mxu2 }
 0x3d2   : > { %v906_v2 = vmul.f32 0.17677669, %v882_v1  ;;  %v6122_v11 = vpop.f32.mrf.mxu0  ;;  %v4966_v1 = vld [vmem:[%s7749_s3 + $0x284] sm:$0xf] }
 0x3d3   : > { %1637 = vmatmul.bf16.gmra.mxu3 %v5950_v48  ;;  %7767 = vst [vmem:[#allocation2_spill] sm:$0xff] %v6122_v11 }
 0x3d4   : > { %v6104_v5 = vadd.f32 %v3588_v39, %v906_v2  ;;  %v4060_v39 = vor.u32 %v4972_v60, %v4059_v45  ;;  %v4029_v45 = vld [vmem:[%s7749_s3 + $0x270] sm:$0xf0]  ;;  %v4188_v60 = vor.u32 %v5004_v33, %v4187_v25  ;;  %v4996_v25 = vld [vmem:[%s7749_s3 + $0x36c] sm:$0xf0] }
 0x3d5   : > { %v3997_v33 = vld [vmem:[%s7749_s3 + $0x230] sm:$0xf0] }
 0x3d6   : > { %949 = vmax.xlane.f32.xlu1 %v6104_v5  ;;  %2106 = vmatpush.bf16.msrb.mxu2 %v4060_v39  ;;  %v5002_v39 = vld [vmem:[%s7749_s3 + $0x3a4] sm:$0xf] }
 0x3d7   : > { %630 = vmax.xlane.f32.xlu0 %v6107_v31  ;;  %v4192_v50 = vor.u32 %v5002_v39, %v4189_v46  ;;  %2125 = vmatpush.bf16.msrb.mxu3 %v4188_v60  ;;  %v4994_v60 = vld [vmem:[%s7749_s3 + $0x364] sm:$0xf] }
 0x3d8   : > { %v6126_v28 = vpop.f32.mrf.mxu3 }
 0x3d9   : > { %2163 = vmatpush.bf16.msra.mxu1 %v4192_v50  ;;  %v3979_v50 = vld [vmem:[%s7749_s3 + $0x200] sm:$0xf] }
 0x3da   : > { %v6128_v7 = vpop.f32.mrf.mxu0  ;;  %2107 = vmatpush.bf16.msrb.mxu2 %v4044_v0  ;;  %v4958_v0 = vld [vmem:[%s7749_s3 + $0x244] sm:$0xf] }
 0x3db   : > { %7768 = vst [vmem:[#allocation3_spill] sm:$0xff] %v6128_v7 }
 0x3de   : > { %632 = vmax.xlane.f32.xlu1 %v6117_v9 }
 0x3df   : > { %704 = vadd.xlane.f32.xlu0 %v6119_v10 }
 0x3e0   : > { %v6132_v16 = vpop.f32.mrf.mxu3 }
 0x3e3   : > { %1670 = vmatmul.bf16.vlgmr.msra.gmra.mxu3 %v5887_v23  ;;  %v4978_v23 = vld [vmem:[%s7749_s3 + $0x2e4] sm:$0xf] }
 0x3e4   : > { %v4096_v21 = vor.u32 %v4978_v23, %v4093_v20  ;;  %v4048_v23 = vor.u32 %v4966_v1, %v4045_v27  ;;  %v4172_v1 = vor.u32 %v5000_v44, %v4171_v59  ;;  %v4173_v27 = vld [vmem:[%s7749_s3 + $0x390] sm:$0xf0]  ;;  %v4992_v59 = vld [vmem:[%s7749_s3 + $0x34c] sm:$0xf0]  ;;  %v4950_v44 = vld [vmem:[%s7749_s3 + $0x204] sm:$0xf] }
 0x3e6   : > { %2142 = vmatpush.bf16.msrb.mxu0 %v4096_v21  ;;  %v4027_v21 = vld [vmem:[%s7749_s3 + $0x260] sm:$0xf]  ;;  %2126 = vmatpush.bf16.msrb.mxu3 %v4172_v1  ;;  %v4990_v1 = vld [vmem:[%s7749_s3 + $0x344] sm:$0xf] }
 0x3e7   : > { %v4028_v13 = vor.u32 %v4964_v22, %v4027_v21  ;;  %v4956_v21 = vld [vmem:[%s7749_s3 + $0x22c] sm:$0xf0] }
 0x3e9   : > { %2108 = vmatpush.bf16.msrb.mxu2 %v4028_v13  ;;  %v4954_v13 = vld [vmem:[%s7749_s3 + $0x224] sm:$0xf] }
 0x3ea   : > { %2143 = vmatpush.bf16.msrb.mxu0 %v4080_v37  ;;  %v4962_v37 = vld [vmem:[%s7749_s3 + $0x264] sm:$0xf] }
 0x3eb   : > { %v4032_v43 = vor.u32 %v4962_v37, %v4029_v45  ;;  %v4000_v45 = vor.u32 %v4954_v13, %v3997_v33  ;;  %v4125_v33 = vld [vmem:[%s7749_s3 + $0x330] sm:$0xf0] }
 0x3ed   : > { %2109 = vmatpush.bf16.msrb.mxu2 %v4012_v58  ;;  %v4139_v58 = vld [vmem:[%s7749_s3 + $0x340] sm:$0xf] }
 0x3ee   : > { %2144 = vmatpush.bf16.msrb.mxu0 %v4064_v49 }
 0x3f0   : > { %v6134_v17 = vpop.f32.mrf.mxu0 }
 0x3f1   : > { %7769 = vst [vmem:[#allocation4_spill] sm:$0xff] %v6134_v17 }
 0x3f2   : > { %2145 = vmatpush.bf16.msrb.mxu0 %v4048_v23 }
 0x3f3   : > { %1675 = vmatmul.bf16.gmra.mxu3 %v5950_v48  ;;  %v6161_v48 = vpop.f32.mrf.mxu1 }
 0x3f6   : > { %v6163_v35 = vpop.f32.mrf.mxu3  ;;  %2146 = vmatpush.bf16.msrb.mxu0 %v4032_v43  ;;  %v4157_v43 = vld [vmem:[%s7749_s3 + $0x370] sm:$0xf0] }
 0x3f7   : > { %v4160_v39 = vor.u32 %v4994_v60, %v4157_v43 }
 0x3f8   : > { %v6165_v40 = vpop.f32.mrf.mxu0 }
 0x3f9   : > { %7770 = vst [vmem:[#allocation5_spill] sm:$0xff] %v6165_v40 }
 0x3fb   : > { %v1709_v2 = vpop.f32.mrf.mxu1 }
 0x3fc   : > { %v6191_v53 = vpop.f32.mrf.mxu2 }
 0x3fe   : > { %v6208_v15 = vpop.f32.mrf.mxu3 }
 0x400   : > { %v1690_v20 = vpop.f32.mrf.mxu0 }
 0x401   : > { %v6228_v26 = vadd.f32 %v1709_v2, %v1690_v20  ;;  %v4013_v2 = vld [vmem:[%s7749_s3 + $0x250] sm:$0xf0]  ;;  %v3995_v20 = vld [vmem:[%s7749_s3 + $0x220] sm:$0xf] }
 0x402   : > { %v4016_v8 = vor.u32 %v4958_v0, %v4013_v2  ;;  %v3996_v22 = vor.u32 %v4956_v21, %v3995_v20  ;;  %v4141_v2 = vld [vmem:[%s7749_s3 + $0x350] sm:$0xf0]  ;;  %v4123_v21 = vld [vmem:[%s7749_s3 + $0x320] sm:$0xf] }
 0x403   : > { %7771 = vst [vmem:[#allocation6_spill] sm:$0xff] %v6228_v26  ;;  %v6277_v23 = vpop.f32.mrf.mxu1 }
 0x404   : > { %v887_v61 = vpop.f32.mrf.mxu2  ;;  %7772 = vst [vmem:[#allocation7_spill] sm:$0xff] %v6277_v23  ;;  %2147 = vmatpush.bf16.msrb.mxu0 %v4016_v8  ;;  %2110 = vmatpush.bf16.msrb.mxu2 %v3996_v22  ;;  %v4144_v8 = vor.u32 %v4990_v1, %v4141_v2  ;;  %v4986_v22 = vld [vmem:[%s7749_s3 + $0x324] sm:$0xf] }
 0x405   : > { %v908_v41 = vmul.f32 0.17677669, %v887_v61  ;;  %v6245_v49 = vpop.xlane.xlu2 %696  ;;  %v4128_v60 = vor.u32 %v4986_v22, %v4125_v33  ;;  %v4067_v22 = vld [vmem:[%s7749_s3 + $0x2a8] sm:$0xf] }
 0x406   : > { %v1595_v34 = vpop.f32.mrf.mxu3  ;;  %v4227_v33 = vld [vmem:[%s7749_s3 + $0x3e8] sm:$0xf] }
 0x407   : > { %v6263_v14 = vadd.f32 %v6114_v6, %v908_v41  ;;  %v6275_v18 = vadd.f32 %v1595_v34, %v6126_v28  ;;  %v4176_v6 = vor.u32 %v4998_v55, %v4173_v27  ;;  %v4155_v28 = vld [vmem:[%s7749_s3 + $0x360] sm:$0xf]  ;;  %v4952_v41 = vld [vmem:[%s7749_s3 + $0x20c] sm:$0xf0]  ;;  %v4140_v34 = vor.u32 %v4992_v59, %v4139_v58 }
 0x408   : > { %v6279_v12 = vpop.f32.mrf.mxu0  ;;  %v4156_v37 = vor.u32 %v4996_v25, %v4155_v28  ;;  %2148 = vmatpush.bf16.msrb.mxu0 %v4000_v45  ;;  %v3980_v52 = vor.u32 %v4952_v41, %v3979_v50  ;;  %v4988_v28 = vld [vmem:[%s7749_s3 + $0x32c] sm:$0xf0]  ;;  %v4981_v45 = vld [vmem:[%s7749_s3 + $0x2f4] sm:$0xf0] }
 0x409   : > { %7773 = vst [vmem:[#allocation8_spill] sm:$0xff] %v6279_v12  ;;  %953 = vmax.xlane.f32.xlu0 %v6263_v14  ;;  %2164 = vmatpush.bf16.msra.mxu1 %v4176_v6  ;;  %v4124_v13 = vor.u32 %v4988_v28, %v4123_v21 }
 0x40a   : > { %2127 = vmatpush.bf16.msrb.mxu3 %v4156_v37  ;;  %2111 = vmatpush.bf16.msrb.mxu2 %v3980_v52  ;;  %v4099_v37 = vld [vmem:[%s7749_s3 + $0x2e8] sm:$0xf]  ;;  %v4984_v52 = vld [vmem:[%s7749_s3 + $0x30c] sm:$0xf0] }
 0x40b   : > { %v1714_v6 = vpop.f32.mrf.mxu1  ;;  %v4100_v43 = vor.u32 %v4981_v45, %v4099_v37  ;;  %v5013_v37 = vld [vmem:[%s7749_s3 + $0x3f4] sm:$0xf0]  ;;  %v4971_v45 = vld [vmem:[%s7749_s3 + $0x2ac] sm:$0xf] }
 0x40d   : > { %v6306_v46 = vpop.xlane.xlu1 %1017  ;;  %v946_v61 = vpop.xlane.xlu2 %945  ;;  %2165 = vmatpush.bf16.msra.mxu1 %v4160_v39  ;;  %v4979_v39 = vld [vmem:[%s7749_s3 + $0x2ec] sm:$0xf] }
 0x40e   : > { %v968_v36 = vsub.f32 %v5980_v47, %v946_v61  ;;  %v6324_v0 = vpop.f32.mrf.mxu3  ;;  %v3981_v47 = vld [vmem:[%s7749_s3 + $0x210] sm:$0xf0]  ;;  %2128 = vmatpush.bf16.msrb.mxu3 %v4140_v34  ;;  %v4101_v61 = vld [vmem:[%s7749_s3 + $0x2f8] sm:$0xf0]  ;;  %2180 = vmatpush.bf16.msra.mxu2 %v4100_v43  ;;  %v907_v43 = vmul.f32 0.17677669, %v6191_v53 }
 0x40f   : > { %v3984_v27 = vor.u32 %v4950_v44, %v3981_v47  ;;  %v4104_v50 = vor.u32 %v4979_v39, %v4101_v61  ;;  %v4982_v44 = vld [vmem:[%s7749_s3 + $0x304] sm:$0xf]  ;;  %v4109_v34 = vld [vmem:[%s7749_s3 + $0x310] sm:$0xf0]  ;;  %v4083_v47 = vld [vmem:[%s7749_s3 + $0x2c8] sm:$0xf]  ;;  %v4228_v39 = vor.u32 %v5013_v37, %v4227_v33 }
 0x410   : > { %v993_v55 = vmul.f32 1.442695, %v968_v36  ;;  %v1695_v20 = vpop.f32.mrf.mxu0  ;;  %v4107_v36 = vld [vmem:[%s7749_s3 + $0x300] sm:$0xf]  ;;  %v4112_v2 = vor.u32 %v4982_v44, %v4109_v34  ;;  %v4051_v53 = vld [vmem:[%s7749_s3 + $0x288] sm:$0xf] }
 0x411   : > { %v6344_v25 = vadd.f32 %v1714_v6, %v1695_v20  ;;  %2149 = vmatpush.bf16.msrb.mxu0 %v3984_v27  ;;  %2166 = vmatpush.bf16.msra.mxu1 %v4144_v8  ;;  %v4108_v59 = vor.u32 %v4984_v52, %v4107_v36  ;;  %v4085_v27 = vld [vmem:[%s7749_s3 + $0x2d8] sm:$0xf0]  ;;  %v4967_v34 = vld [vmem:[%s7749_s3 + $0x28c] sm:$0xf]  ;;  %v5005_v37 = vld [vmem:[%s7749_s3 + $0x3b4] sm:$0xf0] }
 0x412   : > { %5205 = vpow2.f32 %v993_v55  ;;  %2129 = vmatpush.bf16.msrb.mxu3 %v4124_v13  ;;  %v4975_v55 = vld [vmem:[%s7749_s3 + $0x2cc] sm:$0xf]  ;;  %v4973_v13 = vld [vmem:[%s7749_s3 + $0x2b4] sm:$0xf0] }
 0x413   : > { %7774 = vst [vmem:[#allocation9_spill] sm:$0xff] %v6344_v25  ;;  %v4088_v28 = vor.u32 %v4975_v55, %v4085_v27  ;;  %v5007_v27 = vld [vmem:[%s7749_s3 + $0x3cc] sm:$0xf] }
 0x415   : > { %v944_v41 = vpop.xlane.xlu1 %943  ;;  %2167 = vmatpush.bf16.msra.mxu1 %v4128_v60  ;;  %2218 = vmatpush.bf16.msra.mxu0 %v4104_v50  ;;  %v4069_v60 = vld [vmem:[%s7749_s3 + $0x2b8] sm:$0xf0]  ;;  %v5011_v50 = vld [vmem:[%s7749_s3 + $0x3ec] sm:$0xf] }
 0x416   : > { %v967_v58 = vsub.f32 %v6000_v57, %v944_v41  ;;  %v1600_v1 = vpop.f32.mrf.mxu3  ;;  %v4977_v57 = vld [vmem:[%s7749_s3 + $0x2d4] sm:$0xf0]  ;;  %2130 = vmatpush.bf16.msrb.mxu3 %v4108_v59  ;;  %v4072_v61 = vor.u32 %v4971_v45, %v4069_v60  ;;  %v4229_v41 = vld [vmem:[%s7749_s3 + $0x3f8] sm:$0xf0]  ;;  %v4211_v59 = vld [vmem:[%s7749_s3 + $0x3c8] sm:$0xf] }
 0x417   : > { %v6389_v20 = vadd.f32 %v1600_v1, %v6163_v35  ;;  %v4084_v21 = vor.u32 %v4977_v57, %v4083_v47  ;;  %v4068_v35 = vor.u32 %v4973_v13, %v4067_v22  ;;  %v4232_v36 = vor.u32 %v5011_v50, %v4229_v41  ;;  %v4053_v47 = vld [vmem:[%s7749_s3 + $0x298] sm:$0xf0]  ;;  %v4965_v22 = vld [vmem:[%s7749_s3 + $0x274] sm:$0xf0]  ;;  %v4195_v13 = vld [vmem:[%s7749_s3 + $0x3a8] sm:$0xf] }
 0x418   : > { %v6386_v8 = vpop.eup %5205  ;;  %v991_v6 = vmul.f32 1.442695, %v967_v58  ;;  %v4969_v58 = vld [vmem:[%s7749_s3 + $0x294] sm:$0xf0]  ;;  %v4056_v55 = vor.u32 %v4967_v34, %v4053_v47  ;;  %v4963_v45 = vld [vmem:[%s7749_s3 + $0x26c] sm:$0xf] }
 0x419   : > { %1025 = vadd.xlane.f32.xlu2 %v6386_v8  ;;  %2168 = vmatpush.bf16.msra.mxu1 %v4112_v2  ;;  %v4052_v44 = vor.u32 %v4969_v58, %v4051_v53  ;;  %v6441_v2 = vadd.f32 %v6101_v3, %v907_v43  ;;  %v4035_v3 = vld [vmem:[%s7749_s3 + $0x268] sm:$0xf]  ;;  %v4037_v60 = vld [vmem:[%s7749_s3 + $0x278] sm:$0xf0]  ;;  %v5003_v50 = vld [vmem:[%s7749_s3 + $0x3ac] sm:$0xf] }
 0x41a   : > { %5207 = vpow2.f32 %v991_v6  ;;  %2181 = vmatpush.bf16.msra.mxu2 %v4084_v21  ;;  %2219 = vmatpush.bf16.msra.mxu0 %v4088_v28  ;;  %v4213_v6 = vld [vmem:[%s7749_s3 + $0x3d8] sm:$0xf0]  ;;  %v4019_v58 = vld [vmem:[%s7749_s3 + $0x248] sm:$0xf]  ;;  %v5001_v47 = vld [vmem:[%s7749_s3 + $0x394] sm:$0xf0] }
 0x41b   : > { %5209 = vrcp.f32 %v6245_v49  ;;  %2199 = vmatpush.bf16.msra.mxu3 %v4228_v39  ;;  %v5009_v49 = vld [vmem:[%s7749_s3 + $0x3d4] sm:$0xf0]  ;;  %v4216_v28 = vor.u32 %v5007_v27, %v4213_v6  ;;  %v4196_v39 = vor.u32 %v5005_v37, %v4195_v13  ;;  %v4197_v41 = vld [vmem:[%s7749_s3 + $0x3b8] sm:$0xf0]  ;;  %v4999_v6 = vld [vmem:[%s7749_s3 + $0x38c] sm:$0xf] }
 0x41c   : > { %v4212_v57 = vor.u32 %v5009_v49, %v4211_v59  ;;  %v4961_v59 = vld [vmem:[%s7749_s3 + $0x254] sm:$0xf0]  ;;  %v4163_v37 = vld [vmem:[%s7749_s3 + $0x368] sm:$0xf] }
 0x41d   : > { %v6418_v52 = vpop.xlane.xlu1 %700  ;;  %2237 = vmatpush.bf16.msrb.mxu1 %v4232_v36  ;;  %v4200_v36 = vor.u32 %v5003_v50, %v4197_v41  ;;  %v4997_v50 = vld [vmem:[%s7749_s3 + $0x374] sm:$0xf0]  ;;  %v4955_v41 = vld [vmem:[%s7749_s3 + $0x22c] sm:$0xf] }
 0x41e   : > { %2182 = vmatpush.bf16.msra.mxu2 %v4068_v35  ;;  %v6438_v1 = vpop.f32.mrf.mxu3  ;;  %2220 = vmatpush.bf16.msra.mxu0 %v4072_v61  ;;  %v4036_v35 = vor.u32 %v4965_v22, %v4035_v3  ;;  %v4040_v61 = vor.u32 %v4963_v45, %v4037_v60 }
 0x41f   : > { %2200 = vmatpush.bf16.msra.mxu3 %v4212_v57  ;;  %v4959_v57 = vld [vmem:[%s7749_s3 + $0x24c] sm:$0xf] }
 0x420   : > { %v6449_v21 = vpop.eup %5207 }
 0x421   : > { %1023 = vadd.xlane.f32.xlu1 %v6449_v21  ;;  %951 = vmax.xlane.f32.xlu2 %v6441_v2  ;;  %v5210_v43 = vpop.eup %5209 }
 0x422   : > { %v695_v33 = vpop.xlane.xlu0 %694  ;;  %2183 = vmatpush.bf16.msra.mxu2 %v4052_v44  ;;  %2221 = vmatpush.bf16.msra.mxu0 %v4056_v55  ;;  %v4179_v44 = vld [vmem:[%s7749_s3 + $0x388] sm:$0xf]  ;;  %v739_v49 = vmul.f32 %v5210_v43, %v5960_v29  ;;  %v4021_v55 = vld [vmem:[%s7749_s3 + $0x258] sm:$0xf0] }
 0x423   : > { %5211 = vrcp.f32 %v695_v33  ;;  %2238 = vmatpush.bf16.msrb.mxu1 %v4216_v28  ;;  %2201 = vmatpush.bf16.msra.mxu3 %v4196_v39  ;;  %v4180_v29 = vor.u32 %v5001_v47, %v4179_v44  ;;  %v4181_v28 = vld [vmem:[%s7749_s3 + $0x398] sm:$0xf0]  ;;  %v4003_v33 = vld [vmem:[%s7749_s3 + $0x228] sm:$0xf]  ;;  %v4953_v47 = vld [vmem:[%s7749_s3 + $0x214] sm:$0xf0] }
 0x424   : > { %5213 = vrcp.f32 %v6306_v46  ;;  %v4020_v46 = vor.u32 %v4961_v59, %v4019_v58  ;;  %v4184_v22 = vor.u32 %v4999_v6, %v4181_v28  ;;  %v755_v45 = vpack.c.bf16 %v739_v49, %v739_v49  ;;  %v4995_v59 = vld [vmem:[%s7749_s3 + $0x36c] sm:$0xf]  ;;  %v4165_v44 = vld [vmem:[%s7749_s3 + $0x378] sm:$0xf0] }
 0x425   : > { %v627_v53 = vpop.xlane.xlu1 %626  ;;  %v4951_v6 = vld [vmem:[%s7749_s3 + $0x20c] sm:$0xf]  ;;  %v3989_v28 = vld [vmem:[%s7749_s3 + $0x218] sm:$0xf0] }
 0x426   : > { %v648_v34 = vsub.f32 %v6042_v38, %v627_v53  ;;  %2184 = vmatpush.bf16.msra.mxu2 %v4036_v35  ;;  %v6498_v27 = vpop.f32.mrf.mxu3  ;;  %2222 = vmatpush.bf16.msra.mxu0 %v4040_v61  ;;  %v4024_v38 = vor.u32 %v4959_v57, %v4021_v55  ;;  %v4957_v35 = vld [vmem:[%s7749_s3 + $0x234] sm:$0xf0]  ;;  %v4164_v53 = vor.u32 %v4997_v50, %v4163_v37  ;;  %v4147_v57 = vld [vmem:[%s7749_s3 + $0x348] sm:$0xf]  ;;  %v1108_v55 = vunpack.c.l.b16 %v755_v45 }
 0x427   : > { %2239 = vmatpush.bf16.msrb.mxu1 %v4200_v36  ;;  %2202 = vmatpush.bf16.msra.mxu3 %v4180_v29  ;;  %v4004_v61 = vor.u32 %v4957_v35, %v4003_v33  ;;  %v4005_v36 = vld [vmem:[%s7749_s3 + $0x238] sm:$0xf0]  ;;  %v3992_v45 = vor.u32 %v4951_v6, %v3989_v28  ;;  %v4989_v50 = vld [vmem:[%s7749_s3 + $0x334] sm:$0xf0]  ;;  %v4115_v6 = vld [vmem:[%s7749_s3 + $0x308] sm:$0xf] }
 0x428   : > { %v674_v3 = vmul.f32 1.442695, %v648_v34  ;;  %v4008_v58 = vor.u32 %v4955_v41, %v4005_v36  ;;  %v4168_v34 = vor.u32 %v4995_v59, %v4165_v44  ;;  %v4149_v33 = vld [vmem:[%s7749_s3 + $0x358] sm:$0xf0]  ;;  %v4987_v41 = vld [vmem:[%s7749_s3 + $0x32c] sm:$0xf] }
 0x429   : > { %v5212_v13 = vpop.eup %5211  ;;  %v4133_v59 = vld [vmem:[%s7749_s3 + $0x338] sm:$0xf0]  ;;  %v4411_v44 = vld [vmem:[%s7749_s3 + $0x4e0] sm:$0xf]  ;;  %v4985_v28 = vld [vmem:[%s7749_s3 + $0x314] sm:$0xf0] }
 0x42a   : > { %v738_v60 = vmul.f32 %v5212_v13, %v6031_v42  ;;  %5215 = vpow2.f32 %v674_v3  ;;  %v1016_v43 = vpop.xlane.xlu0 %1015  ;;  %v6516_v39 = vpop.xlane.xlu2 %1019  ;;  %2185 = vmatpush.bf16.msra.mxu2 %v4020_v46  ;;  %2223 = vmatpush.bf16.msra.mxu0 %v4024_v38  ;;  %v3987_v46 = vld [vmem:[%s7749_s3 + $0x208] sm:$0xf]  ;;  %v4991_v13 = vld [vmem:[%s7749_s3 + $0x34c] sm:$0xf] }
 0x42b   : > { %v5214_v42 = vpop.eup %5213  ;;  %5217 = vrcp.f32 %v1016_v43  ;;  %2240 = vmatpush.bf16.msrb.mxu1 %v4184_v22  ;;  %2203 = vmatpush.bf16.msra.mxu3 %v4164_v53 }
 0x42c   : > { %v754_v49 = vpack.c.bf16 %v738_v60, %v738_v60  ;;  %5219 = vrcp.f32 %v6418_v52  ;;  %v1060_v29 = vmul.f32 %v5214_v42, %v5988_v63  ;;  %v4993_v52 = vld [vmem:[%s7749_s3 + $0x354] sm:$0xf0]  ;;  %v3988_v63 = vor.u32 %v4953_v47, %v3987_v46 }
 0x42d   : > { %v4148_v22 = vor.u32 %v4993_v52, %v4147_v57  ;;  %v4152_v60 = vor.u32 %v4991_v13, %v4149_v33  ;;  %v4136_v47 = vor.u32 %v4987_v41, %v4133_v59  ;;  %v5042_v57 = vld [vmem:[%s7749_s3 + $0x4e4] sm:$0xf]  ;;  %v4983_v33 = vld [vmem:[%s7749_s3 + $0x30c] sm:$0xf]  ;;  %v4379_v59 = vld [vmem:[%s7749_s3 + $0x4a0] sm:$0xf] }
 0x42e   : > { %v1107_v38 = vunpack.c.l.b16 %v754_v49  ;;  %2186 = vmatpush.bf16.msra.mxu2 %v4004_v61  ;;  %v6553_v3 = vpop.f32.mrf.mxu3  ;;  %2224 = vmatpush.bf16.msra.mxu0 %v4008_v58  ;;  %v4131_v61 = vld [vmem:[%s7749_s3 + $0x328] sm:$0xf]  ;;  %v1076_v36 = vpack.c.bf16 %v1060_v29, %v1060_v29  ;;  %v5044_v49 = vld [vmem:[%s7749_s3 + $0x4ec] sm:$0xf0] }
 0x42f   : > { %2241 = vmatpush.bf16.msrb.mxu1 %v4168_v34  ;;  %2204 = vmatpush.bf16.msra.mxu3 %v4148_v22  ;;  %v4132_v46 = vor.u32 %v4989_v50, %v4131_v61  ;;  %v5038_v61 = vld [vmem:[%s7749_s3 + $0x4c4] sm:$0xf]  ;;  %v4397_v50 = vld [vmem:[%s7749_s3 + $0x4d0] sm:$0xf0] }
 0x430   : > { %v6561_v35 = vpop.eup %5215  ;;  %v6563_v37 = vpack.c.b16 %v1108_v55, %v1107_v38  ;;  %v4413_v55 = vld [vmem:[%s7749_s3 + $0x4f0] sm:$0xf0]  ;;  %v4412_v38 = vor.u32 %v5044_v49, %v4411_v44  ;;  %v5036_v44 = vld [vmem:[%s7749_s3 + $0x4ac] sm:$0xf0]  ;;  %v5034_v49 = vld [vmem:[%s7749_s3 + $0x4a4] sm:$0xf] }
 0x431   : > { %v5218_v43 = vpop.eup %5217  ;;  %706 = vadd.xlane.f32.xlu1 %v6561_v35  ;;  %v4416_v52 = vor.u32 %v5042_v57, %v4413_v55  ;;  %v6639_v55 = vpop.f32.mrf.mxu2 }
 0x432   : > { %v1059_v42 = vmul.f32 %v5218_v43, %v6052_v24  ;;  %v699_v53 = vpop.xlane.xlu0 %698  ;;  %2112 = vmatmul.bf16.vlgmr.msrb.gmra.mxu2 %v6563_v37  ;;  %2150 = vmatmul.bf16.vlgmr.msrb.gmra.mxu0 %v6563_v37  ;;  %v629_v58 = vpop.xlane.xlu2 %628  ;;  %v5040_v43 = vld [vmem:[%s7749_s3 + $0x4cc] sm:$0xf0] }
 0x433   : > { %v5220_v34 = vpop.eup %5219  ;;  %5221 = vrcp.f32 %v699_v53  ;;  %v649_v24 = vsub.f32 %v6075_v51, %v629_v58  ;;  %2187 = vmatpush.bf16.msra.mxu2 %v3988_v63  ;;  %2225 = vmatpush.bf16.msra.mxu0 %v3992_v45  ;;  %v1156_v63 = vunpack.c.l.b16 %v1076_v36  ;;  %v4395_v45 = vld [vmem:[%s7749_s3 + $0x4c0] sm:$0xf]  ;;  %v4400_v53 = vor.u32 %v5038_v61, %v4397_v50  ;;  %v6665_v61 = vld [vmem:[%s7747_s1 + $0xf0] sm:$0xff] }
 0x434   : > { %v1075_v29 = vpack.c.bf16 %v1059_v42, %v1059_v42  ;;  %2242 = vmatpush.bf16.msrb.mxu1 %v4152_v60  ;;  %5223 = vrcp.f32 %v6516_v39  ;;  %v741_v22 = vmul.f32 %v5220_v34, %v6018_v30  ;;  %v4117_v39 = vld [vmem:[%s7749_s3 + $0x318] sm:$0xf0]  ;;  %2205 = vmatpush.bf16.msra.mxu3 %v4132_v46  ;;  %v4116_v30 = vor.u32 %v4985_v28, %v4115_v6  ;;  %v5032_v6 = vld [vmem:[%s7749_s3 + $0x48c] sm:$0xf0]  ;;  %v5030_v28 = vld [vmem:[%s7749_s3 + $0x484] sm:$0xf] }
 0x435   : > { %v676_v51 = vmul.f32 1.442695, %v649_v24  ;;  %v4120_v36 = vor.u32 %v4983_v33, %v4117_v39  ;;  %v4396_v42 = vor.u32 %v5040_v43, %v4395_v45  ;;  %v4365_v33 = vld [vmem:[%s7749_s3 + $0x490] sm:$0xf0] }
 0x436   : > { %v1155_v13 = vunpack.c.l.b16 %v1075_v29  ;;  %v6611_v60 = vpop.f32.mrf.mxu3  ;;  %v757_v34 = vpack.c.bf16 %v741_v22, %v741_v22  ;;  %v4380_v29 = vor.u32 %v5036_v44, %v4379_v59  ;;  %v4349_v44 = vld [vmem:[%s7749_s3 + $0x470] sm:$0xf0] }
 0x437   : > { %2641 = vmatpush.bf16.msrb.mxu2 %v4412_v38  ;;  %2679 = vmatpush.bf16.msrb.mxu0 %v4416_v52  ;;  %5225 = vpow2.f32 %v676_v51  ;;  %v4363_v51 = vld [vmem:[%s7749_s3 + $0x480] sm:$0xf] }
 0x438   : > { %v6622_v41 = vpack.c.b16 %v1156_v63, %v1155_v13  ;;  %2243 = vmatpush.bf16.msrb.mxu1 %v4136_v47  ;;  %v4381_v47 = vld [vmem:[%s7749_s3 + $0x4b0] sm:$0xf0]  ;;  %2206 = vmatpush.bf16.msra.mxu3 %v4116_v30  ;;  %v1110_v63 = vunpack.c.l.b16 %v757_v34  ;;  %v4364_v45 = vor.u32 %v5032_v6, %v4363_v51  ;;  %v588_v30 = vmul.f32 0.17677669, %v6130_v4  ;;  %v5026_v4 = vld [vmem:[%s7749_s3 + $0x464] sm:$0xf] }
 0x439   : > { %v5222_v58 = vpop.eup %5221  ;;  %v5022_v51 = vld [vmem:[%s7749_s3 + $0x444] sm:$0xf]  ;;  %v4333_v6 = vld [vmem:[%s7749_s3 + $0x450] sm:$0xf0] }
 0x43a   : > { %v740_v24 = vmul.f32 %v5222_v58, %v6077_v19  ;;  %2131 = vmatmul.bf16.vlgmr.msrb.gmra.mxu3 %v6622_v41  ;;  %2169 = vmatmul.bf16.vlgmr.msra.gmra.mxu1 %v6622_v41  ;;  %v1022_v46 = vpop.xlane.xlu0 %1021  ;;  %v5224_v57 = vpop.eup %5223  ;;  %v4384_v19 = vor.u32 %v5034_v49, %v4381_v47  ;;  %v4352_v47 = vor.u32 %v5026_v4, %v4349_v44  ;;  %v3592_v4 = vld [vmem:[%s7747_s1 + $0xf8] sm:$0xff] }
 0x43b   : > { %5227 = vrcp.f32 %v1022_v46  ;;  %2642 = vmatpush.bf16.msrb.mxu2 %v4396_v42  ;;  %2680 = vmatpush.bf16.msrb.mxu0 %v4400_v53  ;;  %v1061_v22 = vmul.f32 %v5224_v57, %v6054_v32  ;;  %v4368_v32 = vor.u32 %v5030_v28, %v4365_v33  ;;  %v5028_v42 = vld [vmem:[%s7749_s3 + $0x46c] sm:$0xf0]  ;;  %v6684_v46 = vadd.f32 %v6665_v61, %v588_v30 }
 0x43c   : > { %v756_v38 = vpack.c.bf16 %v740_v24, %v740_v24  ;;  %2244 = vmatpush.bf16.msrb.mxu1 %v4120_v36  ;;  %v4347_v36 = vld [vmem:[%s7749_s3 + $0x460] sm:$0xf] }
 0x43d   : > { %v6641_v52 = vpop.eup %5225  ;;  %v1077_v53 = vpack.c.bf16 %v1061_v22, %v1061_v22  ;;  %v4348_v34 = vor.u32 %v5028_v42, %v4347_v36  ;;  %v5018_v36 = vld [vmem:[%s7749_s3 + $0x424] sm:$0xf]  ;;  %v4317_v42 = vld [vmem:[%s7749_s3 + $0x430] sm:$0xf0] }
 0x43e   : > { %v1109_v13 = vunpack.c.l.b16 %v756_v38  ;;  %708 = vadd.xlane.f32.xlu2 %v6641_v52  ;;  %v6657_v39 = vpop.f32.mrf.mxu3  ;;  %v5024_v38 = vld [vmem:[%s7749_s3 + $0x44c] sm:$0xf0] }
 0x43f   : > { %2643 = vmatpush.bf16.msrb.mxu2 %v4380_v29  ;;  %2681 = vmatpush.bf16.msrb.mxu0 %v4384_v19  ;;  %v4331_v29 = vld [vmem:[%s7749_s3 + $0x440] sm:$0xf]  ;;  %v1157_v19 = vunpack.c.l.b16 %v1077_v53 }
 0x440   : > { %v6660_v43 = vpack.c.b16 %v1110_v63, %v1109_v13  ;;  %v4332_v63 = vor.u32 %v5024_v38, %v4331_v29 }
 0x441   : > { %v5228_v50 = vpop.eup %5227 }
 0x442   : > { %v1062_v58 = vmul.f32 %v5228_v50, %v6088_v54  ;;  %v948_v59 = vpop.xlane.xlu0 %947  ;;  %2117 = vmatmul.bf16.gmra.mxu2 %v6660_v43  ;;  %2155 = vmatmul.bf16.gmra.mxu0 %v6660_v43  ;;  %v892_v54 = vpop.f32.mrf.mxu2  ;;  %v5020_v50 = vld [vmem:[%s7749_s3 + $0x42c] sm:$0xf0] }
 0x443   : > { %v969_v49 = vsub.f32 %v6094_v62, %v948_v59  ;;  %2644 = vmatpush.bf16.msrb.mxu2 %v4364_v45  ;;  %2682 = vmatpush.bf16.msrb.mxu0 %v4368_v32  ;;  %v910_v22 = vmul.f32 0.17677669, %v892_v54  ;;  %v4336_v45 = vor.u32 %v5022_v51, %v4333_v6  ;;  %v4315_v32 = vld [vmem:[%s7749_s3 + $0x420] sm:$0xf]  ;;  %v4301_v54 = vld [vmem:[%s7749_s3 + $0x410] sm:$0xf0] }
 0x444   : > { %v1078_v24 = vpack.c.bf16 %v1062_v58, %v1062_v58  ;;  %v4316_v53 = vor.u32 %v5020_v50, %v4315_v32 }
 0x445   : > { %v995_v57 = vmul.f32 1.442695, %v969_v49  ;;  %v6722_v44 = vadd.f32 %v3592_v4, %v910_v22 }
 0x446   : > { %v1158_v62 = vunpack.c.l.b16 %v1078_v24  ;;  %634 = vmax.xlane.f32.xlu2 %v6684_v46  ;;  %v1633_v28 = vpop.f32.mrf.mxu3  ;;  %v5016_v24 = vld [vmem:[%s7749_s3 + $0x40c] sm:$0xf0] }
 0x447   : > { %5229 = vpow2.f32 %v995_v57  ;;  %2645 = vmatpush.bf16.msrb.mxu2 %v4348_v34  ;;  %v6700_v13 = vadd.f32 %v1633_v28, %v6498_v27  ;;  %2683 = vmatpush.bf16.msrb.mxu0 %v4352_v47  ;;  %v4299_v34 = vld [vmem:[%s7749_s3 + $0x400] sm:$0xf]  ;;  %v5014_v47 = vld [vmem:[%s7749_s3 + $0x404] sm:$0xf] }
 0x448   : > { %v6702_v33 = vpack.c.b16 %v1158_v62, %v1157_v19  ;;  %v4300_v38 = vor.u32 %v5016_v24, %v4299_v34  ;;  %v589_v19 = vmul.f32 0.17677669, %v6161_v48  ;;  %v4304_v62 = vor.u32 %v5014_v47, %v4301_v54  ;;  %v5070_v34 = vld [vmem:[%s7749_s3 + $0x5c4] sm:$0xf]  ;;  %v4525_v47 = vld [vmem:[%s7749_s3 + $0x5d0] sm:$0xf0] }
 0x449   : > { %v950_v30 = vpop.xlane.xlu1 %949  ;;  %v909_v48 = vmul.f32 0.17677669, %v6639_v55  ;;  %v5076_v55 = vld [vmem:[%s7749_s3 + $0x5ec] sm:$0xf0] }
 0x44a   : > { %v970_v27 = vsub.f32 %v6104_v5, %v950_v30  ;;  %2136 = vmatmul.bf16.gmra.mxu3 %v6702_v33  ;;  %2174 = vmatmul.bf16.gmra.mxu1 %v6702_v33  ;;  %v631_v59 = vpop.xlane.xlu0 %630  ;;  %v4320_v5 = vor.u32 %v5018_v36, %v4317_v42  ;;  %v703_v30 = vpop.xlane.xlu2 %702  ;;  %v4541_v42 = vld [vmem:[%s7749_s3 + $0x5f0] sm:$0xf0] }
 0x44b   : > { %2646 = vmatpush.bf16.msrb.mxu2 %v4332_v63  ;;  %2684 = vmatpush.bf16.msrb.mxu0 %v4336_v45  ;;  %v650_v57 = vsub.f32 %v6107_v31, %v631_v59  ;;  %v6748_v63 = vadd.f32 %v3592_v4, %v589_v19  ;;  %v6760_v50 = vadd.f32 %v6665_v61, %v909_v48  ;;  %v5074_v61 = vld [vmem:[%s7749_s3 + $0x5e4] sm:$0xf]  ;;  %v4523_v59 = vld [vmem:[%s7749_s3 + $0x5c0] sm:$0xf] }
 0x44c   : > { %v997_v58 = vmul.f32 1.442695, %v970_v27  ;;  %v5066_v19 = vld [vmem:[%s7749_s3 + $0x5a4] sm:$0xf]  ;;  %v4491_v48 = vld [vmem:[%s7749_s3 + $0x580] sm:$0xf] }
 0x44d   : > { %v6724_v49 = vpop.eup %5229  ;;  %v678_v51 = vmul.f32 1.442695, %v650_v57  ;;  %v4507_v57 = vld [vmem:[%s7749_s3 + $0x5a0] sm:$0xf] }
 0x44e   : > { %5231 = vpow2.f32 %v997_v58  ;;  %1027 = vadd.xlane.f32.xlu0 %v6724_v49  ;;  %957 = vmax.xlane.f32.xlu2 %v6722_v44  ;;  %v6741_v29 = vpop.f32.mrf.mxu3 }
 0x44f   : > { %2647 = vmatpush.bf16.msrb.mxu2 %v4316_v53  ;;  %2685 = vmatpush.bf16.msrb.mxu0 %v4320_v5  ;;  %5233 = vpow2.f32 %v678_v51  ;;  %v4544_v53 = vor.u32 %v5074_v61, %v4541_v42  ;;  %v5072_v5 = vld [vmem:[%s7749_s3 + $0x5cc] sm:$0xf0]  ;;  %v4477_v42 = vld [vmem:[%s7749_s3 + $0x570] sm:$0xf0] }
 0x450   : > { %v4524_v24 = vor.u32 %v5072_v5, %v4523_v59  ;;  %v5060_v61 = vld [vmem:[%s7749_s3 + $0x56c] sm:$0xf0]  ;;  %v5054_v59 = vld [vmem:[%s7749_s3 + $0x544] sm:$0xf] }
 0x451   : > { %v633_v6 = vpop.xlane.xlu1 %632  ;;  %2698 = vmatpush.bf16.msra.mxu1 %v4544_v53  ;;  %v4459_v53 = vld [vmem:[%s7749_s3 + $0x540] sm:$0xf] }
 0x452   : > { %2188 = vmatmul.bf16.vlgmr.msra.gmra.mxu2 %v6563_v37  ;;  %2226 = vmatmul.bf16.vlgmr.msra.gmra.mxu0 %v6563_v37  ;;  %v651_v31 = vsub.f32 %v6117_v9, %v633_v6  ;;  %v705_v45 = vpop.xlane.xlu0 %704 }
 0x453   : > { %2648 = vmatpush.bf16.msrb.mxu2 %v4300_v38  ;;  %2686 = vmatpush.bf16.msrb.mxu0 %v4304_v62  ;;  %5235 = vrcp.f32 %v705_v45  ;;  %v5068_v38 = vld [vmem:[%s7749_s3 + $0x5ac] sm:$0xf0]  ;;  %v5062_v45 = vld [vmem:[%s7749_s3 + $0x584] sm:$0xf] }
 0x454   : > { %v6746_v28 = vpop.eup %5231  ;;  %v680_v32 = vmul.f32 1.442695, %v651_v31  ;;  %5237 = vrcp.f32 %v703_v30  ;;  %v4508_v51 = vor.u32 %v5068_v38, %v4507_v57  ;;  %v4445_v38 = vld [vmem:[%s7749_s3 + $0x530] sm:$0xf0] }
 0x455   : > { %1029 = vadd.xlane.f32.xlu1 %v6746_v28  ;;  %v6762_v9 = vpop.eup %5233 }
 0x456   : > { %636 = vmax.xlane.f32.xlu0 %v6748_v63  ;;  %v1638_v22 = vpop.f32.mrf.mxu3  ;;  %5239 = vpow2.f32 %v680_v32 }
 0x457   : > { %v6755_v37 = vadd.f32 %v1638_v22, %v6611_v60  ;;  %v5064_v22 = vld [vmem:[%s7749_s3 + $0x58c] sm:$0xf0] }
 0x458   : > { %v4492_v32 = vor.u32 %v5064_v22, %v4491_v48  ;;  %v5046_v48 = vld [vmem:[%s7749_s3 + $0x504] sm:$0xf] }
 0x459   : > { %v5236_v60 = vpop.eup %5235 }
 0x45a   : > { %2207 = vmatmul.bf16.vlgmr.msra.gmra.mxu3 %v6622_v41  ;;  %2245 = vmatmul.bf16.vlgmr.msrb.gmra.mxu1 %v6622_v41  ;;  %v4539_v41 = vld [vmem:[%s7749_s3 + $0x5e0] sm:$0xf]  ;;  %v5238_v36 = vpop.eup %5237 }
 0x45b   : > { %v4540_v27 = vor.u32 %v5076_v55, %v4539_v41  ;;  %v742_v58 = vmul.f32 %v5238_v36, %v6090_v56  ;;  %v4528_v56 = vor.u32 %v5070_v34, %v4525_v47  ;;  %v4475_v55 = vld [vmem:[%s7749_s3 + $0x560] sm:$0xf]  ;;  %v5058_v36 = vld [vmem:[%s7749_s3 + $0x564] sm:$0xf]  ;;  %v4461_v34 = vld [vmem:[%s7749_s3 + $0x550] sm:$0xf0] }
 0x45c   : > { %v6780_v4 = vpop.eup %5239  ;;  %v5052_v47 = vld [vmem:[%s7749_s3 + $0x52c] sm:$0xf0] }
 0x45d   : > { %955 = vmax.xlane.f32.xlu1 %v6760_v50  ;;  %2660 = vmatpush.bf16.msrb.mxu3 %v4540_v27  ;;  %v758_v54 = vpack.c.bf16 %v742_v58, %v742_v58  ;;  %v4476_v27 = vor.u32 %v5060_v61, %v4475_v55  ;;  %v5056_v58 = vld [vmem:[%s7749_s3 + $0x54c] sm:$0xf0]  ;;  %v5045_v55 = vld [vmem:[%s7749_s3 + $0x4f4] sm:$0xf0]  ;;  %v5043_v61 = vld [vmem:[%s7749_s3 + $0x4ec] sm:$0xf] }
 0x45e   : > { %710 = vadd.xlane.f32.xlu0 %v6762_v9  ;;  %2699 = vmatpush.bf16.msra.mxu1 %v4528_v56  ;;  %v4460_v5 = vor.u32 %v5056_v58, %v4459_v53  ;;  %v5050_v56 = vld [vmem:[%s7749_s3 + $0x524] sm:$0xf]  ;;  %v4403_v58 = vld [vmem:[%s7749_s3 + $0x4c8] sm:$0xf] }
 0x45f   : > { %v1111_v31 = vunpack.c.l.b16 %v758_v54 }
 0x461   : > { %2661 = vmatpush.bf16.msrb.mxu3 %v4524_v24  ;;  %v4443_v24 = vld [vmem:[%s7749_s3 + $0x520] sm:$0xf] }
 0x462   : > { %2193 = vmatmul.bf16.gmra.mxu2 %v6660_v43  ;;  %2231 = vmatmul.bf16.gmra.mxu0 %v6660_v43  ;;  %v743_v43 = vmul.f32 %v5236_v60, %v6119_v10  ;;  %v4493_v60 = vld [vmem:[%s7749_s3 + $0x590] sm:$0xf0]  ;;  %v4444_v57 = vor.u32 %v5052_v47, %v4443_v24  ;;  %v4405_v47 = vld [vmem:[%s7749_s3 + $0x4d8] sm:$0xf0] }
 0x463   : > { %v4496_v41 = vor.u32 %v5062_v45, %v4493_v60  ;;  %v6879_v60 = vpop.f32.mrf.mxu3 }
 0x464   : > { %v759_v10 = vpack.c.bf16 %v743_v43, %v743_v43  ;;  %v4480_v43 = vor.u32 %v5058_v36, %v4477_v42 }
 0x465   : > { %712 = vadd.xlane.f32.xlu1 %v6780_v4  ;;  %2662 = vmatpush.bf16.msrb.mxu3 %v4508_v51 }
 0x466   : > { %v1112_v62 = vunpack.c.l.b16 %v759_v10  ;;  %v4464_v10 = vor.u32 %v5054_v59, %v4461_v34  ;;  %v5041_v59 = vld [vmem:[%s7749_s3 + $0x4d4] sm:$0xf0] }
 0x467   : > { %v4404_v24 = vor.u32 %v5041_v59, %v4403_v58  ;;  %v5027_v58 = vld [vmem:[%s7749_s3 + $0x46c] sm:$0xf] }
 0x468   : > { %v6820_v30 = vpack.c.b16 %v1112_v62, %v1111_v31  ;;  %v4448_v62 = vor.u32 %v5050_v56, %v4445_v38 }
 0x469   : > { %2663 = vmatpush.bf16.msrb.mxu3 %v4492_v32 }
 0x46a   : > { %2212 = vmatmul.bf16.gmra.mxu3 %v6702_v33  ;;  %2250 = vmatmul.bf16.gmra.mxu1 %v6702_v33  ;;  %v4509_v33 = vld [vmem:[%s7749_s3 + $0x5b0] sm:$0xf0] }
 0x46b   : > { %v4512_v6 = vor.u32 %v5066_v19, %v4509_v33  ;;  %v4427_v33 = vld [vmem:[%s7749_s3 + $0x500] sm:$0xf] }
 0x46d   : > { %2700 = vmatpush.bf16.msra.mxu1 %v4512_v6  ;;  %2664 = vmatpush.bf16.msrb.mxu3 %v4476_v27  ;;  %v5048_v6 = vld [vmem:[%s7749_s3 + $0x50c] sm:$0xf0]  ;;  %v4421_v27 = vld [vmem:[%s7749_s3 + $0x4f8] sm:$0xf0] }
 0x46e   : > { %v4428_v31 = vor.u32 %v5048_v6, %v4427_v33  ;;  %v4424_v42 = vor.u32 %v5043_v61, %v4421_v27  ;;  %v4389_v33 = vld [vmem:[%s7749_s3 + $0x4b8] sm:$0xf0] }
 0x470   : > { %2755 = vmatpush.bf16.msra.mxu0 %v4424_v42 }
 0x471   : > { %2701 = vmatpush.bf16.msra.mxu1 %v4496_v41  ;;  %2665 = vmatpush.bf16.msrb.mxu3 %v4460_v5  ;;  %v4419_v41 = vld [vmem:[%s7749_s3 + $0x4e8] sm:$0xf]  ;;  %v5039_v5 = vld [vmem:[%s7749_s3 + $0x4cc] sm:$0xf] }
 0x472   : > { %2649 = vmatmul.bf16.vlgmr.msrb.gmra.mxu2 %v6820_v30  ;;  %2687 = vmatmul.bf16.vlgmr.msrb.gmra.mxu0 %v6820_v30  ;;  %v4420_v36 = vor.u32 %v5045_v55, %v4419_v41  ;;  %v4408_v56 = vor.u32 %v5039_v5, %v4405_v47  ;;  %v4373_v55 = vld [vmem:[%s7749_s3 + $0x498] sm:$0xf0]  ;;  %v4339_v47 = vld [vmem:[%s7749_s3 + $0x448] sm:$0xf] }
 0x474   : > { %2717 = vmatpush.bf16.msra.mxu2 %v4420_v36  ;;  %2756 = vmatpush.bf16.msra.mxu0 %v4408_v56  ;;  %v5025_v56 = vld [vmem:[%s7749_s3 + $0x454] sm:$0xf0] }
 0x475   : > { %2702 = vmatpush.bf16.msra.mxu1 %v4480_v43  ;;  %2666 = vmatpush.bf16.msrb.mxu3 %v4444_v57 }
 0x478   : > { %2718 = vmatpush.bf16.msra.mxu2 %v4404_v24 }
 0x479   : > { %2703 = vmatpush.bf16.msra.mxu1 %v4464_v10  ;;  %2667 = vmatpush.bf16.msrb.mxu3 %v4428_v31 }
 0x47c   : > { %v954_v54 = vpop.xlane.xlu0 %953 }
 0x47d   : > { %v972_v19 = vsub.f32 %v6263_v14, %v954_v54  ;;  %2704 = vmatpush.bf16.msra.mxu1 %v4448_v62  ;;  %v4429_v14 = vld [vmem:[%s7749_s3 + $0x510] sm:$0xf0]  ;;  %v6906_v54 = vpop.f32.mrf.mxu3  ;;  %v5035_v62 = vld [vmem:[%s7749_s3 + $0x4ac] sm:$0xf] }
 0x47e   : > { %v4432_v22 = vor.u32 %v5046_v48, %v4429_v14  ;;  %7775 = vst [vmem:[#allocation10_spill] sm:$0xff] %v6906_v54  ;;  %v4371_v14 = vld [vmem:[%s7749_s3 + $0x488] sm:$0xf] }
 0x47f   : > { %v1001_v51 = vmul.f32 1.442695, %v972_v19  ;;  %v4387_v19 = vld [vmem:[%s7749_s3 + $0x4a8] sm:$0xf] }
 0x481   : > { %5241 = vpow2.f32 %v1001_v51  ;;  %2705 = vmatpush.bf16.msra.mxu1 %v4432_v22  ;;  %v5033_v22 = vld [vmem:[%s7749_s3 + $0x494] sm:$0xf0] }
 0x482   : > { %v4372_v41 = vor.u32 %v5033_v22, %v4371_v14  ;;  %v5021_v14 = vld [vmem:[%s7749_s3 + $0x434] sm:$0xf0] }
 0x485   : > { %v6946_v59 = vpop.f32.mrf.mxu3 }
 0x486   : > { %7776 = vst [vmem:[#allocation11_spill] sm:$0xff] %v6946_v59 }
 0x487   : > { %v6876_v45 = vpop.eup %5241 }
 0x488   : > { %1033 = vadd.xlane.f32.xlu0 %v6876_v45 }
 0x48c   : > { %v1026_v32 = vpop.xlane.xlu2 %1025 }
 0x48d   : > { %5243 = vrcp.f32 %v1026_v32  ;;  %v5031_v32 = vld [vmem:[%s7749_s3 + $0x48c] sm:$0xf] }
 0x493   : > { %v5244_v34 = vpop.eup %5243 }
 0x494   : > { %v1024_v43 = vpop.xlane.xlu1 %1023  ;;  %v952_v53 = vpop.xlane.xlu2 %951  ;;  %v1064_v38 = vmul.f32 %v5244_v34, %v6386_v8  ;;  %v4392_v8 = vor.u32 %v5035_v62, %v4389_v33  ;;  %v4357_v34 = vld [vmem:[%s7749_s3 + $0x478] sm:$0xf0]  ;;  %v5077_v33 = vld [vmem:[%s7749_s3 + $0x5f4] sm:$0xf0] }
 0x495   : > { %5245 = vrcp.f32 %v1024_v43  ;;  %v971_v10 = vsub.f32 %v6441_v2, %v952_v53  ;;  %v5037_v2 = vld [vmem:[%s7749_s3 + $0x4b4] sm:$0xf0]  ;;  %v4355_v43 = vld [vmem:[%s7749_s3 + $0x468] sm:$0xf]  ;;  %v4360_v24 = vor.u32 %v5027_v58, %v4357_v34  ;;  %v6967_v62 = vpop.f32.mrf.mxu0 }
 0x496   : > { %v4388_v51 = vor.u32 %v5037_v2, %v4387_v19  ;;  %v1080_v31 = vpack.c.bf16 %v1064_v38, %v1064_v38  ;;  %2757 = vmatpush.bf16.msra.mxu0 %v4392_v8  ;;  %v5029_v53 = vld [vmem:[%s7749_s3 + $0x474] sm:$0xf0]  ;;  %v4340_v38 = vor.u32 %v5025_v56, %v4339_v47  ;;  %v4341_v19 = vld [vmem:[%s7749_s3 + $0x458] sm:$0xf0]  ;;  %7777 = vst [vmem:[#allocation12_spill] sm:$0xff] %v6967_v62 }
 0x497   : > { %v999_v57 = vmul.f32 1.442695, %v971_v10  ;;  %v4356_v5 = vor.u32 %v5029_v53, %v4355_v43  ;;  %v5075_v8 = vld [vmem:[%s7749_s3 + $0x5ec] sm:$0xf]  ;;  %v5073_v43 = vld [vmem:[%s7749_s3 + $0x5d4] sm:$0xf0] }
 0x498   : > { %2719 = vmatpush.bf16.msra.mxu2 %v4388_v51  ;;  %v1160_v27 = vunpack.c.l.b16 %v1080_v31  ;;  %v4547_v51 = vld [vmem:[%s7749_s3 + $0x5e8] sm:$0xf]  ;;  %v4549_v31 = vld [vmem:[%s7749_s3 + $0x5f8] sm:$0xf0]  ;;  %v5071_v53 = vld [vmem:[%s7749_s3 + $0x5cc] sm:$0xf] }
 0x499   : > { %5247 = vpow2.f32 %v999_v57  ;;  %v5023_v57 = vld [vmem:[%s7749_s3 + $0x44c] sm:$0xf]  ;;  %v4307_v34 = vld [vmem:[%s7749_s3 + $0x408] sm:$0xf] }
 0x49a   : > { %v4344_v2 = vor.u32 %v5023_v57, %v4341_v19  ;;  %v5015_v57 = vld [vmem:[%s7749_s3 + $0x40c] sm:$0xf] }
 0x49b   : > { %v5246_v6 = vpop.eup %5245 }
 0x49c   : > { %v1063_v48 = vmul.f32 %v5246_v6, %v6449_v21  ;;  %v4376_v21 = vor.u32 %v5031_v32, %v4373_v55  ;;  %2720 = vmatpush.bf16.msra.mxu2 %v4372_v41  ;;  %v4548_v6 = vor.u32 %v5077_v33, %v4547_v51  ;;  %v4552_v32 = vor.u32 %v5075_v8, %v4549_v31  ;;  %v5019_v55 = vld [vmem:[%s7749_s3 + $0x42c] sm:$0xf]  ;;  %v4515_v33 = vld [vmem:[%s7749_s3 + $0x5a8] sm:$0xf]  ;;  %v5069_v8 = vld [vmem:[%s7749_s3 + $0x5b4] sm:$0xf0] }
 0x49d   : > { %v4516_v31 = vor.u32 %v5069_v8, %v4515_v33 }
 0x49e   : > { %v1079_v61 = vpack.c.bf16 %v1063_v48, %v1063_v48  ;;  %2758 = vmatpush.bf16.msra.mxu0 %v4376_v21  ;;  %v4323_v48 = vld [vmem:[%s7749_s3 + $0x428] sm:$0xf]  ;;  %2736 = vmatpush.bf16.msra.mxu3 %v4548_v6  ;;  %v5067_v6 = vld [vmem:[%s7749_s3 + $0x5ac] sm:$0xf] }
 0x49f   : > { %v6934_v36 = vpop.eup %5247  ;;  %v4324_v41 = vor.u32 %v5021_v14, %v4323_v48  ;;  %2774 = vmatpush.bf16.msrb.mxu1 %v4552_v32  ;;  %v4517_v48 = vld [vmem:[%s7749_s3 + $0x5b8] sm:$0xf0]  ;;  %v4731_v14 = vld [vmem:[%s7749_s3 + $0x6e0] sm:$0xf] }
 0x4a0   : > { %v1159_v42 = vunpack.c.l.b16 %v1079_v61  ;;  %1031 = vadd.xlane.f32.xlu2 %v6934_v36  ;;  %2721 = vmatpush.bf16.msra.mxu2 %v4356_v5  ;;  %v4325_v61 = vld [vmem:[%s7749_s3 + $0x438] sm:$0xf0] }
 0x4a1   : > { %v4328_v21 = vor.u32 %v5019_v55, %v4325_v61  ;;  %v4533_v5 = vld [vmem:[%s7749_s3 + $0x5d8] sm:$0xf0]  ;;  %v5106_v61 = vld [vmem:[%s7749_s3 + $0x6e4] sm:$0xf] }
 0x4a2   : > { %v6951_v10 = vpack.c.b16 %v1160_v27, %v1159_v42  ;;  %2759 = vmatpush.bf16.msra.mxu0 %v4360_v24  ;;  %v6993_v27 = vpop.f32.mrf.mxu3  ;;  %v4531_v42 = vld [vmem:[%s7749_s3 + $0x5c8] sm:$0xf]  ;;  %v5017_v24 = vld [vmem:[%s7749_s3 + $0x414] sm:$0xf0]  ;;  %v4536_v47 = vor.u32 %v5071_v53, %v4533_v5  ;;  %v5063_v5 = vld [vmem:[%s7749_s3 + $0x58c] sm:$0xf] }
 0x4a3   : > { %7778 = vst [vmem:[#allocation13_spill] sm:$0xff] %v6993_v27  ;;  %v4532_v58 = vor.u32 %v5073_v43, %v4531_v42  ;;  %v4308_v56 = vor.u32 %v5017_v24, %v4307_v34  ;;  %v4499_v53 = vld [vmem:[%s7749_s3 + $0x588] sm:$0xf]  ;;  %v4501_v24 = vld [vmem:[%s7749_s3 + $0x598] sm:$0xf0] }
 0x4a4   : > { %2668 = vmatmul.bf16.vlgmr.msrb.gmra.mxu3 %v6951_v10  ;;  %2706 = vmatmul.bf16.vlgmr.msra.gmra.mxu1 %v6951_v10  ;;  %v707_v22 = vpop.xlane.xlu1 %706  ;;  %v4504_v33 = vor.u32 %v5063_v5, %v4501_v24 }
 0x4a5   : > { %2722 = vmatpush.bf16.msra.mxu2 %v4340_v38  ;;  %5249 = vrcp.f32 %v707_v22  ;;  %v4309_v38 = vld [vmem:[%s7749_s3 + $0x418] sm:$0xf0]  ;;  %2737 = vmatpush.bf16.msra.mxu3 %v4532_v58  ;;  %v5108_v22 = vld [vmem:[%s7749_s3 + $0x6ec] sm:$0xf0]  ;;  %v5065_v58 = vld [vmem:[%s7749_s3 + $0x594] sm:$0xf0] }
 0x4a6   : > { %2760 = vmatpush.bf16.msra.mxu0 %v4344_v2  ;;  %v4312_v19 = vor.u32 %v5015_v57, %v4309_v38  ;;  %v7019_v2 = vpop.f32.mrf.mxu1  ;;  %2775 = vmatpush.bf16.msrb.mxu1 %v4536_v47  ;;  %v4732_v55 = vor.u32 %v5108_v22, %v4731_v14  ;;  %v4500_v34 = vor.u32 %v5065_v58, %v4499_v53  ;;  %v4715_v47 = vld [vmem:[%s7749_s3 + $0x6c0] sm:$0xf]  ;;  %v5100_v53 = vld [vmem:[%s7749_s3 + $0x6ac] sm:$0xf0] }
 0x4a7   : > { %7779 = vst [vmem:[#allocation14_spill] sm:$0xff] %v7019_v2 }
 0x4a9   : > { %2723 = vmatpush.bf16.msra.mxu2 %v4324_v41  ;;  %v4520_v41 = vor.u32 %v5067_v6, %v4517_v48  ;;  %2738 = vmatpush.bf16.msra.mxu3 %v4516_v31  ;;  %v5102_v6 = vld [vmem:[%s7749_s3 + $0x6c4] sm:$0xf]  ;;  %v4717_v31 = vld [vmem:[%s7749_s3 + $0x6d0] sm:$0xf0] }
 0x4aa   : > { %2761 = vmatpush.bf16.msra.mxu0 %v4328_v21  ;;  %v4733_v21 = vld [vmem:[%s7749_s3 + $0x6f0] sm:$0xf0]  ;;  %v7063_v57 = vpop.f32.mrf.mxu3  ;;  %v4720_v48 = vor.u32 %v5102_v6, %v4717_v31  ;;  %v5055_v31 = vld [vmem:[%s7749_s3 + $0x54c] sm:$0xf] }
 0x4ab   : > { %v5250_v42 = vpop.eup %5249  ;;  %v4736_v43 = vor.u32 %v5106_v61, %v4733_v21  ;;  %2776 = vmatpush.bf16.msrb.mxu1 %v4520_v41  ;;  %7780 = vst [vmem:[#allocation15_spill] sm:$0xff] %v7063_v57  ;;  %v5059_v41 = vld [vmem:[%s7749_s3 + $0x56c] sm:$0xf] }
 0x4ac   : > { %v744_v38 = vmul.f32 %v5250_v42, %v6561_v35  ;;  %v4483_v35 = vld [vmem:[%s7749_s3 + $0x568] sm:$0xf]  ;;  %v4485_v42 = vld [vmem:[%s7749_s3 + $0x578] sm:$0xf0] }
 0x4ad   : > { %2724 = vmatpush.bf16.msra.mxu2 %v4308_v56  ;;  %v5104_v56 = vld [vmem:[%s7749_s3 + $0x6cc] sm:$0xf0]  ;;  %2739 = vmatpush.bf16.msra.mxu3 %v4500_v34 }
 0x4ae   : > { %2762 = vmatpush.bf16.msra.mxu0 %v4312_v19  ;;  %v4716_v8 = vor.u32 %v5104_v56, %v4715_v47  ;;  %v760_v58 = vpack.c.bf16 %v744_v38, %v744_v38  ;;  %v5098_v47 = vld [vmem:[%s7749_s3 + $0x6a4] sm:$0xf]  ;;  %v4701_v56 = vld [vmem:[%s7749_s3 + $0x6b0] sm:$0xf0]  ;;  %v5057_v38 = vld [vmem:[%s7749_s3 + $0x554] sm:$0xf0] }
 0x4af   : > { %v2151_v51 = vpop.f32.mrf.mxu0  ;;  %2777 = vmatpush.bf16.msrb.mxu1 %v4504_v33 }
 0x4b1   : > { %v709_v32 = vpop.xlane.xlu2 %708  ;;  %3178 = vmatpush.bf16.msrb.mxu2 %v4732_v55 }
 0x4b2   : > { %5251 = vrcp.f32 %v709_v32  ;;  %3216 = vmatpush.bf16.msrb.mxu0 %v4736_v43  ;;  %v5061_v32 = vld [vmem:[%s7749_s3 + $0x574] sm:$0xf0]  ;;  %v4699_v43 = vld [vmem:[%s7749_s3 + $0x6a0] sm:$0xf] }
 0x4b3   : > { %v4484_v21 = vor.u32 %v5061_v32, %v4483_v35  ;;  %v4700_v24 = vor.u32 %v5100_v53, %v4699_v43  ;;  %v4683_v35 = vld [vmem:[%s7749_s3 + $0x680] sm:$0xf]  ;;  %v1113_v32 = vunpack.c.l.b16 %v760_v58  ;;  %v5096_v43 = vld [vmem:[%s7749_s3 + $0x68c] sm:$0xf0]  ;;  %v5094_v53 = vld [vmem:[%s7749_s3 + $0x684] sm:$0xf] }
 0x4b4   : > { %v4684_v58 = vor.u32 %v5096_v43, %v4683_v35  ;;  %v4435_v43 = vld [vmem:[%s7749_s3 + $0x508] sm:$0xf] }
 0x4b5   : > { %v2113_v19 = vpop.f32.mrf.mxu2  ;;  %3179 = vmatpush.bf16.msrb.mxu2 %v4716_v8  ;;  %2740 = vmatpush.bf16.msra.mxu3 %v4484_v21  ;;  %v4704_v8 = vor.u32 %v5098_v47, %v4701_v56 }
 0x4b6   : > { %3217 = vmatpush.bf16.msrb.mxu0 %v4720_v48 }
 0x4b7   : > { %v7072_v14 = vpop.f32.mrf.mxu0  ;;  %v2170_v22 = vpop.f32.mrf.mxu1 }
 0x4b8   : > { %v5252_v55 = vpop.eup %5251  ;;  %v7083_v61 = vadd.f32 %v2170_v22, %v2151_v51  ;;  %v4488_v51 = vor.u32 %v5059_v41, %v4485_v42  ;;  %v4469_v22 = vld [vmem:[%s7749_s3 + $0x558] sm:$0xf0] }
 0x4b9   : > { %v745_v5 = vmul.f32 %v5252_v55, %v6641_v52  ;;  %v635_v34 = vpop.xlane.xlu2 %634  ;;  %3180 = vmatpush.bf16.msrb.mxu2 %v4700_v24  ;;  %v4467_v52 = vld [vmem:[%s7749_s3 + $0x548] sm:$0xf]  ;;  %v4472_v42 = vor.u32 %v5055_v31, %v4469_v22  ;;  %v5092_v31 = vld [vmem:[%s7749_s3 + $0x66c] sm:$0xf0] }
 0x4ba   : > { %v652_v33 = vsub.f32 %v6684_v46, %v635_v34  ;;  %2778 = vmatpush.bf16.msrb.mxu1 %v4488_v51  ;;  %3218 = vmatpush.bf16.msrb.mxu0 %v4704_v8  ;;  %v4468_v46 = vor.u32 %v5057_v38, %v4467_v52  ;;  %v5053_v8 = vld [vmem:[%s7749_s3 + $0x534] sm:$0xf0]  ;;  %v4453_v52 = vld [vmem:[%s7749_s3 + $0x538] sm:$0xf0]  ;;  %v4667_v38 = vld [vmem:[%s7749_s3 + $0x660] sm:$0xf] }
 0x4bb   : > { %v761_v6 = vpack.c.bf16 %v745_v5, %v745_v5  ;;  %v4685_v5 = vld [vmem:[%s7749_s3 + $0x690] sm:$0xf0]  ;;  %v4668_v35 = vor.u32 %v5092_v31, %v4667_v38  ;;  %v5088_v38 = vld [vmem:[%s7749_s3 + $0x64c] sm:$0xf0]  ;;  %v5086_v31 = vld [vmem:[%s7749_s3 + $0x644] sm:$0xf] }
 0x4bc   : > { %v682_v48 = vmul.f32 1.442695, %v652_v33  ;;  %2741 = vmatpush.bf16.msra.mxu3 %v4468_v46  ;;  %v4688_v51 = vor.u32 %v5094_v53, %v4685_v5  ;;  %v4451_v33 = vld [vmem:[%s7749_s3 + $0x528] sm:$0xf]  ;;  %v5049_v53 = vld [vmem:[%s7749_s3 + $0x514] sm:$0xf0] }
 0x4bd   : > { %v1114_v41 = vunpack.c.l.b16 %v761_v6  ;;  %v7117_v55 = vpop.f32.mrf.mxu2  ;;  %v2132_v21 = vpop.f32.mrf.mxu3  ;;  %3181 = vmatpush.bf16.msrb.mxu2 %v4684_v58  ;;  %v4452_v6 = vor.u32 %v5053_v8, %v4451_v33  ;;  %v5047_v5 = vld [vmem:[%s7749_s3 + $0x50c] sm:$0xf]  ;;  %v4437_v33 = vld [vmem:[%s7749_s3 + $0x518] sm:$0xf0]  ;;  %v4651_v8 = vld [vmem:[%s7749_s3 + $0x640] sm:$0xf] }
 0x4be   : > { %5253 = vpow2.f32 %v682_v48  ;;  %v7128_v34 = vadd.f32 %v2132_v21, %v2113_v19  ;;  %2779 = vmatpush.bf16.msrb.mxu1 %v4472_v42  ;;  %v5051_v19 = vld [vmem:[%s7749_s3 + $0x52c] sm:$0xf]  ;;  %3219 = vmatpush.bf16.msrb.mxu0 %v4688_v51 }
 0x4bf   : > { %v2156_v24 = vpop.f32.mrf.mxu0  ;;  %v7130_v47 = vpop.f32.mrf.mxu1  ;;  %v7132_v56 = vpack.c.b16 %v1114_v41, %v1113_v32  ;;  %v4456_v22 = vor.u32 %v5051_v19, %v4453_v52  ;;  %v5090_v32 = vld [vmem:[%s7749_s3 + $0x664] sm:$0xf]  ;;  %v4669_v41 = vld [vmem:[%s7749_s3 + $0x670] sm:$0xf0]  ;;  %v4440_v52 = vor.u32 %v5047_v5, %v4437_v33 }
 0x4c0   : > { %2742 = vmatpush.bf16.msra.mxu3 %v4452_v6  ;;  %v4672_v42 = vor.u32 %v5090_v32, %v4669_v41 }
 0x4c1   : > { %v1028_v48 = vpop.xlane.xlu0 %1027  ;;  %2654 = vmatmul.bf16.gmra.mxu2 %v7132_v56  ;;  %2692 = vmatmul.bf16.gmra.mxu0 %v7132_v56  ;;  %v958_v46 = vpop.xlane.xlu2 %957 }
 0x4c2   : > { %v974_v21 = vsub.f32 %v6722_v44, %v958_v46  ;;  %5255 = vrcp.f32 %v1028_v48  ;;  %2780 = vmatpush.bf16.msrb.mxu1 %v4456_v22  ;;  %3182 = vmatpush.bf16.msrb.mxu2 %v4668_v35  ;;  %v4436_v44 = vor.u32 %v5049_v53, %v4435_v43  ;;  %v4653_v48 = vld [vmem:[%s7749_s3 + $0x650] sm:$0xf0]  ;;  %v4652_v46 = vor.u32 %v5088_v38, %v4651_v8  ;;  %v5084_v43 = vld [vmem:[%s7749_s3 + $0x62c] sm:$0xf0]  ;;  %v5082_v53 = vld [vmem:[%s7749_s3 + $0x624] sm:$0xf] }
 0x4c3   : > { %3220 = vmatpush.bf16.msrb.mxu0 %v4672_v42  ;;  %v4656_v22 = vor.u32 %v5086_v31, %v4653_v48  ;;  %v4635_v42 = vld [vmem:[%s7749_s3 + $0x620] sm:$0xf] }
 0x4c4   : > { %v7170_v58 = vpop.eup %5253  ;;  %v1005_v51 = vmul.f32 1.442695, %v974_v21  ;;  %2743 = vmatpush.bf16.msra.mxu3 %v4436_v44  ;;  %v4637_v44 = vld [vmem:[%s7749_s3 + $0x630] sm:$0xf0]  ;;  %v4619_v48 = vld [vmem:[%s7749_s3 + $0x600] sm:$0xf] }
 0x4c5   : > { %v2118_v19 = vpop.f32.mrf.mxu2  ;;  %v7178_v6 = vpop.f32.mrf.mxu3  ;;  %714 = vadd.xlane.f32.xlu1 %v7170_v58  ;;  %v4640_v8 = vor.u32 %v5082_v53, %v4637_v44 }
 0x4c6   : > { %5257 = vpow2.f32 %v1005_v51  ;;  %2781 = vmatpush.bf16.msrb.mxu1 %v4440_v52  ;;  %3183 = vmatpush.bf16.msrb.mxu2 %v4652_v46  ;;  %v5080_v46 = vld [vmem:[%s7749_s3 + $0x60c] sm:$0xf0] }
 0x4c7   : > { %v2158_v35 = vpop.f32.mrf.mxu0  ;;  %v2175_v32 = vpop.f32.mrf.mxu1  ;;  %3221 = vmatpush.bf16.msrb.mxu0 %v4656_v22 }
 0x4c8   : > { %v7190_v41 = vadd.f32 %v2175_v32, %v2156_v24  ;;  %v1030_v21 = vpop.xlane.xlu1 %1029  ;;  %v5256_v5 = vpop.eup %5255  ;;  %v4636_v24 = vor.u32 %v5084_v43, %v4635_v42 }
 0x4c9   : > { %5259 = vrcp.f32 %v1030_v21  ;;  %v637_v51 = vpop.xlane.xlu0 %636  ;;  %v1065_v38 = vmul.f32 %v5256_v5, %v6724_v49  ;;  %v5078_v49 = vld [vmem:[%s7749_s3 + $0x604] sm:$0xf]  ;;  %v4621_v21 = vld [vmem:[%s7749_s3 + $0x610] sm:$0xf0] }
 0x4ca   : > { %v653_v33 = vsub.f32 %v6748_v63, %v637_v51  ;;  %3184 = vmatpush.bf16.msrb.mxu2 %v4636_v24  ;;  %v4620_v63 = vor.u32 %v5080_v46, %v4619_v48  ;;  %v4624_v43 = vor.u32 %v5078_v49, %v4621_v21 }
 0x4cb   : > { %3222 = vmatpush.bf16.msrb.mxu0 %v4640_v8  ;;  %v1081_v51 = vpack.c.bf16 %v1065_v38, %v1065_v38 }
 0x4cc   : > { %v7205_v52 = vpop.eup %5257  ;;  %v684_v31 = vmul.f32 1.442695, %v653_v33 }
 0x4cd   : > { %v2120_v22 = vpop.f32.mrf.mxu2  ;;  %v2137_v32 = vpop.f32.mrf.mxu3  ;;  %1037 = vadd.xlane.f32.xlu1 %v7205_v52 }
 0x4ce   : > { %5261 = vpow2.f32 %v684_v31  ;;  %v7221_v42 = vadd.f32 %v2137_v32, %v2118_v19  ;;  %3185 = vmatpush.bf16.msrb.mxu2 %v4620_v63  ;;  %v4843_v31 = vld [vmem:[%s7749_s3 + $0x7c0] sm:$0xf] }
 0x4cf   : > { %v5260_v53 = vpop.eup %5259  ;;  %v2177_v5 = vpop.f32.mrf.mxu1  ;;  %3223 = vmatpush.bf16.msrb.mxu0 %v4624_v43 }
 0x4d0   : > { %v1066_v24 = vmul.f32 %v5260_v53, %v6746_v28  ;;  %v7224_v44 = vadd.f32 %v2177_v5, %v2158_v35  ;;  %v956_v33 = vpop.xlane.xlu1 %955  ;;  %v2227_v8 = vpop.f32.mrf.mxu0  ;;  %v1161_v28 = vunpack.c.l.b16 %v1081_v51 }
 0x4d1   : > { %v973_v48 = vsub.f32 %v6760_v50, %v956_v33  ;;  %2725 = vmatmul.bf16.vlgmr.msra.gmra.mxu2 %v6820_v30  ;;  %2763 = vmatmul.bf16.vlgmr.msra.gmra.mxu0 %v6820_v30  ;;  %v711_v5 = vpop.xlane.xlu0 %710 }
 0x4d2   : > { %v1082_v19 = vpack.c.bf16 %v1066_v24, %v1066_v24 }
 0x4d3   : > { %v1003_v46 = vmul.f32 1.442695, %v973_v48 }
 0x4d4   : > { %v7231_v38 = vpop.eup %5261  ;;  %v1162_v35 = vunpack.c.l.b16 %v1082_v19 }
 0x4d5   : > { %5263 = vpow2.f32 %v1003_v46  ;;  %v2139_v32 = vpop.f32.mrf.mxu3  ;;  %716 = vadd.xlane.f32.xlu2 %v7231_v38  ;;  %v2189_v49 = vpop.f32.mrf.mxu2 }
 0x4d6   : > { %v7234_v63 = vadd.f32 %v2139_v32, %v2120_v22  ;;  %v7236_v50 = vpack.c.b16 %v1162_v35, %v1161_v28  ;;  %v4859_v32 = vld [vmem:[%s7749_s3 + $0x7e0] sm:$0xf] }
 0x4d7   : > { %v2246_v21 = vpop.f32.mrf.mxu1 }
 0x4d8   : > { %v7240_v43 = vadd.f32 %v2246_v21, %v2227_v8  ;;  %v713_v53 = vpop.xlane.xlu1 %712  ;;  %2673 = vmatmul.bf16.gmra.mxu3 %v7236_v50  ;;  %2711 = vmatmul.bf16.gmra.mxu1 %v7236_v50  ;;  %v2229_v22 = vpop.f32.mrf.mxu0  ;;  %v5138_v21 = vld [vmem:[%s7749_s3 + $0x7e4] sm:$0xf] }
 0x4d9   : > { %5265 = vrcp.f32 %v713_v53 }
 0x4da   : > { %7781 = vst [vmem:[#allocation16_spill] sm:$0xff] %v7240_v43  ;;  %5267 = vrcp.f32 %v711_v5 }
 0x4db   : > { %v7244_v51 = vpop.eup %5263 }
 0x4dc   : > { %1035 = vadd.xlane.f32.xlu0 %v7244_v51 }
 0x4dd   : > { %v2208_v24 = vpop.f32.mrf.mxu3  ;;  %v2191_v46 = vpop.f32.mrf.mxu2 }
 0x4de   : > { %v7247_v33 = vadd.f32 %v2208_v24, %v2189_v49  ;;  %v5140_v49 = vld [vmem:[%s7749_s3 + $0x7ec] sm:$0xf0] }
 0x4df   : > { %v2248_v48 = vpop.f32.mrf.mxu1  ;;  %v5266_v19 = vpop.eup %5265  ;;  %v4860_v5 = vor.u32 %v5140_v49, %v4859_v32  ;;  %v5132_v49 = vld [vmem:[%s7749_s3 + $0x7ac] sm:$0xf0] }
 0x4e0   : > { %7782 = vst [vmem:[#allocation17_spill] sm:$0xff] %v7247_v33  ;;  %v7249_v8 = vadd.f32 %v2248_v48, %v2229_v22  ;;  %v5268_v28 = vpop.eup %5267  ;;  %v747_v53 = vmul.f32 %v5266_v19, %v6780_v4  ;;  %v2232_v48 = vpop.f32.mrf.mxu0  ;;  %v5136_v4 = vld [vmem:[%s7749_s3 + $0x7cc] sm:$0xf0]  ;;  %v5134_v19 = vld [vmem:[%s7749_s3 + $0x7c4] sm:$0xf] }
 0x4e1   : > { %2730 = vmatmul.bf16.gmra.mxu2 %v7132_v56  ;;  %2768 = vmatmul.bf16.gmra.mxu0 %v7132_v56  ;;  %v4861_v56 = vld [vmem:[%s7749_s3 + $0x7f0] sm:$0xf0]  ;;  %v746_v24 = vmul.f32 %v5268_v28, %v6762_v9  ;;  %v4844_v28 = vor.u32 %v5136_v4, %v4843_v31 }
 0x4e2   : > { %7783 = vst [vmem:[#allocation18_spill] sm:$0xff] %v7249_v8  ;;  %v4864_v22 = vor.u32 %v5138_v21, %v4861_v56  ;;  %3197 = vmatpush.bf16.msrb.mxu3 %v4860_v5  ;;  %v763_v32 = vpack.c.bf16 %v747_v53, %v747_v53  ;;  %v5130_v53 = vld [vmem:[%s7749_s3 + $0x7a4] sm:$0xf]  ;;  %v4829_v56 = vld [vmem:[%s7749_s3 + $0x7b0] sm:$0xf0] }
 0x4e3   : > { %v4832_v21 = vor.u32 %v5130_v53, %v4829_v56 }
 0x4e4   : > { %3235 = vmatpush.bf16.msra.mxu1 %v4864_v22  ;;  %v762_v22 = vpack.c.bf16 %v746_v24, %v746_v24  ;;  %v4813_v24 = vld [vmem:[%s7749_s3 + $0x790] sm:$0xf0] }
 0x4e5   : > { %v2210_v35 = vpop.f32.mrf.mxu3 }
 0x4e6   : > { %v7269_v30 = vadd.f32 %v2210_v35, %v2191_v46  ;;  %v4845_v46 = vld [vmem:[%s7749_s3 + $0x7d0] sm:$0xf0]  ;;  %v4827_v35 = vld [vmem:[%s7749_s3 + $0x7a0] sm:$0xf]  ;;  %3198 = vmatpush.bf16.msrb.mxu3 %v4844_v28  ;;  %v1115_v28 = vunpack.c.l.b16 %v762_v22 }
 0x4e7   : > { %v2251_v9 = vpop.f32.mrf.mxu1  ;;  %v4848_v31 = vor.u32 %v5134_v19, %v4845_v46  ;;  %v4828_v4 = vor.u32 %v5132_v49, %v4827_v35  ;;  %v5128_v19 = vld [vmem:[%s7749_s3 + $0x78c] sm:$0xf0]  ;;  %v5126_v46 = vld [vmem:[%s7749_s3 + $0x784] sm:$0xf] }
 0x4e8   : > { %7784 = vst [vmem:[#allocation19_spill] sm:$0xff] %v7269_v30  ;;  %v7291_v5 = vadd.f32 %v2251_v9, %v2232_v48  ;;  %2744 = vmatmul.bf16.vlgmr.msra.gmra.mxu3 %v6951_v10  ;;  %2782 = vmatmul.bf16.vlgmr.msrb.gmra.mxu1 %v6951_v10  ;;  %v4811_v48 = vld [vmem:[%s7749_s3 + $0x780] sm:$0xf]  ;;  %v1116_v9 = vunpack.c.l.b16 %v763_v32  ;;  %v2194_v10 = vpop.f32.mrf.mxu2  ;;  %v2234_v56 = vpop.f32.mrf.mxu0 }
 0x4e9   : > { %3236 = vmatpush.bf16.msra.mxu1 %v4848_v31  ;;  %v4812_v32 = vor.u32 %v5128_v19, %v4811_v48  ;;  %v4816_v31 = vor.u32 %v5126_v46, %v4813_v24 }
 0x4ea   : > { %7785 = vst [vmem:[#allocation20_spill] sm:$0xff] %v7291_v5  ;;  %3199 = vmatpush.bf16.msrb.mxu3 %v4828_v4  ;;  %v7315_v53 = vpack.c.b16 %v1116_v9, %v1115_v28  ;;  %v5124_v4 = vld [vmem:[%s7749_s3 + $0x76c] sm:$0xf0]  ;;  %v4797_v9 = vld [vmem:[%s7749_s3 + $0x770] sm:$0xf0] }
 0x4eb   : > { %v4779_v28 = vld [vmem:[%s7749_s3 + $0x740] sm:$0xf] }
 0x4ed   : > { %v2213_v35 = vpop.f32.mrf.mxu3  ;;  %3237 = vmatpush.bf16.msra.mxu1 %v4832_v21  ;;  %v4795_v21 = vld [vmem:[%s7749_s3 + $0x760] sm:$0xf] }
 0x4ee   : > { %v7313_v49 = vadd.f32 %v2213_v35, %v2194_v10  ;;  %3200 = vmatpush.bf16.msrb.mxu3 %v4812_v32  ;;  %v4796_v48 = vor.u32 %v5124_v4, %v4795_v21  ;;  %v5120_v35 = vld [vmem:[%s7749_s3 + $0x74c] sm:$0xf0]  ;;  %v5118_v32 = vld [vmem:[%s7749_s3 + $0x744] sm:$0xf] }
 0x4ef   : > { %v2253_v54 = vpop.f32.mrf.mxu1 }
 0x4f0   : > { %7786 = vst [vmem:[#allocation21_spill] sm:$0xff] %v7313_v49  ;;  %v7317_v11 = vadd.f32 %v2253_v54, %v2234_v56  ;;  %v5122_v54 = vld [vmem:[%s7749_s3 + $0x764] sm:$0xf]  ;;  %v2196_v19 = vpop.f32.mrf.mxu2  ;;  %v4781_v56 = vld [vmem:[%s7749_s3 + $0x750] sm:$0xf0] }
 0x4f1   : > { %3186 = vmatmul.bf16.vlgmr.msrb.gmra.mxu2 %v7315_v53  ;;  %3224 = vmatmul.bf16.vlgmr.msrb.gmra.mxu0 %v7315_v53  ;;  %v4800_v10 = vor.u32 %v5122_v54, %v4797_v9  ;;  %v4784_v4 = vor.u32 %v5118_v32, %v4781_v56  ;;  %v4763_v54 = vld [vmem:[%s7749_s3 + $0x720] sm:$0xf]  ;;  %v5114_v9 = vld [vmem:[%s7749_s3 + $0x724] sm:$0xf] }
 0x4f2   : > { %7787 = vst [vmem:[#allocation22_spill] sm:$0xff] %v7317_v11  ;;  %3238 = vmatpush.bf16.msra.mxu1 %v4816_v31  ;;  %3201 = vmatpush.bf16.msrb.mxu3 %v4796_v48  ;;  %v4780_v31 = vor.u32 %v5120_v35, %v4779_v28  ;;  %v5116_v48 = vld [vmem:[%s7749_s3 + $0x72c] sm:$0xf0]  ;;  %v5110_v35 = vld [vmem:[%s7749_s3 + $0x704] sm:$0xf] }
 0x4f3   : > { %v5112_v28 = vld [vmem:[%s7749_s3 + $0x70c] sm:$0xf0] }
 0x4f5   : > { %v2215_v46 = vpop.f32.mrf.mxu3 }
 0x4f6   : > { %v7335_v24 = vadd.f32 %v2215_v46, %v2196_v19  ;;  %3239 = vmatpush.bf16.msra.mxu1 %v4800_v10  ;;  %3202 = vmatpush.bf16.msrb.mxu3 %v4780_v31  ;;  %v4764_v10 = vor.u32 %v5116_v48, %v4763_v54  ;;  %v4747_v46 = vld [vmem:[%s7749_s3 + $0x700] sm:$0xf]  ;;  %v4749_v31 = vld [vmem:[%s7749_s3 + $0x710] sm:$0xf0] }
 0x4f7   : > { %v4748_v32 = vor.u32 %v5112_v28, %v4747_v46  ;;  %v4752_v56 = vor.u32 %v5110_v35, %v4749_v31  ;;  %v2688_v46 = vpop.f32.mrf.mxu0 }
 0x4f8   : > { %7788 = vst [vmem:[#allocation23_spill] sm:$0xff] %v7335_v24  ;;  %2749 = vmatmul.bf16.gmra.mxu3 %v7236_v50  ;;  %2787 = vmatmul.bf16.gmra.mxu1 %v7236_v50  ;;  %v4765_v50 = vld [vmem:[%s7749_s3 + $0x730] sm:$0xf0]  ;;  %v2650_v31 = vpop.f32.mrf.mxu2 }
 0x4f9   : > { %v4768_v19 = vor.u32 %v5114_v9, %v4765_v50 }
 0x4fa   : > { %3240 = vmatpush.bf16.msra.mxu1 %v4784_v4  ;;  %3203 = vmatpush.bf16.msrb.mxu3 %v4764_v10 }
 0x4fb   : > { %v1034_v4 = vpop.xlane.xlu0 %1033 }
 0x4fc   : > { %5269 = vrcp.f32 %v1034_v4 }
 0x4fe   : > { %3241 = vmatpush.bf16.msra.mxu1 %v4768_v19  ;;  %3204 = vmatpush.bf16.msrb.mxu3 %v4748_v32 }
 0x502   : > { %3242 = vmatpush.bf16.msra.mxu1 %v4752_v56  ;;  %v5270_v48 = vpop.eup %5269 }
 0x503   : > { %v1068_v9 = vmul.f32 %v5270_v48, %v6876_v45  ;;  %v4739_v45 = vld [vmem:[%s7749_s3 + $0x6e8] sm:$0xf]  ;;  %v2690_v48 = vpop.f32.mrf.mxu0 }
 0x505   : > { %v1084_v50 = vpack.c.bf16 %v1068_v9, %v1068_v9 }
 0x507   : > { %v1164_v28 = vunpack.c.l.b16 %v1084_v50 }
 0x513   : > { %v1032_v54 = vpop.xlane.xlu2 %1031 }
 0x514   : > { %5271 = vrcp.f32 %v1032_v54  ;;  %v4741_v54 = vld [vmem:[%s7749_s3 + $0x6f8] sm:$0xf0] }
 0x51a   : > { %v5272_v10 = vpop.eup %5271 }
 0x51b   : > { %v1067_v19 = vmul.f32 %v5272_v10, %v6934_v36  ;;  %v5109_v36 = vld [vmem:[%s7749_s3 + $0x6f4] sm:$0xf0] }
 0x51c   : > { %v4740_v4 = vor.u32 %v5109_v36, %v4739_v45  ;;  %v4867_v36 = vld [vmem:[%s7749_s3 + $0x7e8] sm:$0xf] }
 0x51d   : > { %v1083_v21 = vpack.c.bf16 %v1067_v19, %v1067_v19  ;;  %v4723_v19 = vld [vmem:[%s7749_s3 + $0x6c8] sm:$0xf] }
 0x51e   : > { %3254 = vmatpush.bf16.msra.mxu2 %v4740_v4  ;;  %v5139_v4 = vld [vmem:[%s7749_s3 + $0x7ec] sm:$0xf] }
 0x51f   : > { %v1163_v22 = vunpack.c.l.b16 %v1083_v21 }
 0x521   : > { %v7379_v59 = vpack.c.b16 %v1164_v28, %v1163_v22  ;;  %v2707_v35 = vpop.f32.mrf.mxu1  ;;  %v5107_v22 = vld [vmem:[%s7749_s3 + $0x6ec] sm:$0xf] }
 0x522   : > { %v7381_v32 = vadd.f32 %v2707_v35, %v2688_v46  ;;  %v4744_v10 = vor.u32 %v5107_v22, %v4741_v54  ;;  %v5105_v46 = vld [vmem:[%s7749_s3 + $0x6d4] sm:$0xf0]  ;;  %v5103_v28 = vld [vmem:[%s7749_s3 + $0x6cc] sm:$0xf]  ;;  %v2652_v54 = vpop.f32.mrf.mxu2 }
 0x523   : > { %3205 = vmatmul.bf16.vlgmr.msrb.gmra.mxu3 %v7379_v59  ;;  %3243 = vmatmul.bf16.vlgmr.msra.gmra.mxu1 %v7379_v59  ;;  %v5141_v22 = vld [vmem:[%s7749_s3 + $0x7f4] sm:$0xf0] }
 0x524   : > { %3292 = vmatpush.bf16.msra.mxu0 %v4744_v10  ;;  %v4869_v10 = vld [vmem:[%s7749_s3 + $0x7f8] sm:$0xf0] }
 0x527   : > { %v2669_v56 = vpop.f32.mrf.mxu3 }
 0x528   : > { %v7394_v21 = vadd.f32 %v2669_v56, %v2650_v31  ;;  %v4724_v31 = vor.u32 %v5105_v46, %v4723_v19  ;;  %v4725_v56 = vld [vmem:[%s7749_s3 + $0x6d8] sm:$0xf0]  ;;  %v4707_v19 = vld [vmem:[%s7749_s3 + $0x6a8] sm:$0xf]  ;;  %v5101_v46 = vld [vmem:[%s7749_s3 + $0x6b4] sm:$0xf0] }
 0x529   : > { %v2709_v9 = vpop.f32.mrf.mxu1  ;;  %v4728_v45 = vor.u32 %v5103_v28, %v4725_v56  ;;  %v4708_v56 = vor.u32 %v5101_v46, %v4707_v19  ;;  %v4691_v19 = vld [vmem:[%s7749_s3 + $0x688] sm:$0xf]  ;;  %v5097_v46 = vld [vmem:[%s7749_s3 + $0x694] sm:$0xf0] }
 0x52a   : > { %v7399_v50 = vadd.f32 %v2709_v9, %v2690_v48  ;;  %3255 = vmatpush.bf16.msra.mxu2 %v4724_v31  ;;  %v4868_v9 = vor.u32 %v5141_v22, %v4867_v36  ;;  %v4872_v31 = vor.u32 %v5139_v4, %v4869_v10  ;;  %v4709_v36 = vld [vmem:[%s7749_s3 + $0x6b8] sm:$0xf0]  ;;  %v4851_v4 = vld [vmem:[%s7749_s3 + $0x7c8] sm:$0xf] }
 0x52b   : > { %3293 = vmatpush.bf16.msra.mxu0 %v4728_v45  ;;  %v5099_v45 = vld [vmem:[%s7749_s3 + $0x6ac] sm:$0xf]  ;;  %v4853_v10 = vld [vmem:[%s7749_s3 + $0x7d8] sm:$0xf0] }
 0x52c   : > { %3273 = vmatpush.bf16.msra.mxu3 %v4868_v9  ;;  %v4712_v22 = vor.u32 %v5099_v45, %v4709_v36  ;;  %3311 = vmatpush.bf16.msrb.mxu1 %v4872_v31  ;;  %v5095_v45 = vld [vmem:[%s7749_s3 + $0x68c] sm:$0xf]  ;;  %v4693_v36 = vld [vmem:[%s7749_s3 + $0x698] sm:$0xf0] }
 0x52e   : > { %3256 = vmatpush.bf16.msra.mxu2 %v4708_v56  ;;  %v4692_v56 = vor.u32 %v5097_v46, %v4691_v19  ;;  %v4675_v19 = vld [vmem:[%s7749_s3 + $0x668] sm:$0xf]  ;;  %v5093_v46 = vld [vmem:[%s7749_s3 + $0x674] sm:$0xf0] }
 0x52f   : > { %v2671_v48 = vpop.f32.mrf.mxu3  ;;  %3294 = vmatpush.bf16.msra.mxu0 %v4712_v22  ;;  %v4696_v22 = vor.u32 %v5095_v45, %v4693_v36  ;;  %v5091_v45 = vld [vmem:[%s7749_s3 + $0x66c] sm:$0xf]  ;;  %v4677_v36 = vld [vmem:[%s7749_s3 + $0x678] sm:$0xf0] }
 0x530   : > { %v7433_v28 = vadd.f32 %v2671_v48, %v2652_v54  ;;  %v5137_v54 = vld [vmem:[%s7749_s3 + $0x7d4] sm:$0xf0]  ;;  %v5135_v48 = vld [vmem:[%s7749_s3 + $0x7cc] sm:$0xf] }
 0x531   : > { %v4852_v9 = vor.u32 %v5137_v54, %v4851_v4  ;;  %v4856_v31 = vor.u32 %v5135_v48, %v4853_v10  ;;  %v4835_v4 = vld [vmem:[%s7749_s3 + $0x7a8] sm:$0xf]  ;;  %v5133_v54 = vld [vmem:[%s7749_s3 + $0x7b4] sm:$0xf0]  ;;  %v5131_v48 = vld [vmem:[%s7749_s3 + $0x7ac] sm:$0xf] }
 0x532   : > { %3257 = vmatpush.bf16.msra.mxu2 %v4692_v56  ;;  %v4836_v10 = vor.u32 %v5133_v54, %v4835_v4  ;;  %v4676_v56 = vor.u32 %v5093_v46, %v4675_v19  ;;  %v4819_v4 = vld [vmem:[%s7749_s3 + $0x788] sm:$0xf]  ;;  %v5129_v54 = vld [vmem:[%s7749_s3 + $0x794] sm:$0xf0] }
 0x533   : > { %3274 = vmatpush.bf16.msra.mxu3 %v4852_v9  ;;  %3312 = vmatpush.bf16.msrb.mxu1 %v4856_v31  ;;  %v4837_v9 = vld [vmem:[%s7749_s3 + $0x7b8] sm:$0xf0]  ;;  %v4659_v19 = vld [vmem:[%s7749_s3 + $0x648] sm:$0xf]  ;;  %v5089_v46 = vld [vmem:[%s7749_s3 + $0x654] sm:$0xf0] }
 0x534   : > { %3295 = vmatpush.bf16.msra.mxu0 %v4696_v22  ;;  %v4840_v31 = vor.u32 %v5131_v48, %v4837_v9  ;;  %v4680_v22 = vor.u32 %v5091_v45, %v4677_v36  ;;  %v5127_v48 = vld [vmem:[%s7749_s3 + $0x78c] sm:$0xf]  ;;  %v4820_v9 = vor.u32 %v5129_v54, %v4819_v4  ;;  %v4661_v36 = vld [vmem:[%s7749_s3 + $0x658] sm:$0xf0]  ;;  %v4803_v54 = vld [vmem:[%s7749_s3 + $0x768] sm:$0xf] }
 0x535   : > { %v5087_v45 = vld [vmem:[%s7749_s3 + $0x64c] sm:$0xf] }
 0x536   : > { %3258 = vmatpush.bf16.msra.mxu2 %v4676_v56  ;;  %v4660_v56 = vor.u32 %v5089_v46, %v4659_v19  ;;  %v4664_v4 = vor.u32 %v5087_v45, %v4661_v36  ;;  %v4643_v46 = vld [vmem:[%s7749_s3 + $0x628] sm:$0xf]  ;;  %v5083_v36 = vld [vmem:[%s7749_s3 + $0x62c] sm:$0xf] }
 0x537   : > { %3275 = vmatpush.bf16.msra.mxu3 %v4836_v10  ;;  %3313 = vmatpush.bf16.msrb.mxu1 %v4840_v31  ;;  %v4821_v10 = vld [vmem:[%s7749_s3 + $0x798] sm:$0xf0] }
 0x538   : > { %3296 = vmatpush.bf16.msra.mxu0 %v4680_v22  ;;  %v4824_v31 = vor.u32 %v5127_v48, %v4821_v10  ;;  %v715_v22 = vpop.xlane.xlu1 %714  ;;  %v5125_v48 = vld [vmem:[%s7749_s3 + $0x774] sm:$0xf0]  ;;  %v5123_v10 = vld [vmem:[%s7749_s3 + $0x76c] sm:$0xf] }
 0x539   : > { %v4804_v19 = vor.u32 %v5125_v48, %v4803_v54  ;;  %v4787_v48 = vld [vmem:[%s7749_s3 + $0x748] sm:$0xf]  ;;  %5273 = vrcp.f32 %v715_v22  ;;  %v5079_v22 = vld [vmem:[%s7749_s3 + $0x60c] sm:$0xf] }
 0x53a   : > { %3259 = vmatpush.bf16.msra.mxu2 %v4660_v56 }
 0x53b   : > { %3276 = vmatpush.bf16.msra.mxu3 %v4820_v9  ;;  %3314 = vmatpush.bf16.msrb.mxu1 %v4824_v31  ;;  %v4805_v9 = vld [vmem:[%s7749_s3 + $0x778] sm:$0xf0]  ;;  %v5085_v31 = vld [vmem:[%s7749_s3 + $0x634] sm:$0xf0] }
 0x53c   : > { %3297 = vmatpush.bf16.msra.mxu0 %v4664_v4  ;;  %v4808_v56 = vor.u32 %v5123_v10, %v4805_v9  ;;  %v4644_v45 = vor.u32 %v5085_v31, %v4643_v46  ;;  %v4645_v4 = vld [vmem:[%s7749_s3 + $0x638] sm:$0xf0]  ;;  %v5121_v10 = vld [vmem:[%s7749_s3 + $0x754] sm:$0xf0]  ;;  %v5119_v9 = vld [vmem:[%s7749_s3 + $0x74c] sm:$0xf] }
 0x53d   : > { %v4648_v54 = vor.u32 %v5083_v36, %v4645_v4  ;;  %v4788_v46 = vor.u32 %v5121_v10, %v4787_v48  ;;  %v4627_v31 = vld [vmem:[%s7749_s3 + $0x608] sm:$0xf]  ;;  %v4629_v4 = vld [vmem:[%s7749_s3 + $0x618] sm:$0xf0]  ;;  %v5117_v10 = vld [vmem:[%s7749_s3 + $0x734] sm:$0xf0] }
 0x53e   : > { %3260 = vmatpush.bf16.msra.mxu2 %v4644_v45  ;;  %v4771_v48 = vld [vmem:[%s7749_s3 + $0x728] sm:$0xf] }
 0x53f   : > { %3277 = vmatpush.bf16.msra.mxu3 %v4804_v19  ;;  %3315 = vmatpush.bf16.msrb.mxu1 %v4808_v56  ;;  %v4789_v19 = vld [vmem:[%s7749_s3 + $0x758] sm:$0xf0]  ;;  %v5081_v56 = vld [vmem:[%s7749_s3 + $0x614] sm:$0xf0] }
 0x540   : > { %3298 = vmatpush.bf16.msra.mxu0 %v4648_v54  ;;  %v4792_v45 = vor.u32 %v5119_v9, %v4789_v19  ;;  %v4628_v36 = vor.u32 %v5081_v56, %v4627_v31  ;;  %v4632_v54 = vor.u32 %v5079_v22, %v4629_v4  ;;  %v5115_v9 = vld [vmem:[%s7749_s3 + $0x72c] sm:$0xf]  ;;  %v1038_v19 = vpop.xlane.xlu1 %1037  ;;  %v4772_v31 = vor.u32 %v5117_v10, %v4771_v48  ;;  %v4755_v22 = vld [vmem:[%s7749_s3 + $0x708] sm:$0xf]  ;;  %v5113_v4 = vld [vmem:[%s7749_s3 + $0x714] sm:$0xf0]  ;;  %v2693_v48 = vpop.f32.mrf.mxu0 }
 0x541   : > { %v4756_v10 = vor.u32 %v5113_v4, %v4755_v22 }
 0x542   : > { %3261 = vmatpush.bf16.msra.mxu2 %v4628_v36  ;;  %v5274_v36 = vpop.eup %5273 }
 0x543   : > { %3278 = vmatpush.bf16.msra.mxu3 %v4788_v46  ;;  %3316 = vmatpush.bf16.msrb.mxu1 %v4792_v45  ;;  %v4773_v46 = vld [vmem:[%s7749_s3 + $0x738] sm:$0xf0] }
 0x544   : > { %3299 = vmatpush.bf16.msra.mxu0 %v4632_v54  ;;  %v4776_v45 = vor.u32 %v5115_v9, %v4773_v46  ;;  %v5111_v54 = vld [vmem:[%s7749_s3 + $0x70c] sm:$0xf]  ;;  %v4757_v9 = vld [vmem:[%s7749_s3 + $0x718] sm:$0xf0]  ;;  %v2655_v33 = vpop.f32.mrf.mxu2 }
 0x547   : > { %3279 = vmatpush.bf16.msra.mxu3 %v4772_v31  ;;  %3317 = vmatpush.bf16.msrb.mxu1 %v4776_v45  ;;  %v4760_v31 = vor.u32 %v5111_v54, %v4757_v9 }
 0x548   : > { %v717_v56 = vpop.xlane.xlu2 %716  ;;  %v2695_v17 = vpop.f32.mrf.mxu0 }
 0x549   : > { %5275 = vrcp.f32 %v717_v56 }
 0x54a   : > { %5277 = vrcp.f32 %v1038_v19  ;;  %v748_v19 = vmul.f32 %v5274_v36, %v7170_v58 }
 0x54b   : > { %3280 = vmatpush.bf16.msra.mxu3 %v4756_v10  ;;  %3318 = vmatpush.bf16.msrb.mxu1 %v4760_v31 }
 0x54c   : > { %v764_v35 = vpack.c.bf16 %v748_v19, %v748_v19  ;;  %v2657_v19 = vpop.f32.mrf.mxu2 }
 0x54e   : > { %v1117_v4 = vunpack.c.l.b16 %v764_v35 }
 0x54f   : > { %v5276_v46 = vpop.eup %5275  ;;  %v1036_v56 = vpop.xlane.xlu0 %1035 }
 0x550   : > { %v5278_v45 = vpop.eup %5277  ;;  %v749_v7 = vmul.f32 %v5276_v46, %v7231_v38  ;;  %5279 = vrcp.f32 %v1036_v56  ;;  %v2764_v56 = vpop.f32.mrf.mxu0 }
 0x551   : > { %v1070_v22 = vmul.f32 %v5278_v45, %v7205_v52 }
 0x552   : > { %v765_v30 = vpack.c.bf16 %v749_v7, %v749_v7 }
 0x553   : > { %v1086_v54 = vpack.c.bf16 %v1070_v22, %v1070_v22 }
 0x554   : > { %v1118_v27 = vunpack.c.l.b16 %v765_v30 }
 0x555   : > { %v2712_v26 = vpop.f32.mrf.mxu1  ;;  %v1166_v38 = vunpack.c.l.b16 %v1086_v54 }
 0x556   : > { %v5280_v57 = vpop.eup %5279  ;;  %v7590_v58 = vadd.f32 %v2712_v26, %v2693_v48  ;;  %v1126_v36 = vpack.c.b16 %v1118_v27, %v1117_v4 }
 0x557   : > { %v1069_v10 = vmul.f32 %v5280_v57, %v7244_v51  ;;  %v2726_v51 = vpop.f32.mrf.mxu2 }
 0x558   : > { %3191 = vmatmul.bf16.gmra.mxu2 %v1126_v36  ;;  %3229 = vmatmul.bf16.gmra.mxu0 %v1126_v36 }
 0x559   : > { %v1085_v9 = vpack.c.bf16 %v1069_v10, %v1069_v10 }
 0x55b   : > { %v1165_v31 = vunpack.c.l.b16 %v1085_v9  ;;  %v2674_v7 = vpop.f32.mrf.mxu3 }
 0x55c   : > { %v7593_v46 = vadd.f32 %v2674_v7, %v2655_v33 }
 0x55d   : > { %v2714_v52 = vpop.f32.mrf.mxu1  ;;  %v1174_v30 = vpack.c.b16 %v1166_v38, %v1165_v31 }
 0x55e   : > { %v7595_v35 = vadd.f32 %v2714_v52, %v2695_v17  ;;  %v2766_v17 = vpop.f32.mrf.mxu0 }
 0x55f   : > { %3210 = vmatmul.bf16.gmra.mxu3 %v1174_v30  ;;  %3248 = vmatmul.bf16.gmra.mxu1 %v1174_v30  ;;  %v2728_v9 = vpop.f32.mrf.mxu2 }
 0x563   : > { %v2676_v27 = vpop.f32.mrf.mxu3 }
 0x564   : > { %v7599_v57 = vadd.f32 %v2676_v27, %v2657_v19 }
 0x565   : > { %v2783_v48 = vpop.f32.mrf.mxu1 }
 0x566   : > { %v7603_v33 = vadd.f32 %v2783_v48, %v2764_v56  ;;  %v2769_v19 = vpop.f32.mrf.mxu0 }
 0x567   : > { %v2731_v27 = vpop.f32.mrf.mxu2 }
 0x568   : > { %7789 = vst [vmem:[#allocation24_spill] sm:$0xff] %v7603_v33  ;;  %3262 = vmatmul.bf16.vlgmr.msra.gmra.mxu2 %v7315_v53  ;;  %3300 = vmatmul.bf16.vlgmr.msra.gmra.mxu0 %v7315_v53 }
 0x56b   : > { %v2745_v22 = vpop.f32.mrf.mxu3 }
 0x56c   : > { %v7607_v4 = vadd.f32 %v2745_v22, %v2726_v51 }
 0x56d   : > { %v2785_v54 = vpop.f32.mrf.mxu1 }
 0x56e   : > { %7790 = vst [vmem:[#allocation25_spill] sm:$0xff] %v7607_v4  ;;  %v7609_v10 = vadd.f32 %v2785_v54, %v2766_v17 }
 0x56f   : > { %3281 = vmatmul.bf16.vlgmr.msra.gmra.mxu3 %v7379_v59  ;;  %3319 = vmatmul.bf16.vlgmr.msrb.gmra.mxu1 %v7379_v59  ;;  %v2771_v59 = vpop.f32.mrf.mxu0 }
 0x570   : > { %7791 = vst [vmem:[#allocation26_spill] sm:$0xff] %v7609_v10 }
 0x573   : > { %v2747_v31 = vpop.f32.mrf.mxu3 }
 0x574   : > { %v7615_v7 = vadd.f32 %v2747_v31, %v2728_v9  ;;  %v2733_v9 = vpop.f32.mrf.mxu2 }
 0x575   : > { %v2788_v53 = vpop.f32.mrf.mxu1 }
 0x576   : > { %7792 = vst [vmem:[#allocation27_spill] sm:$0xff] %v7615_v7  ;;  %v7619_v56 = vadd.f32 %v2788_v53, %v2769_v19 }
 0x577   : > { %v3225_v19 = vpop.f32.mrf.mxu0 }
 0x578   : > { %3267 = vmatmul.bf16.gmra.mxu2 %v1126_v36  ;;  %3305 = vmatmul.bf16.gmra.mxu0 %v1126_v36 }
 0x57b   : > { %v2750_v51 = vpop.f32.mrf.mxu3 }
 0x57c   : > { %v7621_v48 = vadd.f32 %v2750_v51, %v2731_v27  ;;  %v3187_v53 = vpop.f32.mrf.mxu2 }
 0x57d   : > { %v2790_v17 = vpop.f32.mrf.mxu1 }
 0x57e   : > { %7793 = vst [vmem:[#allocation28_spill] sm:$0xff] %v7621_v48  ;;  %v7623_v22 = vadd.f32 %v2790_v17, %v2771_v59 }
 0x57f   : > { %3286 = vmatmul.bf16.gmra.mxu3 %v1174_v30  ;;  %3324 = vmatmul.bf16.gmra.mxu1 %v1174_v30  ;;  %v3227_v51 = vpop.f32.mrf.mxu0 }
 0x583   : > { %v2752_v31 = vpop.f32.mrf.mxu3 }
 0x584   : > { %v7627_v52 = vadd.f32 %v2752_v31, %v2733_v9  ;;  %v3189_v45 = vpop.f32.mrf.mxu2 }
 0x586   : > { %7794 = vst [vmem:[#allocation29_spill] sm:$0xff] %v7627_v52 }
 0x5a0   : > { %v3244_v27 = vpop.f32.mrf.mxu1 }
 0x5a1   : > { %v3245_v43 = vadd.f32 %v3244_v27, %v3225_v19 }
 0x5a6   : > { %v3206_v38 = vpop.f32.mrf.mxu3 }
 0x5a7   : > { %v3207_v52 = vadd.f32 %v3206_v38, %v3187_v53  ;;  %v7801_v38 = vpack.c.bf16 %v7623_v22, %v7619_v56  ;;  %v7812_v53 = vld [vmem:[#allocation14_spill] sm:$0xff] }
 0x5a8   : > { %v3246_v59 = vpop.f32.mrf.mxu1  ;;  %v7816_v22 = vld [vmem:[#allocation18_spill] sm:$0xff] }
 0x5a9   : > { %v3247_v12 = vadd.f32 %v3246_v59, %v3227_v51  ;;  %v7813_v51 = vld [vmem:[#allocation27_spill] sm:$0xff]  ;;  %v7814_v59 = vld [vmem:[#allocation25_spill] sm:$0xff] }
 0x5aa   : > { %v7815_v56 = vpack.c.bf16 %v7813_v51, %v7814_v59 }
 0x5ab   : > { %v3355_v4 = vpack.c.bf16 %v3247_v12, %v3245_v43  ;;  %v7796_v12 = vpack.c.bf16 %v7399_v50, %v7381_v32  ;;  %v7799_v50 = vpack.c.bf16 %v7433_v28, %v7394_v21 }
 0x5ae   : > { %v3208_v26 = vpop.f32.mrf.mxu3 }
 0x5af   : > { %v3209_v11 = vadd.f32 %v3208_v26, %v3189_v45 }
 0x5b1   : > { %v3354_v10 = vpack.c.bf16 %v3209_v11, %v3207_v52  ;;  %v7798_v11 = vpack.c.bf16 %v7224_v44, %v7190_v41  ;;  %v1636_v41 = vadd.f32 %v6741_v29, %v6553_v3  ;;  %v1598_v3 = vadd.f32 %v6324_v0, %v6132_v16  ;;  %v7806_v52 = vld [vmem:[#allocation28_spill] sm:$0xff] }
 0x5d5   : > { %v3230_v17 = vpop.f32.mrf.mxu0 }
 0x5db   : > { %v3192_v30 = vpop.f32.mrf.mxu2 }
 0x5dc   : > { %v3249_v40 = vpop.f32.mrf.mxu1 }
 0x5dd   : > { %v3232_v49 = vpop.f32.mrf.mxu0  ;;  %v3250_v9 = vadd.f32 %v3249_v40, %v3230_v17  ;;  %v7795_v40 = vpack.c.bf16 %v7595_v35, %v7590_v58  ;;  %v1641_v35 = vadd.f32 %v6879_v60, %v6657_v39  ;;  %v1603_v60 = vadd.f32 %v6438_v1, %v6208_v15  ;;  %v309_v15 = vld [vmem:[%s7750_s4] sm:$0x1]  ;;  %v7817_v17 = vld [vmem:[#allocation16_spill] sm:$0xff] }
 0x5df   : > { %v3335_v44 = vpack.c.bf16 %v1641_v35, %v6755_v37  ;;  %v3334_v29 = vpack.c.bf16 %v1603_v60, %v6389_v20 }
 0x5e2   : > { %v3211_v54 = vpop.f32.mrf.mxu3 }
 0x5e3   : > { %v3194_v24 = vpop.f32.mrf.mxu2  ;;  %v3212_v7 = vadd.f32 %v3211_v54, %v3192_v30  ;;  %v7808_v54 = vld [vmem:[#allocation22_spill] sm:$0xff]  ;;  %v7818_v30 = vpack.c.bf16 %v7816_v22, %v7817_v17 }
 0x5e4   : > { %v3251_v25 = vpop.f32.mrf.mxu1 }
 0x5e5   : > { %v3252_v31 = vadd.f32 %v3251_v25, %v3232_v49  ;;  %v3301_v23 = vpop.f32.mrf.mxu0 }
 0x5e7   : > { %v3359_v36 = vpack.c.bf16 %v3252_v31, %v3250_v9  ;;  %v7819_v9 = vld [vmem:[#allocation8_spill] sm:$0xff]  ;;  %v7820_v31 = vld [vmem:[#allocation7_spill] sm:$0xff] }
 0x5e9   : > { %3384 = vmatpush.bf16.msrb.mxu3 %v3359_v36  ;;  %v7809_v36 = vld [vmem:[#allocation20_spill] sm:$0xff] }
 0x5ea   : > { %v3213_v8 = vpop.f32.mrf.mxu3  ;;  %v7810_v19 = vpack.c.bf16 %v7808_v54, %v7809_v36 }
 0x5eb   : > { %v3214_v2 = vadd.f32 %v3213_v8, %v3194_v24  ;;  %v3263_v62 = vpop.f32.mrf.mxu2  ;;  %v7797_v8 = vpack.c.bf16 %v7599_v57, %v7593_v46  ;;  %v7800_v46 = vpack.c.bf16 %v7234_v63, %v7221_v42 }
 0x5ec   : > { %v3320_v5 = vpop.f32.mrf.mxu1 }
 0x5ed   : > { %v3358_v48 = vpack.c.bf16 %v3214_v2, %v3212_v7  ;;  %3385 = vmatpush.bf16.msrb.mxu3 %v3355_v4  ;;  %v3303_v33 = vpop.f32.mrf.mxu0  ;;  %v2173_v2 = vadd.f32 %v7130_v47, %v7072_v14  ;;  %v2135_v47 = vadd.f32 %v7178_v6, %v7117_v55  ;;  %v3331_v55 = vpack.c.bf16 %v1636_v41, %v6700_v13  ;;  %v7805_v7 = vld [vmem:[#allocation29_spill] sm:$0xff] }
 0x5ee   : > { %v3330_v13 = vpack.c.bf16 %v1598_v3, %v6275_v18  ;;  %v3321_v63 = vadd.f32 %v3320_v5, %v3301_v23  ;;  %v7802_v18 = vld [vmem:[#allocation26_spill] sm:$0xff]  ;;  %v7803_v23 = vld [vmem:[#allocation24_spill] sm:$0xff]  ;;  %v7831_v41 = vld [vmem:[#allocation17_spill] sm:$0xff] }
 0x5ef   : > { %3371 = vmatpush.bf16.msrb.mxu2 %v3358_v48  ;;  %v3339_v32 = vpack.c.bf16 %v2173_v2, %v7083_v61  ;;  %v3338_v61 = vpack.c.bf16 %v2135_v47, %v7128_v34  ;;  %v7804_v5 = vpack.c.bf16 %v7802_v18, %v7803_v23  ;;  %v7807_v48 = vpack.c.bf16 %v7805_v7, %v7806_v52  ;;  %v7830_v47 = vld [vmem:[#allocation19_spill] sm:$0xff]  ;;  %v310_v3 = vld [vmem:[%s7751_s5] sm:$0xf] }
 0x5f0   : > { %v3365_v23 = vperm.slane %v310_v3, 2 }
 0x5f1   : > { %3386 = vmatpush.bf16.msrb.mxu3 %v7795_v40  ;;  %v1712_v40 = vadd.f32 %v7820_v31, %v7819_v9 }
 0x5f2   : > { %v3282_v25 = vpop.f32.mrf.mxu3 }
 0x5f3   : > { %3372 = vmatpush.bf16.msrb.mxu2 %v3354_v10  ;;  %v3265_v43 = vpop.f32.mrf.mxu2  ;;  %v3283_v10 = vadd.f32 %v3282_v25, %v3263_v62  ;;  %v7811_v62 = vld [vmem:[#allocation12_spill] sm:$0xff]  ;;  %v7821_v25 = vld [vmem:[#allocation9_spill] sm:$0xff] }
 0x5f4   : > { %v3322_v49 = vpop.f32.mrf.mxu1  ;;  %v1717_v27 = vadd.f32 %v7812_v53, %v7811_v62 }
 0x5f5   : > { %3387 = vmatpush.bf16.msrb.mxu3 %v7796_v12  ;;  %v3306_v24 = vpop.f32.mrf.mxu0  ;;  %v3323_v1 = vadd.f32 %v3322_v49, %v3303_v33  ;;  %v7822_v12 = vld [vmem:[#allocation23_spill] sm:$0xff] }
 0x5f6   : > { %v3337_v49 = vpack.c.bf16 %v1717_v27, %v7821_v25 }
 0x5f7   : > { %3373 = vmatpush.bf16.msrb.mxu2 %v7797_v8  ;;  %v3357_v16 = vpack.c.bf16 %v3323_v1, %v3321_v63  ;;  %v7825_v8 = vld [vmem:[#allocation5_spill] sm:$0xff] }
 0x5f9   : > { %3388 = vmatpush.bf16.msrb.mxu3 %v7798_v11  ;;  %v7826_v11 = vld [vmem:[#allocation15_spill] sm:$0xff] }
 0x5fa   : > { %v3284_v58 = vpop.f32.mrf.mxu3 }
 0x5fb   : > { %3374 = vmatpush.bf16.msrb.mxu2 %v7799_v50  ;;  %v3268_v39 = vpop.f32.mrf.mxu2  ;;  %v3285_v45 = vadd.f32 %v3284_v58, %v3265_v43  ;;  %v7823_v43 = vld [vmem:[#allocation21_spill] sm:$0xff]  ;;  %v7827_v58 = vld [vmem:[#allocation6_spill] sm:$0xff] }
 0x5fc   : > { %v3325_v14 = vpop.f32.mrf.mxu1  ;;  %v7824_v2 = vpack.c.bf16 %v7822_v12, %v7823_v43  ;;  %v3333_v35 = vpack.c.bf16 %v1712_v40, %v7827_v58  ;;  %v7829_v50 = vld [vmem:[#allocation13_spill] sm:$0xff] }
 0x5fd   : > { %3389 = vmatpush.bf16.msrb.mxu3 %v3339_v32  ;;  %v3308_v6 = vpop.f32.mrf.mxu0  ;;  %v3326_v37 = vadd.f32 %v3325_v14, %v3306_v24  ;;  %v3356_v33 = vpack.c.bf16 %v3285_v45, %v3283_v10  ;;  %v1679_v24 = vadd.f32 %v7826_v11, %v7825_v8  ;;  %v7828_v32 = vld [vmem:[#allocation4_spill] sm:$0xff]  ;;  %v3366_v45 = vperm.slane %v310_v3, 3 }
 0x5fe   : > { %v1677_v14 = vadd.f32 %v7829_v50, %v7828_v32 }
 0x5ff   : > { %3375 = vmatpush.bf16.msrb.mxu2 %v7800_v46  ;;  %v7833_v46 = vld [vmem:[#allocation3_spill] sm:$0xff] }
 0x601   : > { %3390 = vmatpush.bf16.msrb.mxu3 %v3335_v44  ;;  %v7832_v44 = vpack.c.bf16 %v7830_v47, %v7831_v41 }
 0x602   : > { %v3287_v21 = vpop.f32.mrf.mxu3 }
 0x603   : > { %3376 = vmatpush.bf16.msrb.mxu2 %v3338_v61  ;;  %v3270_v26 = vpop.f32.mrf.mxu2  ;;  %v3288_v0 = vadd.f32 %v3287_v21, %v3268_v39  ;;  %v7834_v39 = vld [vmem:[#allocation11_spill] sm:$0xff]  ;;  %v3336_v61 = vpack.c.bf16 %v1679_v24, %v1677_v14  ;;  %v7835_v21 = vld [vmem:[#allocation2_spill] sm:$0xff] }
 0x604   : > { %v3327_v28 = vpop.f32.mrf.mxu1  ;;  %v1674_v60 = vadd.f32 %v7834_v39, %v7833_v46 }
 0x605   : > { %v3328_v42 = vadd.f32 %v3327_v28, %v3308_v6  ;;  %3391 = vmatpush.bf16.msrb.mxu3 %v3331_v55  ;;  %v7836_v55 = vld [vmem:[#allocation10_spill] sm:$0xff] }
 0x606   : > { %v1672_v6 = vadd.f32 %v7836_v55, %v7835_v21 }
 0x607   : > { %v3361_v34 = vpack.c.bf16 %v3328_v42, %v3326_v37  ;;  %3377 = vmatpush.bf16.msrb.mxu2 %v3334_v29  ;;  %v3364_v37 = vperm.slane %v310_v3, 1 }
 0x608   : > { %3392 = vmatmul.bf16.vlgmr.msrb.gmra.mxu3 %v309_v15  ;;  %v3332_v28 = vpack.c.bf16 %v1674_v60, %v1672_v6 }
 0x609   : > { %3410 = vmatpush.bf16.msra.mxu1 %v3361_v34  ;;  %v3363_v34 = vperm.slane %v310_v3, 0 }
 0x60a   : > { %v3289_v57 = vpop.f32.mrf.mxu3 }
 0x60b   : > { %v3290_v20 = vadd.f32 %v3289_v57, %v3270_v26  ;;  %3378 = vmatpush.bf16.msrb.mxu2 %v3330_v13 }
 0x60d   : > { %v3360_v4 = vpack.c.bf16 %v3290_v20, %v3288_v0  ;;  %3411 = vmatpush.bf16.msra.mxu1 %v3357_v16 }
 0x60e   : > { %3379 = vmatmul.bf16.vlgmr.msrb.gmra.mxu2 %v309_v15 }
 0x60f   : > { %3397 = vmatpush.bf16.msrb.mxu0 %v3360_v4 }
 0x611   : > { %3412 = vmatpush.bf16.msra.mxu1 %v7801_v38 }
 0x613   : > { %3398 = vmatpush.bf16.msrb.mxu0 %v3356_v33 }
 0x615   : > { %3413 = vmatpush.bf16.msra.mxu1 %v7804_v5 }
 0x617   : > { %3399 = vmatpush.bf16.msrb.mxu0 %v7807_v48 }
 0x619   : > { %3414 = vmatpush.bf16.msra.mxu1 %v7810_v19 }
 0x61b   : > { %3400 = vmatpush.bf16.msrb.mxu0 %v7815_v56 }
 0x61d   : > { %3415 = vmatpush.bf16.msra.mxu1 %v7818_v30 }
 0x61f   : > { %3401 = vmatpush.bf16.msrb.mxu0 %v7824_v2 }
 0x621   : > { %3416 = vmatpush.bf16.msra.mxu1 %v3337_v49 }
 0x623   : > { %3402 = vmatpush.bf16.msrb.mxu0 %v7832_v44 }
 0x625   : > { %3417 = vmatpush.bf16.msra.mxu1 %v3333_v35 }
 0x627   : > { %3403 = vmatpush.bf16.msrb.mxu0 %v3336_v61 }
 0x628   : > { %3418 = vmatmul.bf16.vlgmr.msra.gmra.mxu1 %v309_v15 }
 0x62b   : > { %3404 = vmatpush.bf16.msrb.mxu0 %v3332_v28 }
 0x62e   : > { %3405 = vmatmul.bf16.vlgmr.msrb.gmra.mxu0 %v309_v15 }
 0x68b   : > { %v3393_v29 = vpop.f32.mrf.mxu3 }
 0x68c   : > { %v3394_v1 = vadd.f32 %v3393_v29, %v3364_v37 }
 0x68e   : > { %v3424_v63 = vsub.f32 0.0, %v3394_v1 }
 0x690   : > { %v3429_v16 = vmul.f32 1.442695, %v3424_v63 }
 0x691   : > { %v3380_v42 = vpop.f32.mrf.mxu2 }
 0x692   : > { %v3381_v26 = vadd.f32 %v3380_v42, %v3363_v34  ;;  %5281 = vpow2.f32 %v3429_v16 }
 0x693   : > { %v3395_v13 = vpop.f32.mrf.mxu3 }
 0x694   : > { %v3423_v0 = vsub.f32 0.0, %v3381_v26 }
 0x696   : > { %v3427_v20 = vmul.f32 1.442695, %v3423_v0 }
 0x698   : > { %5283 = vpow2.f32 %v3427_v20  ;;  %v5282_v15 = vpop.eup %5281 }
 0x699   : > { %v3382_v57 = vpop.f32.mrf.mxu2  ;;  %v3436_v33 = vadd.f32 1.0, %v5282_v15 }
 0x69b   : > { %5285 = vrcp.f32 %v3436_v33  ;;  %v3463_v12 = vand.u32 2147483647, %v3436_v33  ;;  %vm3459_vm3 = vweird.f32 %v3436_v33  ;;  %v3465_v2 = vand.u32 2147483648, %v3436_v33 }
 0x69d   : > { %vm7715_vm6 = vcmp.eq.f32.partialorder %v3463_v12, 8.507059e+37  ;;  %v3466_v47 = vor.u32 1.1754944e-38, %v3465_v2 }
 0x69e   : > { %v5284_v38 = vpop.eup %5283 }
 0x69f   : > { %v3435_v7 = vadd.f32 1.0, %v5284_v38 }
 0x6a1   : > { %v5286_v62 = vpop.eup %5285  ;;  %vm3444_vm7 = vweird.f32 %v3435_v7  ;;  %v3448_v41 = vand.u32 2147483647, %v3435_v7  ;;  %v3450_v44 = vand.u32 2147483648, %v3435_v7 }
 0x6a2   : > { %v3455_v59 = vmul.f32 %v5286_v62, %v3436_v33  ;;  %vm3460_vm4 = vweird.f32 %v5286_v62 }
 0x6a3   : > { %vm7711_vm5 = vmor %vm3459_vm3, %vm3460_vm4  ;;  %vm3449_vm14 = vcmp.eq.f32.partialorder %v3448_v41, 8.507059e+37  ;;  %v3451_v1 = vor.u32 1.1754944e-38, %v3450_v44  ;;  %vm3507_vm4 = vcmask 1045508  }
 0x6a4   : > { %v3456_v17 = vsub.f32 1.0, %v3455_v59 }
 0x6a5   : > { %v3419_v4 = vpop.f32.mrf.mxu1 }
 0x6a6   : > { %v3420_v10 = vadd.f32 %v3419_v4, %v3366_v45  ;;  %v3457_v40 = vmul.f32 %v5286_v62, %v3456_v17 }
 0x6a8   : > { %v3426_v18 = vsub.f32 0.0, %v3420_v10  ;;  %v3458_v8 = vadd.f32 %v5286_v62, %v3457_v40 }
 0x6aa   : > { %v3433_v5 = vmul.f32 1.442695, %v3426_v18  ;;  %v3462_v39 = vsel %vm7711_vm5, %v5286_v62, %v3458_v8  ;;  %vm3509_vm5 = vcmask 1043456  }
 0x6ab   : > { %v3406_v52 = vpop.f32.mrf.mxu0  ;;  %v3467_v42 = vsel %vm7715_vm6, %v3466_v47, %v3462_v39 }
 0x6ac   : > { %5287 = vpow2.f32 %v3433_v5  ;;  %v3407_v48 = vadd.f32 %v3406_v52, %v3365_v23  ;;  %v3503_v16 = vrot.slane %v3467_v42, 6 }
 0x6ad   : > { %v3421_v54 = vpop.f32.mrf.mxu1  ;;  %5289 = vrcp.f32 %v3435_v7 }
 0x6ae   : > { %v3425_v36 = vsub.f32 0.0, %v3407_v48 }
 0x6b0   : > { %v3431_v19 = vmul.f32 1.442695, %v3425_v36 }
 0x6b2   : > { %v5288_v53 = vpop.eup %5287  ;;  %5291 = vpow2.f32 %v3431_v19 }
 0x6b3   : > { %v3438_v27 = vadd.f32 1.0, %v5288_v53  ;;  %v3408_v51 = vpop.f32.mrf.mxu0  ;;  %v5290_v56 = vpop.eup %5289 }
 0x6b4   : > { %v3440_v30 = vmul.f32 %v5290_v56, %v3435_v7  ;;  %vm3445_vm8 = vweird.f32 %v5290_v56 }
 0x6b5   : > { %5293 = vrcp.f32 %v3438_v27  ;;  %vm3489_vm9 = vweird.f32 %v3438_v27  ;;  %v3495_v46 = vand.u32 2147483648, %v3438_v27  ;;  %vm7722_vm11 = vmor %vm3444_vm7, %vm3445_vm8  ;;  %v3493_v21 = vand.u32 2147483647, %v3438_v27 }
 0x6b6   : > { %v3441_v25 = vsub.f32 1.0, %v3440_v30 }
 0x6b7   : > { %v3496_v34 = vor.u32 1.1754944e-38, %v3495_v46  ;;  %vm3494_vm15 = vcmp.eq.f32.partialorder %v3493_v21, 8.507059e+37 }
 0x6b8   : > { %v5292_v22 = vpop.eup %5291  ;;  %v3442_v11 = vmul.f32 %v5290_v56, %v3441_v25 }
 0x6b9   : > { %v3437_v9 = vadd.f32 1.0, %v5292_v22 }
 0x6ba   : > { %v3443_v60 = vadd.f32 %v5290_v56, %v3442_v11 }
 0x6bb   : > { %v5294_v31 = vpop.eup %5293  ;;  %5295 = vrcp.f32 %v3437_v9  ;;  %v3480_v28 = vand.u32 2147483648, %v3437_v9  ;;  %v3478_v37 = vand.u32 2147483647, %v3437_v9  ;;  %vm3474_vm1 = vweird.f32 %v3437_v9 }
 0x6bc   : > { %v3485_v49 = vmul.f32 %v5294_v31, %v3438_v27  ;;  %vm3490_vm10 = vweird.f32 %v5294_v31  ;;  %v3447_v13 = vsel %vm7722_vm11, %v5290_v56, %v3443_v60 }
 0x6bd   : > { %vm7726_vm12 = vmor %vm3489_vm9, %vm3490_vm10  ;;  %v3481_v57 = vor.u32 1.1754944e-38, %v3480_v28  ;;  %vm3479_vm3 = vcmp.eq.f32.partialorder %v3478_v37, 8.507059e+37  ;;  %v3452_v20 = vsel %vm3449_vm14, %v3451_v1, %v3447_v13 }
 0x6be   : > { %v3486_v43 = vsub.f32 1.0, %v3485_v49  ;;  %v3506_v10 = vsel %vm391_vm0, %v3452_v20, %v3503_v16 }
 0x6c0   : > { %v3487_v24 = vmul.f32 %v5294_v31, %v3486_v43 }
 0x6c1   : > { %v5296_v58 = vpop.eup %5295 }
 0x6c2   : > { %v3488_v50 = vadd.f32 %v5294_v31, %v3487_v24  ;;  %v3470_v14 = vmul.f32 %v5296_v58, %v3437_v9  ;;  %vm3475_vm13 = vweird.f32 %v5296_v58 }
 0x6c3   : > { %vm3476_vm2 = vmor %vm3474_vm1, %vm3475_vm13 }
 0x6c4   : > { %v3471_v55 = vsub.f32 1.0, %v3470_v14  ;;  %v3492_v3 = vsel %vm7726_vm12, %v5294_v31, %v3488_v50 }
 0x6c5   : > { %v3497_v26 = vsel %vm3494_vm15, %v3496_v34, %v3492_v3 }
 0x6c6   : > { %v3472_v29 = vmul.f32 %v5296_v58, %v3471_v55  ;;  %v3505_v15 = vrot.slane %v3497_v26, 2 }
 0x6c8   : > { %v3473_v63 = vadd.f32 %v5296_v58, %v3472_v29 }
 0x6ca   : > { %v3477_v0 = vsel %vm3476_vm2, %v5296_v58, %v3473_v63 }
 0x6cb   : > { %v3482_v45 = vsel %vm3479_vm3, %v3481_v57, %v3477_v0 }
 0x6cc   : > { %v3504_v4 = vrot.slane %v3482_v45, 4 }
 0x6ce   : > { %v3508_v33 = vsel %vm3507_vm4, %v3504_v4, %v3505_v15 }
 0x6cf   : > { %v3510_v38 = vsel %vm3509_vm5, %v3506_v10, %v3508_v33 }
 0x6d0   : > { %3512 = vst [vmem:[%s253_s8] sm:$0xff] %v3510_v38 }
 0x6d1 PF: > { %s16_s21 = sadd.s32 1, %s5303_s21  }
 0x6d2   : > { %p13_p5 = scmp.ge.s32.totalorder %s16_s21, 4  }
 0x6d4   :  { %15 = sbr.rel (!%p13_p5) target bundleno = 1 (0x1), region = 78 }

</bundles_post_ra>
